<compile_context>
chip_gen: v7x
topology: tpu7x:2x2x1
jax: 0.10.0
libtpu: 0.0.40
codegen_flags: <defaults>
</compile_context>

<pallas_src>
import numpy as np

import jax
import jax.numpy as jnp
from jax.experimental import pallas as pl
from jax.experimental.pallas import tpu as pltpu


MAX_BATCH_TILE = 128           # images per grid step (upper bound)
MATMUL_DTYPE = jnp.float32     # set to jnp.bfloat16 on v6e/v7x for 2x MXU rate


# ---------------------------------------------------------------------------
# Fused kernel: conv1 -> pool/relu -> conv2 -> pool/relu -> fc1 -> fc2 -> lsm
# ---------------------------------------------------------------------------
def net_fused_kernel(x_ref, t1_ref, s1e_ref, s1o_ref, b1_ref,
                     t2_ref, s2e_ref, s2o_ref, b2_ref,
                     wf1_ref, bf1_ref, wf2_ref, bf2_ref,
                     out_ref, wm_ref, p1_ref, wm2_ref, fcin_ref):
    f32 = jnp.float32
    md = MATMUL_DTYPE
    B = x_ref.shape[0]

    # ---- stage 1: conv1 (1->10, k5) -> 2x2 maxpool -> relu -----------------
    # conv1 as 5 banded matmuls with the whole batch folded into M.
    # c1[b*24 + y, c*24 + x] = conv1(x)[b, c, y, x]   (bias added after pool)
    c1 = None
    for di in range(5):
        xs = x_ref[:, di:di + 24, :].reshape(B * 24, 28)          # (B*24, 28)
        d = jnp.dot(xs.astype(md), t1_ref[di],
                    preferred_element_type=f32)                   # (B*24, 240)
        c1 = d if c1 is None else c1 + d

    # width pooling: even/odd column selection matmuls + max (lane axis)
    c1m = c1.astype(md)
    wm = jnp.maximum(
        jnp.dot(c1m, s1e_ref[...], preferred_element_type=f32),
        jnp.dot(c1m, s1o_ref[...], preferred_element_type=f32))   # (B*24, 120)
    wm_ref[...] = wm.reshape(B, 24, 120)

    # height pooling (+ bias + relu): adjacent-row max assembled into p1
    b1row = b1_ref[...]                                           # (1, 120)
    for i in range(12):
        pr = jnp.maximum(wm_ref[:, 2 * i, :], wm_ref[:, 2 * i + 1, :])
        p1_ref[:, i, :] = jnp.maximum(pr + b1row, 0.0)            # (B, 120)

    # ---- stage 2: conv2 (10->20, k5) -> dropout2d(eval) -> pool -> relu ----
    # TODO(synk): Dropout2d is an eval-mode identity here.
    c2 = None
    for di in range(5):
        ps = p1_ref[:, di:di + 8, :].reshape(B * 8, 120)          # (B*8, 120)
        d = jnp.dot(ps.astype(md), t2_ref[di],
                    preferred_element_type=f32)                   # (B*8, 160)
        c2 = d if c2 is None else c2 + d

    c2m = c2.astype(md)
    wm2 = jnp.maximum(
        jnp.dot(c2m, s2e_ref[...], preferred_element_type=f32),
        jnp.dot(c2m, s2o_ref[...], preferred_element_type=f32))   # (B*8, 80)
    wm2_ref[...] = wm2.reshape(B, 8, 80)

    # height pooling (+ bias + relu) written lane-dense into the fc1 input
    b2row = b2_ref[...]                                           # (1, 80)
    for i in range(4):
        pr = jnp.maximum(wm2_ref[:, 2 * i, :], wm2_ref[:, 2 * i + 1, :])
        fcin_ref[:, i * 80:(i + 1) * 80] = jnp.maximum(pr + b2row, 0.0)

    # ---- fc1 -> relu -> dropout(eval) -> fc2 -> relu -> log_softmax --------
    h = jnp.dot(fcin_ref[...].astype(md), wf1_ref[...],
                preferred_element_type=f32)                       # (B, 64)
    h = jnp.maximum(h + bf1_ref[...], 0.0)

    logits = jnp.dot(h.astype(md), wf2_ref[...],
                     preferred_element_type=f32)                  # (B, 128)
    logits = jnp.maximum(logits + bf2_ref[...], 0.0)
    lane = jax.lax.broadcasted_iota(jnp.int32, logits.shape, 1)
    logits = jnp.where(lane < 10, logits, -1e30)     # mask padded output lanes
    m = jnp.max(logits, axis=-1, keepdims=True)
    s = logits - m
    lse = jnp.log(jnp.sum(jnp.exp(s), axis=-1, keepdims=True))
    out_ref[...] = s - lse


# ---------------------------------------------------------------------------
# Wrapper
# ---------------------------------------------------------------------------
def _const_index_map(rank):
    def index_map(i):
        return (0,) * rank
    return index_map


def _const_spec(a):
    return pl.BlockSpec(a.shape, _const_index_map(a.ndim))


def _round_up(n, m):
    return ((n + m - 1) // m) * m


def _pick_batch_tile(n):
    """Images per grid step: big enough to fill the MXU / amortize per-step
    overhead, but kept to >=2 grid steps when possible (v7x has 2 TCs)."""
    if n > MAX_BATCH_TILE:
        return MAX_BATCH_TILE
    if n >= 16:
        return _round_up((n + 1) // 2, 8)
    return 8


def net_forward(x_nchw, prepped):
    n = x_nchw.shape[0]
    x = x_nchw.reshape(n, 28, 28).astype(jnp.float32)
    bt = _pick_batch_tile(n)
    pad = (-n) % bt
    if pad:
        x = jnp.concatenate([x, jnp.zeros((pad, 28, 28), jnp.float32)], axis=0)
    n_pad = n + pad

    out = pl.pallas_call(
        net_fused_kernel,
        out_shape=jax.ShapeDtypeStruct((n_pad, 128), jnp.float32),
        grid_spec=pltpu.PrefetchScalarGridSpec(
            num_scalar_prefetch=0,
            grid=(n_pad // bt,),
            in_specs=[pl.BlockSpec((bt, 28, 28), lambda i: (i, 0, 0))]
                     + [_const_spec(a) for a in prepped],
            out_specs=pl.BlockSpec((bt, 128), lambda i: (i, 0)),
            scratch_shapes=[pltpu.VMEM((bt, 24, 120), jnp.float32),
                            pltpu.VMEM((bt, 12, 120), jnp.float32),
                            pltpu.VMEM((bt, 8, 80), jnp.float32),
                            pltpu.VMEM((bt, 320), jnp.float32)],
        ),
        compiler_params=pltpu.CompilerParams(
            dimension_semantics=("parallel",),
            vmem_limit_bytes=48 * 1024 * 1024),
    )(x, *prepped)
    return out[:n, :10]


# ---------------------------------------------------------------------------
# One-time parameter prep (all layout transforms hoisted out of the hot path)
# ---------------------------------------------------------------------------
def prepare_params(params):
    w1 = np.asarray(params["w1"], np.float32)    # (10, 1, 5, 5)
    b1 = np.asarray(params["b1"], np.float32)    # (10,)
    w2 = np.asarray(params["w2"], np.float32)    # (20, 10, 5, 5)
    b2 = np.asarray(params["b2"], np.float32)    # (20,)
    wf1 = np.asarray(params["wf1"], np.float32)  # (50, 320)
    bf1 = np.asarray(params["bf1"], np.float32)  # (50,)
    wf2 = np.asarray(params["wf2"], np.float32)  # (10, 50)
    bf2 = np.asarray(params["bf2"], np.float32)  # (10,)

    # conv1 as banded matrices: c1[., c*24+xo] = sum_di x_rows(y+di) @ t1[di]
    t1 = np.zeros((5, 28, 240), np.float32)
    for di in range(5):
        for c in range(10):
            for xo in range(24):
                t1[di, xo:xo + 5, c * 24 + xo] = w1[c, 0, di, :]

    # stage-1 width pooling: even / odd column selections within each channel
    s1e = np.zeros((240, 120), np.float32)
    s1o = np.zeros((240, 120), np.float32)
    for c in range(10):
        for j in range(12):
            s1e[c * 24 + 2 * j,     c * 12 + j] = 1.0
            s1o[c * 24 + 2 * j + 1, c * 12 + j] = 1.0
    b1l = np.repeat(b1, 12)[None, :]                     # (1, 120)

    # conv2 as banded matrices over (cin, width) lanes
    t2 = np.zeros((5, 120, 160), np.float32)
    for di in range(5):
        for co in range(20):
            for ci in range(10):
                for xo in range(8):
                    t2[di, ci * 12 + xo:ci * 12 + xo + 5, co * 8 + xo] = \
                        w2[co, ci, di, :]

    s2e = np.zeros((160, 80), np.float32)
    s2o = np.zeros((160, 80), np.float32)
    for co in range(20):
        for j in range(4):
            s2e[co * 8 + 2 * j,     co * 4 + j] = 1.0
            s2o[co * 8 + 2 * j + 1, co * 4 + j] = 1.0
    b2l = np.repeat(b2, 4)[None, :]                      # (1, 80)

    # fc1 as a single (320, 64) matrix; rows follow the kernel's fcin lane
    # order (i*80 + co*4 + w  <->  PyTorch flat index co*16 + i*4 + w),
    # 50 outputs padded to 64 lanes.
    wf1p = np.zeros((320, 64), np.float32)
    for i in range(4):
        for co in range(20):
            for w in range(4):
                wf1p[i * 80 + co * 4 + w, :50] = wf1[:, co * 16 + i * 4 + w]
    bf1l = np.zeros((1, 64), np.float32)
    bf1l[0, :50] = bf1

    # fc2: transpose + pad to a lane-dense (64, 128) weight.
    wf2p = np.zeros((64, 128), np.float32)
    wf2p[:50, :10] = wf2.T
    bf2l = np.zeros((1, 128), np.float32)
    bf2l[0, :10] = bf2

    def mat(a):     # matmul operands: optionally bf16 on v6e/v7x
        return jnp.asarray(a, MATMUL_DTYPE)

    def vec(a):     # bias rows: added post-accumulation, keep f32
        return jnp.asarray(a, jnp.float32)

    return (mat(t1), mat(s1e), mat(s1o), vec(b1l),
            mat(t2), mat(s2e), mat(s2o), vec(b2l),
            mat(wf1p), vec(bf1l), mat(wf2p), vec(bf2l))


# ---------------------------------------------------------------------------
# Pure-JAX reference (for numerical verification)
# ---------------------------------------------------------------------------
def net_reference(x_nchw, params):
    hp = jax.lax.Precision.HIGHEST
    y = jax.lax.conv_general_dilated(
        x_nchw.astype(jnp.float32), params["w1"], (1, 1), "VALID",
        dimension_numbers=("NCHW", "OIHW", "NCHW"), precision=hp)
    y = y + params["b1"][None, :, None, None]
    n, c, h, w = y.shape
    y = y.reshape(n, c, h // 2, 2, w // 2, 2).max(axis=(3, 5))
    y = jnp.maximum(y, 0.0)

    y = jax.lax.conv_general_dilated(
        y, params["w2"], (1, 1), "VALID",
        dimension_numbers=("NCHW", "OIHW", "NCHW"), precision=hp)
    y = y + params["b2"][None, :, None, None]
    n, c, h, w = y.shape
    y = y.reshape(n, c, h // 2, 2, w // 2, 2).max(axis=(3, 5))
    y = jnp.maximum(y, 0.0)

    y = y.reshape(n, 320)
    y = jnp.maximum(jnp.dot(y, params["wf1"].T, precision=hp) + params["bf1"], 0.0)
    y = jnp.maximum(jnp.dot(y, params["wf2"].T, precision=hp) + params["bf2"], 0.0)
    return jax.nn.log_softmax(y, axis=-1)


def init_params(key):
    ks = jax.random.split(key, 8)
    scale = 0.1
    return {
        "w1": scale * jax.random.normal(ks[0], (10, 1, 5, 5), jnp.float32),
        "b1": scale * jax.random.normal(ks[1], (10,), jnp.float32),
        "w2": scale * jax.random.normal(ks[2], (20, 10, 5, 5), jnp.float32),
        "b2": scale * jax.random.normal(ks[3], (20,), jnp.float32),
        "wf1": scale * jax.random.normal(ks[4], (50, 320), jnp.float32),
        "bf1": scale * jax.random.normal(ks[5], (50,), jnp.float32),
        "wf2": scale * jax.random.normal(ks[6], (10, 50), jnp.float32),
        "bf2": scale * jax.random.normal(ks[7], (10,), jnp.float32),
    }


if __name__ == "__main__":
    key = jax.random.PRNGKey(0)
    pkey, xkey = jax.random.split(key)
    params = init_params(pkey)
    prepped = prepare_params(params)

    fwd = jax.jit(net_forward)
    ref_fn = jax.jit(net_reference)

    # Batch=2 MNIST-shaped input (N, 1, 28, 28) -- required for the 320-d flatten.
    # A second, larger batch exercises the multi-step ("parallel") grid and
    # the batch-padding path.
    for batch in (2, 200):
        xb = jax.random.normal(jax.random.fold_in(xkey, batch),
                               (batch, 1, 28, 28), jnp.float32)
        out = jax.block_until_ready(fwd(xb, prepped))

        assert out.shape == (batch, 10)
        assert bool(jnp.all(jnp.isfinite(out)))
        # log_softmax rows should (approximately) exp-sum to 1
        assert bool(jnp.allclose(jnp.exp(out).sum(axis=-1), 1.0, atol=1e-4))

        # Numerical check against the pure-JAX reference of the PyTorch module.
        ref = jax.block_until_ready(ref_fn(xb, params))
        max_diff = float(jnp.max(jnp.abs(out - ref)))
        assert max_diff < 5e-2, f"batch={batch}: mismatch vs reference: {max_diff}"

    print("KERNEL_OK")
</pallas_src>

<mosaic_0001>
module attributes {stable_mosaic.version = 11 : i64} {
  func.func @net_fused_kernel(%arg0: i32, %arg1: memref<8x28x28xf32, #tpu.memory_space<vmem>>, %arg2: memref<5x28x240xf32, #tpu.memory_space<vmem>>, %arg3: memref<240x120xf32, #tpu.memory_space<vmem>>, %arg4: memref<240x120xf32, #tpu.memory_space<vmem>>, %arg5: memref<1x120xf32, #tpu.memory_space<vmem>>, %arg6: memref<5x120x160xf32, #tpu.memory_space<vmem>>, %arg7: memref<160x80xf32, #tpu.memory_space<vmem>>, %arg8: memref<160x80xf32, #tpu.memory_space<vmem>>, %arg9: memref<1x80xf32, #tpu.memory_space<vmem>>, %arg10: memref<320x64xf32, #tpu.memory_space<vmem>>, %arg11: memref<1x64xf32, #tpu.memory_space<vmem>>, %arg12: memref<64x128xf32, #tpu.memory_space<vmem>>, %arg13: memref<1x128xf32, #tpu.memory_space<vmem>>, %arg14: memref<8x128xf32, #tpu.memory_space<vmem>>, %arg15: memref<8x24x120xf32, #tpu.memory_space<vmem>>, %arg16: memref<8x12x120xf32, #tpu.memory_space<vmem>>, %arg17: memref<8x8x80xf32, #tpu.memory_space<vmem>>, %arg18: memref<8x320xf32, #tpu.memory_space<vmem>>) attributes {dimension_semantics = [#tpu.dimension_semantics<parallel>], iteration_bounds = array<i64: 1>, scalar_prefetch = 0 : i64, scratch_operands = 4 : i64, tpu.core_type = #tpu.core_type<tc>, window_params = [{transform_indices = @transform_0, window_bounds = array<i64: 8, 28, 28>}, {pipeline_mode = #tpu.pipeline_mode<synchronous>, transform_indices = @transform_1, window_bounds = array<i64: 5, 28, 240>}, {pipeline_mode = #tpu.pipeline_mode<synchronous>, transform_indices = @transform_2, window_bounds = array<i64: 240, 120>}, {pipeline_mode = #tpu.pipeline_mode<synchronous>, transform_indices = @transform_3, window_bounds = array<i64: 240, 120>}, {pipeline_mode = #tpu.pipeline_mode<synchronous>, transform_indices = @transform_4, window_bounds = array<i64: 1, 120>}, {pipeline_mode = #tpu.pipeline_mode<synchronous>, transform_indices = @transform_5, window_bounds = array<i64: 5, 120, 160>}, {pipeline_mode = #tpu.pipeline_mode<synchronous>, transform_indices = @transform_6, window_bounds = array<i64: 160, 80>}, {pipeline_mode = #tpu.pipeline_mode<synchronous>, transform_indices = @transform_7, window_bounds = array<i64: 160, 80>}, {pipeline_mode = #tpu.pipeline_mode<synchronous>, transform_indices = @transform_8, window_bounds = array<i64: 1, 80>}, {pipeline_mode = #tpu.pipeline_mode<synchronous>, transform_indices = @transform_9, window_bounds = array<i64: 320, 64>}, {pipeline_mode = #tpu.pipeline_mode<synchronous>, transform_indices = @transform_10, window_bounds = array<i64: 1, 64>}, {pipeline_mode = #tpu.pipeline_mode<synchronous>, transform_indices = @transform_11, window_bounds = array<i64: 64, 128>}, {pipeline_mode = #tpu.pipeline_mode<synchronous>, transform_indices = @transform_12, window_bounds = array<i64: 1, 128>}, {transform_indices = @transform_13, window_bounds = array<i64: 8, 128>}]} {
    %c0 = arith.constant 0 : index
    %c0_0 = arith.constant 0 : index
    %c0_1 = arith.constant 0 : index
    %0 = vector.load %arg1[%c0, %c0_0, %c0_1] : memref<8x28x28xf32, #tpu.memory_space<vmem>>, vector<8x24x28xf32>
    %1 = vector.shape_cast %0 : vector<8x24x28xf32> to vector<192x28xf32>
    %c0_2 = arith.constant 0 : index
    %c0_3 = arith.constant 0 : index
    %c0_4 = arith.constant 0 : index
    %2 = vector.load %arg2[%c0_2, %c0_3, %c0_4] : memref<5x28x240xf32, #tpu.memory_space<vmem>>, vector<1x28x240xf32>
    %3 = vector.shape_cast %2 : vector<1x28x240xf32> to vector<28x240xf32>
    %cst = arith.constant dense<0.000000e+00> : vector<192x240xf32>
    %4 = tpu.matmul %1, %3, %cst {dimension_numbers = #tpu.dot_dimension_numbers<[1], [0], [0], [1], [0, 0, 1, 1], [], []>} : vector<192x28xf32>, vector<28x240xf32>, vector<192x240xf32> -> vector<192x240xf32>
    %c0_5 = arith.constant 0 : index
    %c1 = arith.constant 1 : index
    %c0_6 = arith.constant 0 : index
    %5 = vector.load %arg1[%c0_5, %c1, %c0_6] : memref<8x28x28xf32, #tpu.memory_space<vmem>>, vector<8x24x28xf32>
    %6 = vector.shape_cast %5 : vector<8x24x28xf32> to vector<192x28xf32>
    %c1_7 = arith.constant 1 : index
    %c0_8 = arith.constant 0 : index
    %c0_9 = arith.constant 0 : index
    %7 = vector.load %arg2[%c1_7, %c0_8, %c0_9] : memref<5x28x240xf32, #tpu.memory_space<vmem>>, vector<1x28x240xf32>
    %8 = vector.shape_cast %7 : vector<1x28x240xf32> to vector<28x240xf32>
    %cst_10 = arith.constant dense<0.000000e+00> : vector<192x240xf32>
    %9 = tpu.matmul %6, %8, %cst_10 {dimension_numbers = #tpu.dot_dimension_numbers<[1], [0], [0], [1], [0, 0, 1, 1], [], []>} : vector<192x28xf32>, vector<28x240xf32>, vector<192x240xf32> -> vector<192x240xf32>
    %10 = arith.addf %4, %9 : vector<192x240xf32>
    %c0_11 = arith.constant 0 : index
    %c2 = arith.constant 2 : index
    %c0_12 = arith.constant 0 : index
    %11 = vector.load %arg1[%c0_11, %c2, %c0_12] : memref<8x28x28xf32, #tpu.memory_space<vmem>>, vector<8x24x28xf32>
    %12 = vector.shape_cast %11 : vector<8x24x28xf32> to vector<192x28xf32>
    %c2_13 = arith.constant 2 : index
    %c0_14 = arith.constant 0 : index
    %c0_15 = arith.constant 0 : index
    %13 = vector.load %arg2[%c2_13, %c0_14, %c0_15] : memref<5x28x240xf32, #tpu.memory_space<vmem>>, vector<1x28x240xf32>
    %14 = vector.shape_cast %13 : vector<1x28x240xf32> to vector<28x240xf32>
    %cst_16 = arith.constant dense<0.000000e+00> : vector<192x240xf32>
    %15 = tpu.matmul %12, %14, %cst_16 {dimension_numbers = #tpu.dot_dimension_numbers<[1], [0], [0], [1], [0, 0, 1, 1], [], []>} : vector<192x28xf32>, vector<28x240xf32>, vector<192x240xf32> -> vector<192x240xf32>
    %16 = arith.addf %10, %15 : vector<192x240xf32>
    %c0_17 = arith.constant 0 : index
    %c3 = arith.constant 3 : index
    %c0_18 = arith.constant 0 : index
    %17 = vector.load %arg1[%c0_17, %c3, %c0_18] : memref<8x28x28xf32, #tpu.memory_space<vmem>>, vector<8x24x28xf32>
    %18 = vector.shape_cast %17 : vector<8x24x28xf32> to vector<192x28xf32>
    %c3_19 = arith.constant 3 : index
    %c0_20 = arith.constant 0 : index
    %c0_21 = arith.constant 0 : index
    %19 = vector.load %arg2[%c3_19, %c0_20, %c0_21] : memref<5x28x240xf32, #tpu.memory_space<vmem>>, vector<1x28x240xf32>
    %20 = vector.shape_cast %19 : vector<1x28x240xf32> to vector<28x240xf32>
    %cst_22 = arith.constant dense<0.000000e+00> : vector<192x240xf32>
    %21 = tpu.matmul %18, %20, %cst_22 {dimension_numbers = #tpu.dot_dimension_numbers<[1], [0], [0], [1], [0, 0, 1, 1], [], []>} : vector<192x28xf32>, vector<28x240xf32>, vector<192x240xf32> -> vector<192x240xf32>
    %22 = arith.addf %16, %21 : vector<192x240xf32>
    %c0_23 = arith.constant 0 : index
    %c4 = arith.constant 4 : index
    %c0_24 = arith.constant 0 : index
    %23 = vector.load %arg1[%c0_23, %c4, %c0_24] : memref<8x28x28xf32, #tpu.memory_space<vmem>>, vector<8x24x28xf32>
    %24 = vector.shape_cast %23 : vector<8x24x28xf32> to vector<192x28xf32>
    %c4_25 = arith.constant 4 : index
    %c0_26 = arith.constant 0 : index
    %c0_27 = arith.constant 0 : index
    %25 = vector.load %arg2[%c4_25, %c0_26, %c0_27] : memref<5x28x240xf32, #tpu.memory_space<vmem>>, vector<1x28x240xf32>
    %26 = vector.shape_cast %25 : vector<1x28x240xf32> to vector<28x240xf32>
    %cst_28 = arith.constant dense<0.000000e+00> : vector<192x240xf32>
    %27 = tpu.matmul %24, %26, %cst_28 {dimension_numbers = #tpu.dot_dimension_numbers<[1], [0], [0], [1], [0, 0, 1, 1], [], []>} : vector<192x28xf32>, vector<28x240xf32>, vector<192x240xf32> -> vector<192x240xf32>
    %28 = arith.addf %22, %27 : vector<192x240xf32>
    %c0_29 = arith.constant 0 : index
    %c0_30 = arith.constant 0 : index
    %29 = vector.load %arg3[%c0_29, %c0_30] : memref<240x120xf32, #tpu.memory_space<vmem>>, vector<240x120xf32>
    %cst_31 = arith.constant dense<0.000000e+00> : vector<192x120xf32>
    %30 = tpu.matmul %28, %29, %cst_31 {dimension_numbers = #tpu.dot_dimension_numbers<[1], [0], [0], [1], [0, 0, 1, 1], [], []>} : vector<192x240xf32>, vector<240x120xf32>, vector<192x120xf32> -> vector<192x120xf32>
    %c0_32 = arith.constant 0 : index
    %c0_33 = arith.constant 0 : index
    %31 = vector.load %arg4[%c0_32, %c0_33] : memref<240x120xf32, #tpu.memory_space<vmem>>, vector<240x120xf32>
    %cst_34 = arith.constant dense<0.000000e+00> : vector<192x120xf32>
    %32 = tpu.matmul %28, %31, %cst_34 {dimension_numbers = #tpu.dot_dimension_numbers<[1], [0], [0], [1], [0, 0, 1, 1], [], []>} : vector<192x240xf32>, vector<240x120xf32>, vector<192x120xf32> -> vector<192x120xf32>
    %33 = arith.maximumf %30, %32 : vector<192x120xf32>
    %34 = vector.shape_cast %33 : vector<192x120xf32> to vector<8x24x120xf32>
    %c0_35 = arith.constant 0 : index
    %c0_36 = arith.constant 0 : index
    %c0_37 = arith.constant 0 : index
    %35 = vector.load %arg15[%c0_35, %c0_36, %c0_37] : memref<8x24x120xf32, #tpu.memory_space<vmem>>, vector<8x24x120xf32>
    tpu.vector_store %arg15[%c0_35, %c0_36, %c0_37], %34 {strides = array<i32>} : memref<8x24x120xf32, #tpu.memory_space<vmem>>, vector<8x24x120xf32>,
    %c0_38 = arith.constant 0 : index
    %c0_39 = arith.constant 0 : index
    %36 = vector.load %arg5[%c0_38, %c0_39] : memref<1x120xf32, #tpu.memory_space<vmem>>, vector<1x120xf32>
    %c0_40 = arith.constant 0 : index
    %c0_41 = arith.constant 0 : index
    %c0_42 = arith.constant 0 : index
    %37 = vector.load %arg15[%c0_40, %c0_41, %c0_42] : memref<8x24x120xf32, #tpu.memory_space<vmem>>, vector<8x1x120xf32>
    %38 = vector.shape_cast %37 : vector<8x1x120xf32> to vector<8x120xf32>
    %c0_43 = arith.constant 0 : index
    %c1_44 = arith.constant 1 : index
    %c0_45 = arith.constant 0 : index
    %39 = vector.load %arg15[%c0_43, %c1_44, %c0_45] : memref<8x24x120xf32, #tpu.memory_space<vmem>>, vector<8x1x120xf32>
    %40 = vector.shape_cast %39 : vector<8x1x120xf32> to vector<8x120xf32>
    %41 = arith.maximumf %38, %40 : vector<8x120xf32>
    %42 = vector.broadcast %36 : vector<1x120xf32> to vector<8x120xf32>
    %43 = arith.addf %41, %42 : vector<8x120xf32>
    %cst_46 = arith.constant 0.000000e+00 : f32
    %44 = vector.broadcast %cst_46 : f32 to vector<8x120xf32>
    %45 = arith.maximumf %43, %44 : vector<8x120xf32>
    %c0_47 = arith.constant 0 : index
    %c0_48 = arith.constant 0 : index
    %c0_49 = arith.constant 0 : index
    %46 = vector.load %arg16[%c0_47, %c0_48, %c0_49] : memref<8x12x120xf32, #tpu.memory_space<vmem>>, vector<8x1x120xf32>
    %47 = vector.shape_cast %46 : vector<8x1x120xf32> to vector<8x120xf32>
    %48 = vector.shape_cast %45 : vector<8x120xf32> to vector<8x1x120xf32>
    tpu.vector_store %arg16[%c0_47, %c0_48, %c0_49], %48 {strides = array<i32>} : memref<8x12x120xf32, #tpu.memory_space<vmem>>, vector<8x1x120xf32>,
    %c0_50 = arith.constant 0 : index
    %c2_51 = arith.constant 2 : index
    %c0_52 = arith.constant 0 : index
    %49 = vector.load %arg15[%c0_50, %c2_51, %c0_52] : memref<8x24x120xf32, #tpu.memory_space<vmem>>, vector<8x1x120xf32>
    %50 = vector.shape_cast %49 : vector<8x1x120xf32> to vector<8x120xf32>
    %c0_53 = arith.constant 0 : index
    %c3_54 = arith.constant 3 : index
    %c0_55 = arith.constant 0 : index
    %51 = vector.load %arg15[%c0_53, %c3_54, %c0_55] : memref<8x24x120xf32, #tpu.memory_space<vmem>>, vector<8x1x120xf32>
    %52 = vector.shape_cast %51 : vector<8x1x120xf32> to vector<8x120xf32>
    %53 = arith.maximumf %50, %52 : vector<8x120xf32>
    %54 = vector.broadcast %36 : vector<1x120xf32> to vector<8x120xf32>
    %55 = arith.addf %53, %54 : vector<8x120xf32>
    %cst_56 = arith.constant 0.000000e+00 : f32
    %56 = vector.broadcast %cst_56 : f32 to vector<8x120xf32>
    %57 = arith.maximumf %55, %56 : vector<8x120xf32>
    %c0_57 = arith.constant 0 : index
    %c1_58 = arith.constant 1 : index
    %c0_59 = arith.constant 0 : index
    %58 = vector.load %arg16[%c0_57, %c1_58, %c0_59] : memref<8x12x120xf32, #tpu.memory_space<vmem>>, vector<8x1x120xf32>
    %59 = vector.shape_cast %58 : vector<8x1x120xf32> to vector<8x120xf32>
    %60 = vector.shape_cast %57 : vector<8x120xf32> to vector<8x1x120xf32>
    tpu.vector_store %arg16[%c0_57, %c1_58, %c0_59], %60 {strides = array<i32>} : memref<8x12x120xf32, #tpu.memory_space<vmem>>, vector<8x1x120xf32>,
    %c0_60 = arith.constant 0 : index
    %c4_61 = arith.constant 4 : index
    %c0_62 = arith.constant 0 : index
    %61 = vector.load %arg15[%c0_60, %c4_61, %c0_62] : memref<8x24x120xf32, #tpu.memory_space<vmem>>, vector<8x1x120xf32>
    %62 = vector.shape_cast %61 : vector<8x1x120xf32> to vector<8x120xf32>
    %c0_63 = arith.constant 0 : index
    %c5 = arith.constant 5 : index
    %c0_64 = arith.constant 0 : index
    %63 = vector.load %arg15[%c0_63, %c5, %c0_64] : memref<8x24x120xf32, #tpu.memory_space<vmem>>, vector<8x1x120xf32>
    %64 = vector.shape_cast %63 : vector<8x1x120xf32> to vector<8x120xf32>
    %65 = arith.maximumf %62, %64 : vector<8x120xf32>
    %66 = vector.broadcast %36 : vector<1x120xf32> to vector<8x120xf32>
    %67 = arith.addf %65, %66 : vector<8x120xf32>
    %cst_65 = arith.constant 0.000000e+00 : f32
    %68 = vector.broadcast %cst_65 : f32 to vector<8x120xf32>
    %69 = arith.maximumf %67, %68 : vector<8x120xf32>
    %c0_66 = arith.constant 0 : index
    %c2_67 = arith.constant 2 : index
    %c0_68 = arith.constant 0 : index
    %70 = vector.load %arg16[%c0_66, %c2_67, %c0_68] : memref<8x12x120xf32, #tpu.memory_space<vmem>>, vector<8x1x120xf32>
    %71 = vector.shape_cast %70 : vector<8x1x120xf32> to vector<8x120xf32>
    %72 = vector.shape_cast %69 : vector<8x120xf32> to vector<8x1x120xf32>
    tpu.vector_store %arg16[%c0_66, %c2_67, %c0_68], %72 {strides = array<i32>} : memref<8x12x120xf32, #tpu.memory_space<vmem>>, vector<8x1x120xf32>,
    %c0_69 = arith.constant 0 : index
    %c6 = arith.constant 6 : index
    %c0_70 = arith.constant 0 : index
    %73 = vector.load %arg15[%c0_69, %c6, %c0_70] : memref<8x24x120xf32, #tpu.memory_space<vmem>>, vector<8x1x120xf32>
    %74 = vector.shape_cast %73 : vector<8x1x120xf32> to vector<8x120xf32>
    %c0_71 = arith.constant 0 : index
    %c7 = arith.constant 7 : index
    %c0_72 = arith.constant 0 : index
    %75 = vector.load %arg15[%c0_71, %c7, %c0_72] : memref<8x24x120xf32, #tpu.memory_space<vmem>>, vector<8x1x120xf32>
    %76 = vector.shape_cast %75 : vector<8x1x120xf32> to vector<8x120xf32>
    %77 = arith.maximumf %74, %76 : vector<8x120xf32>
    %78 = vector.broadcast %36 : vector<1x120xf32> to vector<8x120xf32>
    %79 = arith.addf %77, %78 : vector<8x120xf32>
    %cst_73 = arith.constant 0.000000e+00 : f32
    %80 = vector.broadcast %cst_73 : f32 to vector<8x120xf32>
    %81 = arith.maximumf %79, %80 : vector<8x120xf32>
    %c0_74 = arith.constant 0 : index
    %c3_75 = arith.constant 3 : index
    %c0_76 = arith.constant 0 : index
    %82 = vector.load %arg16[%c0_74, %c3_75, %c0_76] : memref<8x12x120xf32, #tpu.memory_space<vmem>>, vector<8x1x120xf32>
    %83 = vector.shape_cast %82 : vector<8x1x120xf32> to vector<8x120xf32>
    %84 = vector.shape_cast %81 : vector<8x120xf32> to vector<8x1x120xf32>
    tpu.vector_store %arg16[%c0_74, %c3_75, %c0_76], %84 {strides = array<i32>} : memref<8x12x120xf32, #tpu.memory_space<vmem>>, vector<8x1x120xf32>,
    %c0_77 = arith.constant 0 : index
    %c8 = arith.constant 8 : index
    %c0_78 = arith.constant 0 : index
    %85 = vector.load %arg15[%c0_77, %c8, %c0_78] : memref<8x24x120xf32, #tpu.memory_space<vmem>>, vector<8x1x120xf32>
    %86 = vector.shape_cast %85 : vector<8x1x120xf32> to vector<8x120xf32>
    %c0_79 = arith.constant 0 : index
    %c9 = arith.constant 9 : index
    %c0_80 = arith.constant 0 : index
    %87 = vector.load %arg15[%c0_79, %c9, %c0_80] : memref<8x24x120xf32, #tpu.memory_space<vmem>>, vector<8x1x120xf32>
    %88 = vector.shape_cast %87 : vector<8x1x120xf32> to vector<8x120xf32>
    %89 = arith.maximumf %86, %88 : vector<8x120xf32>
    %90 = vector.broadcast %36 : vector<1x120xf32> to vector<8x120xf32>
    %91 = arith.addf %89, %90 : vector<8x120xf32>
    %cst_81 = arith.constant 0.000000e+00 : f32
    %92 = vector.broadcast %cst_81 : f32 to vector<8x120xf32>
    %93 = arith.maximumf %91, %92 : vector<8x120xf32>
    %c0_82 = arith.constant 0 : index
    %c4_83 = arith.constant 4 : index
    %c0_84 = arith.constant 0 : index
    %94 = vector.load %arg16[%c0_82, %c4_83, %c0_84] : memref<8x12x120xf32, #tpu.memory_space<vmem>>, vector<8x1x120xf32>
    %95 = vector.shape_cast %94 : vector<8x1x120xf32> to vector<8x120xf32>
    %96 = vector.shape_cast %93 : vector<8x120xf32> to vector<8x1x120xf32>
    tpu.vector_store %arg16[%c0_82, %c4_83, %c0_84], %96 {strides = array<i32>} : memref<8x12x120xf32, #tpu.memory_space<vmem>>, vector<8x1x120xf32>,
    %c0_85 = arith.constant 0 : index
    %c10 = arith.constant 10 : index
    %c0_86 = arith.constant 0 : index
    %97 = vector.load %arg15[%c0_85, %c10, %c0_86] : memref<8x24x120xf32, #tpu.memory_space<vmem>>, vector<8x1x120xf32>
    %98 = vector.shape_cast %97 : vector<8x1x120xf32> to vector<8x120xf32>
    %c0_87 = arith.constant 0 : index
    %c11 = arith.constant 11 : index
    %c0_88 = arith.constant 0 : index
    %99 = vector.load %arg15[%c0_87, %c11, %c0_88] : memref<8x24x120xf32, #tpu.memory_space<vmem>>, vector<8x1x120xf32>
    %100 = vector.shape_cast %99 : vector<8x1x120xf32> to vector<8x120xf32>
    %101 = arith.maximumf %98, %100 : vector<8x120xf32>
    %102 = vector.broadcast %36 : vector<1x120xf32> to vector<8x120xf32>
    %103 = arith.addf %101, %102 : vector<8x120xf32>
    %cst_89 = arith.constant 0.000000e+00 : f32
    %104 = vector.broadcast %cst_89 : f32 to vector<8x120xf32>
    %105 = arith.maximumf %103, %104 : vector<8x120xf32>
    %c0_90 = arith.constant 0 : index
    %c5_91 = arith.constant 5 : index
    %c0_92 = arith.constant 0 : index
    %106 = vector.load %arg16[%c0_90, %c5_91, %c0_92] : memref<8x12x120xf32, #tpu.memory_space<vmem>>, vector<8x1x120xf32>
    %107 = vector.shape_cast %106 : vector<8x1x120xf32> to vector<8x120xf32>
    %108 = vector.shape_cast %105 : vector<8x120xf32> to vector<8x1x120xf32>
    tpu.vector_store %arg16[%c0_90, %c5_91, %c0_92], %108 {strides = array<i32>} : memref<8x12x120xf32, #tpu.memory_space<vmem>>, vector<8x1x120xf32>,
    %c0_93 = arith.constant 0 : index
    %c12 = arith.constant 12 : index
    %c0_94 = arith.constant 0 : index
    %109 = vector.load %arg15[%c0_93, %c12, %c0_94] : memref<8x24x120xf32, #tpu.memory_space<vmem>>, vector<8x1x120xf32>
    %110 = vector.shape_cast %109 : vector<8x1x120xf32> to vector<8x120xf32>
    %c0_95 = arith.constant 0 : index
    %c13 = arith.constant 13 : index
    %c0_96 = arith.constant 0 : index
    %111 = vector.load %arg15[%c0_95, %c13, %c0_96] : memref<8x24x120xf32, #tpu.memory_space<vmem>>, vector<8x1x120xf32>
    %112 = vector.shape_cast %111 : vector<8x1x120xf32> to vector<8x120xf32>
    %113 = arith.maximumf %110, %112 : vector<8x120xf32>
    %114 = vector.broadcast %36 : vector<1x120xf32> to vector<8x120xf32>
    %115 = arith.addf %113, %114 : vector<8x120xf32>
    %cst_97 = arith.constant 0.000000e+00 : f32
    %116 = vector.broadcast %cst_97 : f32 to vector<8x120xf32>
    %117 = arith.maximumf %115, %116 : vector<8x120xf32>
    %c0_98 = arith.constant 0 : index
    %c6_99 = arith.constant 6 : index
    %c0_100 = arith.constant 0 : index
    %118 = vector.load %arg16[%c0_98, %c6_99, %c0_100] : memref<8x12x120xf32, #tpu.memory_space<vmem>>, vector<8x1x120xf32>
    %119 = vector.shape_cast %118 : vector<8x1x120xf32> to vector<8x120xf32>
    %120 = vector.shape_cast %117 : vector<8x120xf32> to vector<8x1x120xf32>
    tpu.vector_store %arg16[%c0_98, %c6_99, %c0_100], %120 {strides = array<i32>} : memref<8x12x120xf32, #tpu.memory_space<vmem>>, vector<8x1x120xf32>,
    %c0_101 = arith.constant 0 : index
    %c14 = arith.constant 14 : index
    %c0_102 = arith.constant 0 : index
    %121 = vector.load %arg15[%c0_101, %c14, %c0_102] : memref<8x24x120xf32, #tpu.memory_space<vmem>>, vector<8x1x120xf32>
    %122 = vector.shape_cast %121 : vector<8x1x120xf32> to vector<8x120xf32>
    %c0_103 = arith.constant 0 : index
    %c15 = arith.constant 15 : index
    %c0_104 = arith.constant 0 : index
    %123 = vector.load %arg15[%c0_103, %c15, %c0_104] : memref<8x24x120xf32, #tpu.memory_space<vmem>>, vector<8x1x120xf32>
    %124 = vector.shape_cast %123 : vector<8x1x120xf32> to vector<8x120xf32>
    %125 = arith.maximumf %122, %124 : vector<8x120xf32>
    %126 = vector.broadcast %36 : vector<1x120xf32> to vector<8x120xf32>
    %127 = arith.addf %125, %126 : vector<8x120xf32>
    %cst_105 = arith.constant 0.000000e+00 : f32
    %128 = vector.broadcast %cst_105 : f32 to vector<8x120xf32>
    %129 = arith.maximumf %127, %128 : vector<8x120xf32>
    %c0_106 = arith.constant 0 : index
    %c7_107 = arith.constant 7 : index
    %c0_108 = arith.constant 0 : index
    %130 = vector.load %arg16[%c0_106, %c7_107, %c0_108] : memref<8x12x120xf32, #tpu.memory_space<vmem>>, vector<8x1x120xf32>
    %131 = vector.shape_cast %130 : vector<8x1x120xf32> to vector<8x120xf32>
    %132 = vector.shape_cast %129 : vector<8x120xf32> to vector<8x1x120xf32>
    tpu.vector_store %arg16[%c0_106, %c7_107, %c0_108], %132 {strides = array<i32>} : memref<8x12x120xf32, #tpu.memory_space<vmem>>, vector<8x1x120xf32>,
    %c0_109 = arith.constant 0 : index
    %c16 = arith.constant 16 : index
    %c0_110 = arith.constant 0 : index
    %133 = vector.load %arg15[%c0_109, %c16, %c0_110] : memref<8x24x120xf32, #tpu.memory_space<vmem>>, vector<8x1x120xf32>
    %134 = vector.shape_cast %133 : vector<8x1x120xf32> to vector<8x120xf32>
    %c0_111 = arith.constant 0 : index
    %c17 = arith.constant 17 : index
    %c0_112 = arith.constant 0 : index
    %135 = vector.load %arg15[%c0_111, %c17, %c0_112] : memref<8x24x120xf32, #tpu.memory_space<vmem>>, vector<8x1x120xf32>
    %136 = vector.shape_cast %135 : vector<8x1x120xf32> to vector<8x120xf32>
    %137 = arith.maximumf %134, %136 : vector<8x120xf32>
    %138 = vector.broadcast %36 : vector<1x120xf32> to vector<8x120xf32>
    %139 = arith.addf %137, %138 : vector<8x120xf32>
    %cst_113 = arith.constant 0.000000e+00 : f32
    %140 = vector.broadcast %cst_113 : f32 to vector<8x120xf32>
    %141 = arith.maximumf %139, %140 : vector<8x120xf32>
    %c0_114 = arith.constant 0 : index
    %c8_115 = arith.constant 8 : index
    %c0_116 = arith.constant 0 : index
    %142 = vector.load %arg16[%c0_114, %c8_115, %c0_116] : memref<8x12x120xf32, #tpu.memory_space<vmem>>, vector<8x1x120xf32>
    %143 = vector.shape_cast %142 : vector<8x1x120xf32> to vector<8x120xf32>
    %144 = vector.shape_cast %141 : vector<8x120xf32> to vector<8x1x120xf32>
    tpu.vector_store %arg16[%c0_114, %c8_115, %c0_116], %144 {strides = array<i32>} : memref<8x12x120xf32, #tpu.memory_space<vmem>>, vector<8x1x120xf32>,
    %c0_117 = arith.constant 0 : index
    %c18 = arith.constant 18 : index
    %c0_118 = arith.constant 0 : index
    %145 = vector.load %arg15[%c0_117, %c18, %c0_118] : memref<8x24x120xf32, #tpu.memory_space<vmem>>, vector<8x1x120xf32>
    %146 = vector.shape_cast %145 : vector<8x1x120xf32> to vector<8x120xf32>
    %c0_119 = arith.constant 0 : index
    %c19 = arith.constant 19 : index
    %c0_120 = arith.constant 0 : index
    %147 = vector.load %arg15[%c0_119, %c19, %c0_120] : memref<8x24x120xf32, #tpu.memory_space<vmem>>, vector<8x1x120xf32>
    %148 = vector.shape_cast %147 : vector<8x1x120xf32> to vector<8x120xf32>
    %149 = arith.maximumf %146, %148 : vector<8x120xf32>
    %150 = vector.broadcast %36 : vector<1x120xf32> to vector<8x120xf32>
    %151 = arith.addf %149, %150 : vector<8x120xf32>
    %cst_121 = arith.constant 0.000000e+00 : f32
    %152 = vector.broadcast %cst_121 : f32 to vector<8x120xf32>
    %153 = arith.maximumf %151, %152 : vector<8x120xf32>
    %c0_122 = arith.constant 0 : index
    %c9_123 = arith.constant 9 : index
    %c0_124 = arith.constant 0 : index
    %154 = vector.load %arg16[%c0_122, %c9_123, %c0_124] : memref<8x12x120xf32, #tpu.memory_space<vmem>>, vector<8x1x120xf32>
    %155 = vector.shape_cast %154 : vector<8x1x120xf32> to vector<8x120xf32>
    %156 = vector.shape_cast %153 : vector<8x120xf32> to vector<8x1x120xf32>
    tpu.vector_store %arg16[%c0_122, %c9_123, %c0_124], %156 {strides = array<i32>} : memref<8x12x120xf32, #tpu.memory_space<vmem>>, vector<8x1x120xf32>,
    %c0_125 = arith.constant 0 : index
    %c20 = arith.constant 20 : index
    %c0_126 = arith.constant 0 : index
    %157 = vector.load %arg15[%c0_125, %c20, %c0_126] : memref<8x24x120xf32, #tpu.memory_space<vmem>>, vector<8x1x120xf32>
    %158 = vector.shape_cast %157 : vector<8x1x120xf32> to vector<8x120xf32>
    %c0_127 = arith.constant 0 : index
    %c21 = arith.constant 21 : index
    %c0_128 = arith.constant 0 : index
    %159 = vector.load %arg15[%c0_127, %c21, %c0_128] : memref<8x24x120xf32, #tpu.memory_space<vmem>>, vector<8x1x120xf32>
    %160 = vector.shape_cast %159 : vector<8x1x120xf32> to vector<8x120xf32>
    %161 = arith.maximumf %158, %160 : vector<8x120xf32>
    %162 = vector.broadcast %36 : vector<1x120xf32> to vector<8x120xf32>
    %163 = arith.addf %161, %162 : vector<8x120xf32>
    %cst_129 = arith.constant 0.000000e+00 : f32
    %164 = vector.broadcast %cst_129 : f32 to vector<8x120xf32>
    %165 = arith.maximumf %163, %164 : vector<8x120xf32>
    %c0_130 = arith.constant 0 : index
    %c10_131 = arith.constant 10 : index
    %c0_132 = arith.constant 0 : index
    %166 = vector.load %arg16[%c0_130, %c10_131, %c0_132] : memref<8x12x120xf32, #tpu.memory_space<vmem>>, vector<8x1x120xf32>
    %167 = vector.shape_cast %166 : vector<8x1x120xf32> to vector<8x120xf32>
    %168 = vector.shape_cast %165 : vector<8x120xf32> to vector<8x1x120xf32>
    tpu.vector_store %arg16[%c0_130, %c10_131, %c0_132], %168 {strides = array<i32>} : memref<8x12x120xf32, #tpu.memory_space<vmem>>, vector<8x1x120xf32>,
    %c0_133 = arith.constant 0 : index
    %c22 = arith.constant 22 : index
    %c0_134 = arith.constant 0 : index
    %169 = vector.load %arg15[%c0_133, %c22, %c0_134] : memref<8x24x120xf32, #tpu.memory_space<vmem>>, vector<8x1x120xf32>
    %170 = vector.shape_cast %169 : vector<8x1x120xf32> to vector<8x120xf32>
    %c0_135 = arith.constant 0 : index
    %c23 = arith.constant 23 : index
    %c0_136 = arith.constant 0 : index
    %171 = vector.load %arg15[%c0_135, %c23, %c0_136] : memref<8x24x120xf32, #tpu.memory_space<vmem>>, vector<8x1x120xf32>
    %172 = vector.shape_cast %171 : vector<8x1x120xf32> to vector<8x120xf32>
    %173 = arith.maximumf %170, %172 : vector<8x120xf32>
    %174 = vector.broadcast %36 : vector<1x120xf32> to vector<8x120xf32>
    %175 = arith.addf %173, %174 : vector<8x120xf32>
    %cst_137 = arith.constant 0.000000e+00 : f32
    %176 = vector.broadcast %cst_137 : f32 to vector<8x120xf32>
    %177 = arith.maximumf %175, %176 : vector<8x120xf32>
    %c0_138 = arith.constant 0 : index
    %c11_139 = arith.constant 11 : index
    %c0_140 = arith.constant 0 : index
    %178 = vector.load %arg16[%c0_138, %c11_139, %c0_140] : memref<8x12x120xf32, #tpu.memory_space<vmem>>, vector<8x1x120xf32>
    %179 = vector.shape_cast %178 : vector<8x1x120xf32> to vector<8x120xf32>
    %180 = vector.shape_cast %177 : vector<8x120xf32> to vector<8x1x120xf32>
    tpu.vector_store %arg16[%c0_138, %c11_139, %c0_140], %180 {strides = array<i32>} : memref<8x12x120xf32, #tpu.memory_space<vmem>>, vector<8x1x120xf32>,
    %c0_141 = arith.constant 0 : index
    %c0_142 = arith.constant 0 : index
    %c0_143 = arith.constant 0 : index
    %181 = vector.load %arg16[%c0_141, %c0_142, %c0_143] : memref<8x12x120xf32, #tpu.memory_space<vmem>>, vector<8x8x120xf32>
    %182 = vector.shape_cast %181 : vector<8x8x120xf32> to vector<64x120xf32>
    %c0_144 = arith.constant 0 : index
    %c0_145 = arith.constant 0 : index
    %c0_146 = arith.constant 0 : index
    %183 = vector.load %arg6[%c0_144, %c0_145, %c0_146] : memref<5x120x160xf32, #tpu.memory_space<vmem>>, vector<1x120x160xf32>
    %184 = vector.shape_cast %183 : vector<1x120x160xf32> to vector<120x160xf32>
    %cst_147 = arith.constant dense<0.000000e+00> : vector<64x160xf32>
    %185 = tpu.matmul %182, %184, %cst_147 {dimension_numbers = #tpu.dot_dimension_numbers<[1], [0], [0], [1], [0, 0, 1, 1], [], []>} : vector<64x120xf32>, vector<120x160xf32>, vector<64x160xf32> -> vector<64x160xf32>
    %c0_148 = arith.constant 0 : index
    %c1_149 = arith.constant 1 : index
    %c0_150 = arith.constant 0 : index
    %186 = vector.load %arg16[%c0_148, %c1_149, %c0_150] : memref<8x12x120xf32, #tpu.memory_space<vmem>>, vector<8x8x120xf32>
    %187 = vector.shape_cast %186 : vector<8x8x120xf32> to vector<64x120xf32>
    %c1_151 = arith.constant 1 : index
    %c0_152 = arith.constant 0 : index
    %c0_153 = arith.constant 0 : index
    %188 = vector.load %arg6[%c1_151, %c0_152, %c0_153] : memref<5x120x160xf32, #tpu.memory_space<vmem>>, vector<1x120x160xf32>
    %189 = vector.shape_cast %188 : vector<1x120x160xf32> to vector<120x160xf32>
    %cst_154 = arith.constant dense<0.000000e+00> : vector<64x160xf32>
    %190 = tpu.matmul %187, %189, %cst_154 {dimension_numbers = #tpu.dot_dimension_numbers<[1], [0], [0], [1], [0, 0, 1, 1], [], []>} : vector<64x120xf32>, vector<120x160xf32>, vector<64x160xf32> -> vector<64x160xf32>
    %191 = arith.addf %185, %190 : vector<64x160xf32>
    %c0_155 = arith.constant 0 : index
    %c2_156 = arith.constant 2 : index
    %c0_157 = arith.constant 0 : index
    %192 = vector.load %arg16[%c0_155, %c2_156, %c0_157] : memref<8x12x120xf32, #tpu.memory_space<vmem>>, vector<8x8x120xf32>
    %193 = vector.shape_cast %192 : vector<8x8x120xf32> to vector<64x120xf32>
    %c2_158 = arith.constant 2 : index
    %c0_159 = arith.constant 0 : index
    %c0_160 = arith.constant 0 : index
    %194 = vector.load %arg6[%c2_158, %c0_159, %c0_160] : memref<5x120x160xf32, #tpu.memory_space<vmem>>, vector<1x120x160xf32>
    %195 = vector.shape_cast %194 : vector<1x120x160xf32> to vector<120x160xf32>
    %cst_161 = arith.constant dense<0.000000e+00> : vector<64x160xf32>
    %196 = tpu.matmul %193, %195, %cst_161 {dimension_numbers = #tpu.dot_dimension_numbers<[1], [0], [0], [1], [0, 0, 1, 1], [], []>} : vector<64x120xf32>, vector<120x160xf32>, vector<64x160xf32> -> vector<64x160xf32>
    %197 = arith.addf %191, %196 : vector<64x160xf32>
    %c0_162 = arith.constant 0 : index
    %c3_163 = arith.constant 3 : index
    %c0_164 = arith.constant 0 : index
    %198 = vector.load %arg16[%c0_162, %c3_163, %c0_164] : memref<8x12x120xf32, #tpu.memory_space<vmem>>, vector<8x8x120xf32>
    %199 = vector.shape_cast %198 : vector<8x8x120xf32> to vector<64x120xf32>
    %c3_165 = arith.constant 3 : index
    %c0_166 = arith.constant 0 : index
    %c0_167 = arith.constant 0 : index
    %200 = vector.load %arg6[%c3_165, %c0_166, %c0_167] : memref<5x120x160xf32, #tpu.memory_space<vmem>>, vector<1x120x160xf32>
    %201 = vector.shape_cast %200 : vector<1x120x160xf32> to vector<120x160xf32>
    %cst_168 = arith.constant dense<0.000000e+00> : vector<64x160xf32>
    %202 = tpu.matmul %199, %201, %cst_168 {dimension_numbers = #tpu.dot_dimension_numbers<[1], [0], [0], [1], [0, 0, 1, 1], [], []>} : vector<64x120xf32>, vector<120x160xf32>, vector<64x160xf32> -> vector<64x160xf32>
    %203 = arith.addf %197, %202 : vector<64x160xf32>
    %c0_169 = arith.constant 0 : index
    %c4_170 = arith.constant 4 : index
    %c0_171 = arith.constant 0 : index
    %204 = vector.load %arg16[%c0_169, %c4_170, %c0_171] : memref<8x12x120xf32, #tpu.memory_space<vmem>>, vector<8x8x120xf32>
    %205 = vector.shape_cast %204 : vector<8x8x120xf32> to vector<64x120xf32>
    %c4_172 = arith.constant 4 : index
    %c0_173 = arith.constant 0 : index
    %c0_174 = arith.constant 0 : index
    %206 = vector.load %arg6[%c4_172, %c0_173, %c0_174] : memref<5x120x160xf32, #tpu.memory_space<vmem>>, vector<1x120x160xf32>
    %207 = vector.shape_cast %206 : vector<1x120x160xf32> to vector<120x160xf32>
    %cst_175 = arith.constant dense<0.000000e+00> : vector<64x160xf32>
    %208 = tpu.matmul %205, %207, %cst_175 {dimension_numbers = #tpu.dot_dimension_numbers<[1], [0], [0], [1], [0, 0, 1, 1], [], []>} : vector<64x120xf32>, vector<120x160xf32>, vector<64x160xf32> -> vector<64x160xf32>
    %209 = arith.addf %203, %208 : vector<64x160xf32>
    %c0_176 = arith.constant 0 : index
    %c0_177 = arith.constant 0 : index
    %210 = vector.load %arg7[%c0_176, %c0_177] : memref<160x80xf32, #tpu.memory_space<vmem>>, vector<160x80xf32>
    %cst_178 = arith.constant dense<0.000000e+00> : vector<64x80xf32>
    %211 = tpu.matmul %209, %210, %cst_178 {dimension_numbers = #tpu.dot_dimension_numbers<[1], [0], [0], [1], [0, 0, 1, 1], [], []>} : vector<64x160xf32>, vector<160x80xf32>, vector<64x80xf32> -> vector<64x80xf32>
    %c0_179 = arith.constant 0 : index
    %c0_180 = arith.constant 0 : index
    %212 = vector.load %arg8[%c0_179, %c0_180] : memref<160x80xf32, #tpu.memory_space<vmem>>, vector<160x80xf32>
    %cst_181 = arith.constant dense<0.000000e+00> : vector<64x80xf32>
    %213 = tpu.matmul %209, %212, %cst_181 {dimension_numbers = #tpu.dot_dimension_numbers<[1], [0], [0], [1], [0, 0, 1, 1], [], []>} : vector<64x160xf32>, vector<160x80xf32>, vector<64x80xf32> -> vector<64x80xf32>
    %214 = arith.maximumf %211, %213 : vector<64x80xf32>
    %215 = vector.shape_cast %214 : vector<64x80xf32> to vector<8x8x80xf32>
    %c0_182 = arith.constant 0 : index
    %c0_183 = arith.constant 0 : index
    %c0_184 = arith.constant 0 : index
    %216 = vector.load %arg17[%c0_182, %c0_183, %c0_184] : memref<8x8x80xf32, #tpu.memory_space<vmem>>, vector<8x8x80xf32>
    tpu.vector_store %arg17[%c0_182, %c0_183, %c0_184], %215 {strides = array<i32>} : memref<8x8x80xf32, #tpu.memory_space<vmem>>, vector<8x8x80xf32>,
    %c0_185 = arith.constant 0 : index
    %c0_186 = arith.constant 0 : index
    %217 = vector.load %arg9[%c0_185, %c0_186] : memref<1x80xf32, #tpu.memory_space<vmem>>, vector<1x80xf32>
    %c0_187 = arith.constant 0 : index
    %c0_188 = arith.constant 0 : index
    %c0_189 = arith.constant 0 : index
    %218 = vector.load %arg17[%c0_187, %c0_188, %c0_189] : memref<8x8x80xf32, #tpu.memory_space<vmem>>, vector<8x1x80xf32>
    %219 = vector.shape_cast %218 : vector<8x1x80xf32> to vector<8x80xf32>
    %c0_190 = arith.constant 0 : index
    %c1_191 = arith.constant 1 : index
    %c0_192 = arith.constant 0 : index
    %220 = vector.load %arg17[%c0_190, %c1_191, %c0_192] : memref<8x8x80xf32, #tpu.memory_space<vmem>>, vector<8x1x80xf32>
    %221 = vector.shape_cast %220 : vector<8x1x80xf32> to vector<8x80xf32>
    %222 = arith.maximumf %219, %221 : vector<8x80xf32>
    %223 = vector.broadcast %217 : vector<1x80xf32> to vector<8x80xf32>
    %224 = arith.addf %222, %223 : vector<8x80xf32>
    %cst_193 = arith.constant 0.000000e+00 : f32
    %225 = vector.broadcast %cst_193 : f32 to vector<8x80xf32>
    %226 = arith.maximumf %224, %225 : vector<8x80xf32>
    %c0_194 = arith.constant 0 : index
    %c0_195 = arith.constant 0 : index
    %227 = vector.load %arg18[%c0_194, %c0_195] : memref<8x320xf32, #tpu.memory_space<vmem>>, vector<8x80xf32>
    tpu.vector_store %arg18[%c0_194, %c0_195], %226 {strides = array<i32>} : memref<8x320xf32, #tpu.memory_space<vmem>>, vector<8x80xf32>,
    %c0_196 = arith.constant 0 : index
    %c2_197 = arith.constant 2 : index
    %c0_198 = arith.constant 0 : index
    %228 = vector.load %arg17[%c0_196, %c2_197, %c0_198] : memref<8x8x80xf32, #tpu.memory_space<vmem>>, vector<8x1x80xf32>
    %229 = vector.shape_cast %228 : vector<8x1x80xf32> to vector<8x80xf32>
    %c0_199 = arith.constant 0 : index
    %c3_200 = arith.constant 3 : index
    %c0_201 = arith.constant 0 : index
    %230 = vector.load %arg17[%c0_199, %c3_200, %c0_201] : memref<8x8x80xf32, #tpu.memory_space<vmem>>, vector<8x1x80xf32>
    %231 = vector.shape_cast %230 : vector<8x1x80xf32> to vector<8x80xf32>
    %232 = arith.maximumf %229, %231 : vector<8x80xf32>
    %233 = vector.broadcast %217 : vector<1x80xf32> to vector<8x80xf32>
    %234 = arith.addf %232, %233 : vector<8x80xf32>
    %cst_202 = arith.constant 0.000000e+00 : f32
    %235 = vector.broadcast %cst_202 : f32 to vector<8x80xf32>
    %236 = arith.maximumf %234, %235 : vector<8x80xf32>
    %c0_203 = arith.constant 0 : index
    %c80 = arith.constant 80 : index
    %237 = vector.load %arg18[%c0_203, %c80] : memref<8x320xf32, #tpu.memory_space<vmem>>, vector<8x80xf32>
    tpu.vector_store %arg18[%c0_203, %c80], %236 {strides = array<i32>} : memref<8x320xf32, #tpu.memory_space<vmem>>, vector<8x80xf32>,
    %c0_204 = arith.constant 0 : index
    %c4_205 = arith.constant 4 : index
    %c0_206 = arith.constant 0 : index
    %238 = vector.load %arg17[%c0_204, %c4_205, %c0_206] : memref<8x8x80xf32, #tpu.memory_space<vmem>>, vector<8x1x80xf32>
    %239 = vector.shape_cast %238 : vector<8x1x80xf32> to vector<8x80xf32>
    %c0_207 = arith.constant 0 : index
    %c5_208 = arith.constant 5 : index
    %c0_209 = arith.constant 0 : index
    %240 = vector.load %arg17[%c0_207, %c5_208, %c0_209] : memref<8x8x80xf32, #tpu.memory_space<vmem>>, vector<8x1x80xf32>
    %241 = vector.shape_cast %240 : vector<8x1x80xf32> to vector<8x80xf32>
    %242 = arith.maximumf %239, %241 : vector<8x80xf32>
    %243 = vector.broadcast %217 : vector<1x80xf32> to vector<8x80xf32>
    %244 = arith.addf %242, %243 : vector<8x80xf32>
    %cst_210 = arith.constant 0.000000e+00 : f32
    %245 = vector.broadcast %cst_210 : f32 to vector<8x80xf32>
    %246 = arith.maximumf %244, %245 : vector<8x80xf32>
    %c0_211 = arith.constant 0 : index
    %c160 = arith.constant 160 : index
    %247 = vector.load %arg18[%c0_211, %c160] : memref<8x320xf32, #tpu.memory_space<vmem>>, vector<8x80xf32>
    tpu.vector_store %arg18[%c0_211, %c160], %246 {strides = array<i32>} : memref<8x320xf32, #tpu.memory_space<vmem>>, vector<8x80xf32>,
    %c0_212 = arith.constant 0 : index
    %c6_213 = arith.constant 6 : index
    %c0_214 = arith.constant 0 : index
    %248 = vector.load %arg17[%c0_212, %c6_213, %c0_214] : memref<8x8x80xf32, #tpu.memory_space<vmem>>, vector<8x1x80xf32>
    %249 = vector.shape_cast %248 : vector<8x1x80xf32> to vector<8x80xf32>
    %c0_215 = arith.constant 0 : index
    %c7_216 = arith.constant 7 : index
    %c0_217 = arith.constant 0 : index
    %250 = vector.load %arg17[%c0_215, %c7_216, %c0_217] : memref<8x8x80xf32, #tpu.memory_space<vmem>>, vector<8x1x80xf32>
    %251 = vector.shape_cast %250 : vector<8x1x80xf32> to vector<8x80xf32>
    %252 = arith.maximumf %249, %251 : vector<8x80xf32>
    %253 = vector.broadcast %217 : vector<1x80xf32> to vector<8x80xf32>
    %254 = arith.addf %252, %253 : vector<8x80xf32>
    %cst_218 = arith.constant 0.000000e+00 : f32
    %255 = vector.broadcast %cst_218 : f32 to vector<8x80xf32>
    %256 = arith.maximumf %254, %255 : vector<8x80xf32>
    %c0_219 = arith.constant 0 : index
    %c240 = arith.constant 240 : index
    %257 = vector.load %arg18[%c0_219, %c240] : memref<8x320xf32, #tpu.memory_space<vmem>>, vector<8x80xf32>
    tpu.vector_store %arg18[%c0_219, %c240], %256 {strides = array<i32>} : memref<8x320xf32, #tpu.memory_space<vmem>>, vector<8x80xf32>,
    %c0_220 = arith.constant 0 : index
    %c0_221 = arith.constant 0 : index
    %258 = vector.load %arg18[%c0_220, %c0_221] : memref<8x320xf32, #tpu.memory_space<vmem>>, vector<8x320xf32>
    %c0_222 = arith.constant 0 : index
    %c0_223 = arith.constant 0 : index
    %259 = vector.load %arg10[%c0_222, %c0_223] : memref<320x64xf32, #tpu.memory_space<vmem>>, vector<320x64xf32>
    %cst_224 = arith.constant dense<0.000000e+00> : vector<8x64xf32>
    %260 = tpu.matmul %258, %259, %cst_224 {dimension_numbers = #tpu.dot_dimension_numbers<[1], [0], [0], [1], [0, 0, 1, 1], [], []>} : vector<8x320xf32>, vector<320x64xf32>, vector<8x64xf32> -> vector<8x64xf32>
    %c0_225 = arith.constant 0 : index
    %c0_226 = arith.constant 0 : index
    %261 = vector.load %arg11[%c0_225, %c0_226] : memref<1x64xf32, #tpu.memory_space<vmem>>, vector<1x64xf32>
    %262 = vector.broadcast %261 : vector<1x64xf32> to vector<8x64xf32>
    %263 = arith.addf %260, %262 : vector<8x64xf32>
    %cst_227 = arith.constant 0.000000e+00 : f32
    %264 = vector.broadcast %cst_227 : f32 to vector<8x64xf32>
    %265 = arith.maximumf %263, %264 : vector<8x64xf32>
    %c0_228 = arith.constant 0 : index
    %c0_229 = arith.constant 0 : index
    %266 = vector.load %arg12[%c0_228, %c0_229] : memref<64x128xf32, #tpu.memory_space<vmem>>, vector<64x128xf32>
    %cst_230 = arith.constant dense<0.000000e+00> : vector<8x128xf32>
    %267 = tpu.matmul %265, %266, %cst_230 {dimension_numbers = #tpu.dot_dimension_numbers<[1], [0], [0], [1], [0, 0, 1, 1], [], []>} : vector<8x64xf32>, vector<64x128xf32>, vector<8x128xf32> -> vector<8x128xf32>
    %c0_231 = arith.constant 0 : index
    %c0_232 = arith.constant 0 : index
    %268 = vector.load %arg13[%c0_231, %c0_232] : memref<1x128xf32, #tpu.memory_space<vmem>>, vector<1x128xf32>
    %269 = vector.broadcast %268 : vector<1x128xf32> to vector<8x128xf32>
    %270 = arith.addf %267, %269 : vector<8x128xf32>
    %cst_233 = arith.constant 0.000000e+00 : f32
    %271 = vector.broadcast %cst_233 : f32 to vector<8x128xf32>
    %272 = arith.maximumf %270, %271 : vector<8x128xf32>
    %273 = tpu.iota {dimensions = array<i32: 1>} : vector<8x128xi32>
    %c10_i32 = arith.constant 10 : i32
    %274 = vector.broadcast %c10_i32 : i32 to vector<8x128xi32>
    %275 = arith.cmpi slt, %273, %274 : vector<8x128xi32>
    %cst_234 = arith.constant -1.000000e+30 : f32
    %276 = vector.broadcast %cst_234 : f32 to vector<8x128xf32>
    %277 = arith.select %275, %272, %276 : vector<8x128xi1>, vector<8x128xf32>
    %cst_235 = arith.constant dense<0xFF800000> : vector<8xf32>
    %278 = vector.multi_reduction <maximumf>, %277, %cst_235 [1] : vector<8x128xf32> to vector<8xf32>
    %279 = vector.shape_cast %278 : vector<8xf32> to vector<8x1xf32>
    %280 = vector.broadcast %279 : vector<8x1xf32> to vector<8x128xf32>
    %281 = arith.subf %277, %280 : vector<8x128xf32>
    %282 = math.exp %281 : vector<8x128xf32>
    %cst_236 = arith.constant dense<0.000000e+00> : vector<8xf32>
    %283 = vector.multi_reduction <add>, %282, %cst_236 [1] : vector<8x128xf32> to vector<8xf32>
    %284 = vector.shape_cast %283 : vector<8xf32> to vector<8x1xf32>
    %285 = math.log %284 : vector<8x1xf32>
    %286 = vector.broadcast %285 : vector<8x1xf32> to vector<8x128xf32>
    %287 = arith.subf %281, %286 : vector<8x128xf32>
    %c0_237 = arith.constant 0 : index
    %c0_238 = arith.constant 0 : index
    %288 = vector.load %arg14[%c0_237, %c0_238] : memref<8x128xf32, #tpu.memory_space<vmem>>, vector<8x128xf32>
    tpu.vector_store %arg14[%c0_237, %c0_238], %287 {strides = array<i32>} : memref<8x128xf32, #tpu.memory_space<vmem>>, vector<8x128xf32>,
    return
  }
  func.func @transform_0(%arg0: i32) -> (i32, i32, i32) {
    %c0_i32 = arith.constant 0 : i32
    %c0_i32_0 = arith.constant 0 : i32
    %c0_i32_1 = arith.constant 0 : i32
    return %arg0, %c0_i32, %c0_i32_0 : i32, i32, i32
  }
  func.func @transform_1(%arg0: i32) -> (i32, i32, i32) {
    %c0_i32 = arith.constant 0 : i32
    %c0_i32_0 = arith.constant 0 : i32
    %c0_i32_1 = arith.constant 0 : i32
    %c0_i32_2 = arith.constant 0 : i32
    return %c0_i32, %c0_i32_0, %c0_i32_1 : i32, i32, i32
  }
  func.func @transform_2(%arg0: i32) -> (i32, i32) {
    %c0_i32 = arith.constant 0 : i32
    %c0_i32_0 = arith.constant 0 : i32
    %c0_i32_1 = arith.constant 0 : i32
    return %c0_i32, %c0_i32_0 : i32, i32
  }
  func.func @transform_3(%arg0: i32) -> (i32, i32) {
    %c0_i32 = arith.constant 0 : i32
    %c0_i32_0 = arith.constant 0 : i32
    %c0_i32_1 = arith.constant 0 : i32
    return %c0_i32, %c0_i32_0 : i32, i32
  }
  func.func @transform_4(%arg0: i32) -> (i32, i32) {
    %c0_i32 = arith.constant 0 : i32
    %c0_i32_0 = arith.constant 0 : i32
    %c0_i32_1 = arith.constant 0 : i32
    return %c0_i32, %c0_i32_0 : i32, i32
  }
  func.func @transform_5(%arg0: i32) -> (i32, i32, i32) {
    %c0_i32 = arith.constant 0 : i32
    %c0_i32_0 = arith.constant 0 : i32
    %c0_i32_1 = arith.constant 0 : i32
    %c0_i32_2 = arith.constant 0 : i32
    return %c0_i32, %c0_i32_0, %c0_i32_1 : i32, i32, i32
  }
  func.func @transform_6(%arg0: i32) -> (i32, i32) {
    %c0_i32 = arith.constant 0 : i32
    %c0_i32_0 = arith.constant 0 : i32
    %c0_i32_1 = arith.constant 0 : i32
    return %c0_i32, %c0_i32_0 : i32, i32
  }
  func.func @transform_7(%arg0: i32) -> (i32, i32) {
    %c0_i32 = arith.constant 0 : i32
    %c0_i32_0 = arith.constant 0 : i32
    %c0_i32_1 = arith.constant 0 : i32
    return %c0_i32, %c0_i32_0 : i32, i32
  }
  func.func @transform_8(%arg0: i32) -> (i32, i32) {
    %c0_i32 = arith.constant 0 : i32
    %c0_i32_0 = arith.constant 0 : i32
    %c0_i32_1 = arith.constant 0 : i32
    return %c0_i32, %c0_i32_0 : i32, i32
  }
  func.func @transform_9(%arg0: i32) -> (i32, i32) {
    %c0_i32 = arith.constant 0 : i32
    %c0_i32_0 = arith.constant 0 : i32
    %c0_i32_1 = arith.constant 0 : i32
    return %c0_i32, %c0_i32_0 : i32, i32
  }
  func.func @transform_10(%arg0: i32) -> (i32, i32) {
    %c0_i32 = arith.constant 0 : i32
    %c0_i32_0 = arith.constant 0 : i32
    %c0_i32_1 = arith.constant 0 : i32
    return %c0_i32, %c0_i32_0 : i32, i32
  }
  func.func @transform_11(%arg0: i32) -> (i32, i32) {
    %c0_i32 = arith.constant 0 : i32
    %c0_i32_0 = arith.constant 0 : i32
    %c0_i32_1 = arith.constant 0 : i32
    return %c0_i32, %c0_i32_0 : i32, i32
  }
  func.func @transform_12(%arg0: i32) -> (i32, i32) {
    %c0_i32 = arith.constant 0 : i32
    %c0_i32_0 = arith.constant 0 : i32
    %c0_i32_1 = arith.constant 0 : i32
    return %c0_i32, %c0_i32_0 : i32, i32
  }
  func.func @transform_13(%arg0: i32) -> (i32, i32) {
    %c0_i32 = arith.constant 0 : i32
    %c0_i32_0 = arith.constant 0 : i32
    return %arg0, %c0_i32 : i32, i32
  }
}

</mosaic_0001>

<bundles_post_ra>
// kernel: net_forward.1
= control target key start
LH: loop header
LB: loop body
LE: loop exit
PB: predicated region body
PF: predicated region fallthrough
CT: control target
= control target key end

     0   :  { %vm182_vm0 = vcmask 1043456   ;;  %v5875_v3 = vmov 0.0   ;;  %vm5876_vm1 = vmmov 1   ;;  %vm109_vm3 = vcmask 228352   ;;  %s5878_s24 = smov 112   ;;  %s5879_s25 = smov 80   ;;  %s8702_s1 = inlined_call_operand.vmem [shape: f32[5,28,240], index: 1, kind: input, shape index: {}]   ;;  %s8703_s0 = inlined_call_operand.vmem [shape: f32[8,28,28], index: 0, kind: input, shape index: {}]   ;;  %s8704_s2 = inlined_call_operand.vmem [shape: f32[240,120], index: 2, kind: input, shape index: {}]   ;;  %s8705_s3 = inlined_call_operand.vmem [shape: f32[240,120], index: 3, kind: input, shape index: {}]   ;;  %s8706_s5 = inlined_call_operand.vmem [shape: f32[5,120,160], index: 5, kind: input, shape index: {}]   ;;  %s8707_s4 = inlined_call_operand.vmem [shape: f32[1,120], index: 4, kind: input, shape index: {}]   ;;  %s8708_s6 = inlined_call_operand.vmem [shape: f32[160,80], index: 6, kind: input, shape index: {}]   ;;  %s8709_s7 = inlined_call_operand.vmem [shape: f32[160,80], index: 7, kind: input, shape index: {}]   ;;  %s8710_s9 = inlined_call_operand.vmem [shape: f32[320,64], index: 9, kind: input, shape index: {}]   ;;  %s8711_s8 = inlined_call_operand.vmem [shape: f32[1,80], index: 8, kind: input, shape index: {}]   ;;  %s8712_s11 = inlined_call_operand.vmem [shape: f32[64,128], index: 11, kind: input, shape index: {}]   ;;  %s8713_s10 = inlined_call_operand.vmem [shape: f32[1,64], index: 10, kind: input, shape index: {}]   ;;  %s8714_s12 = inlined_call_operand.vmem [shape: f32[1,128], index: 12, kind: input, shape index: {}]   ;;  %s8715_s13 = inlined_call_operand.vmem [shape: f32[8,128], index: 13, kind: output, shape index: {}]  }
   0x1   :  { %v4729_v0 = vld [vmem:[%s8702_s1 + $0x48] sm:$0xff]  ;;  %v4731_v1 = vld [vmem:[%s8702_s1 + $0x58] sm:$0xff]  ;;  %v4728_v2 = vld [vmem:[%s8702_s1 + $0x40] sm:$0xff]  ;;  %253 = vmatprep.mubr.f32.mxu0 %v5875_v3  ;;  %vm1819_vm4 = vcmask 916480   ;;  %vm2316_vm5 = vcmask 982016   ;;  %vm2388_vm6 = vcmask 974848  }
   0x2   :  { %v5211_v4 = vpack.c.bf16 %v4731_v1, %v4729_v0  ;;  %v4730_v5 = vld [vmem:[%s8702_s1 + $0x50] sm:$0xff]  ;;  %v4733_v6 = vld [vmem:[%s8702_s1 + $0x68] sm:$0xff]  ;;  %v4735_v7 = vld [vmem:[%s8702_s1 + $0x78] sm:$0xf]  ;;  %vm3872_vm7 = vcmask 261120   ;;  %vm4135_vm8 = vcmask 654336  }
   0x3   :  { %v5213_v8 = vpack.c.bf16 %v4730_v5, %v4728_v2  ;;  %v5215_v9 = vpack.c.bf16 %v4735_v7, %v4733_v6  ;;  %vm5971_vm2 = vmpackc.low %vm182_vm0, %vm5876_vm1  ;;  %v4732_v11 = vld [vmem:[%s8702_s1 + $0x60] sm:$0xff]  ;;  %v4734_v12 = vld [vmem:[%s8702_s1 + $0x70] sm:$0xf]  ;;  %vm4200_vm9 = vcmask 1041409   ;;  %vm4203_vm10 = vcmask 1042434   ;;  %s5880_s17 = smov 32  }
   0x4   :  { %5212 = vmatprep.subr.bf16.mxu0 %v5211_v4  ;;  %v69_v13 = vld [vmem:[%s8702_s1 + $0x8] sm:$0xff]  ;;  %v71_v14 = vld [vmem:[%s8702_s1 + $0x18] sm:$0xff]  ;;  %v5218_v15 = vpack.c.bf16 %v4734_v12, %v4732_v11  ;;  %v68_v17 = vld [vmem:[%s8702_s1] sm:$0xff]  ;;  %vm4206_vm11 = vcmask 1043459   ;;  %vm4209_vm12 = vcmask 1044484   ;;  %vm4212_vm13 = vcmask 1045509  }
   0x5   :  { %5214 = vmatpush1.bf16.msra.mxu0 %v5213_v8  ;;  %v5221_v16 = vpack.c.bf16 %v71_v14, %v69_v13  ;;  %v70_v18 = vld [vmem:[%s8702_s1 + $0x10] sm:$0xff]  ;;  %v76_v19 = vld [vmem:[%s8703_s0 + $0x1] sm:$0xff]  ;;  %v75_v22 = vld [vmem:[%s8702_s1 + $0x38] sm:$0xf]  ;;  %vm4215_vm14 = vcmask 1046534   ;;  %vm4218_vm15 = vcmask 1047559  }
   0x6   :  { %5217 = vmatprep.subr.msk.bf16.mxu0 %vm5971_vm2, %v5215_v9  ;;  %v5223_v20 = vpack.c.bf16 %v70_v18, %v68_v17  ;;  %v73_v21 = vld [vmem:[%s8702_s1 + $0x28] sm:$0xff]  ;;  %v72_v23 = vld [vmem:[%s8702_s1 + $0x20] sm:$0xff]  ;;  %v74_v24 = vld [vmem:[%s8702_s1 + $0x30] sm:$0xf]  ;;  %vm5881_vm0 = vmmov 0   ;;  %vm4424_vm1 = vcmask 523264  }
   0x7   :  { %v5225_v25 = vpack.c.bf16 %v75_v22, %v73_v21  ;;  %v77_v26 = vld [vmem:[%s8703_s0 + $0x9] sm:$0xff]  ;;  %v5228_v27 = vpack.c.bf16 %v74_v24, %v72_v23  ;;  %v4791_v29 = vld [vmem:[%s8702_s1 + $0x98] sm:$0xff]  ;;  %v79_v32 = vld [vmem:[%s8703_s0 + $0x21] sm:$0xff] }
   0x8   :  { %v4789_v28 = vld [vmem:[%s8702_s1 + $0x88] sm:$0xff]  ;;  %v78_v31 = vld [vmem:[%s8703_s0 + $0x11] sm:$0xff]  ;;  %v4788_v53 = vld [vmem:[%s8702_s1 + $0x80] sm:$0xff] }
   0x9   :  { %5220 = vmatpush1.bf16.msk.msra.mxu0 %vm5971_vm2, %v5218_v15  ;;  %v5231_v30 = vpack.c.bf16 %v4791_v29, %v4789_v28  ;;  %v80_v33 = vld [vmem:[%s8703_s0 + $0x29] sm:$0xff]  ;;  %v81_v34 = vld [vmem:[%s8703_s0 + $0x31] sm:$0xff]  ;;  %v82_v35 = vld [vmem:[%s8703_s0 + $0x41] sm:$0xff] }
   0xa   :  { %5222 = vmatprep.subr.bf16.mxu0 %v5221_v16  ;;  %v83_v36 = vld [vmem:[%s8703_s0 + $0x49] sm:$0xff]  ;;  %v84_v37 = vld [vmem:[%s8703_s0 + $0x51] sm:$0xff]  ;;  %v85_v38 = vld [vmem:[%s8703_s0 + $0x61] sm:$0xff] }
   0xb   :  { %v86_v39 = vld [vmem:[%s8703_s0 + $0x69] sm:$0xff]  ;;  %v87_v40 = vld [vmem:[%s8703_s0 + $0x71] sm:$0xff]  ;;  %v88_v41 = vld [vmem:[%s8703_s0 + $0x81] sm:$0xff] }
   0xc   :  { %4738 = vmatmul.mubr.msk.f32.vlgmr.msra.gmra.mrb[0].mxu0 %vm109_vm3, %v76_v19  ;;  %v89_v42 = vld [vmem:[%s8703_s0 + $0x89] sm:$0xff]  ;;  %v90_v43 = vld [vmem:[%s8703_s0 + $0x91] sm:$0xff]  ;;  %v91_v44 = vld [vmem:[%s8703_s0 + $0xa1] sm:$0xff] }
   0xd   :  { %5224 = vmatpush1.bf16.msra.mxu0 %v5223_v20  ;;  %259 = vmatprep.mubr.f32.mxu0 %v5875_v3  ;;  %v92_v45 = vld [vmem:[%s8703_s0 + $0xa9] sm:$0xff]  ;;  %v93_v46 = vld [vmem:[%s8703_s0 + $0xb1] sm:$0xff]  ;;  %v94_v47 = vld [vmem:[%s8703_s0 + $0xc1] sm:$0xff] }
   0xe   :  { %5227 = vmatprep.subr.msk.bf16.mxu0 %vm5971_vm2, %v5225_v25  ;;  %v95_v48 = vld [vmem:[%s8703_s0 + $0xc9] sm:$0xff]  ;;  %v96_v49 = vld [vmem:[%s8703_s0 + $0xd1] sm:$0xff]  ;;  %v97_v50 = vld [vmem:[%s8703_s0 + $0xe1] sm:$0xff] }
   0xf   :  { %v98_v51 = vld [vmem:[%s8703_s0 + $0xe9] sm:$0xff]  ;;  %v99_v52 = vld [vmem:[%s8703_s0 + $0xf1] sm:$0xff]  ;;  %v44_v57 = vld [vmem:[%s8703_s0] sm:$0xff] }
  0x10   :  { %4739 = vmatmul.mubr.msk.f32.gmra.mrb[2].mxu0 %vm109_vm3, %v77_v26  ;;  %v4790_v54 = vld [vmem:[%s8702_s1 + $0x90] sm:$0xff]  ;;  %v4793_v55 = vld [vmem:[%s8702_s1 + $0xa8] sm:$0xff]  ;;  %v4795_v56 = vld [vmem:[%s8702_s1 + $0xb8] sm:$0xf] }
  0x11   :  { %265 = vmatprep.mubr.f32.mxu0 %v5875_v3  ;;  %5230 = vmatpush1.bf16.msk.msra.mxu0 %vm5971_vm2, %v5228_v27  ;;  %v5233_v58 = vpack.c.bf16 %v4790_v54, %v4788_v53  ;;  %v5235_v59 = vpack.c.bf16 %v4795_v56, %v4793_v55  ;;  %v4792_v60 = vld [vmem:[%s8702_s1 + $0xa0] sm:$0xff]  ;;  %v4794_v61 = vld [vmem:[%s8702_s1 + $0xb0] sm:$0xf]  ;;  %v4823_v62 = vld [vmem:[%s8702_s1 + $0xc8] sm:$0xff] }
  0x12   :  { %5232 = vmatprep.subr.bf16.mxu0 %v5231_v30  ;;  %v4825_v63 = vld [vmem:[%s8702_s1 + $0xd8] sm:$0xff]  ;;  %v45_v0 = vld [vmem:[%s8703_s0 + $0x8] sm:$0xff]  ;;  %v5238_v1 = vpack.c.bf16 %v4794_v61, %v4792_v60  ;;  %v46_v4 = vld [vmem:[%s8703_s0 + $0x10] sm:$0xff] }
  0x13   :  { %v5241_v2 = vpack.c.bf16 %v4825_v63, %v4823_v62  ;;  %v47_v5 = vld [vmem:[%s8703_s0 + $0x20] sm:$0xff]  ;;  %v48_v6 = vld [vmem:[%s8703_s0 + $0x28] sm:$0xff]  ;;  %v49_v7 = vld [vmem:[%s8703_s0 + $0x30] sm:$0xff] }
  0x14   :  { %4740 = vmatmul.mubr.msk.f32.gmra.mrb[4].mxu0 %vm109_vm3, %v78_v31  ;;  %v50_v8 = vld [vmem:[%s8703_s0 + $0x40] sm:$0xff]  ;;  %v51_v9 = vld [vmem:[%s8703_s0 + $0x48] sm:$0xff]  ;;  %v52_v11 = vld [vmem:[%s8703_s0 + $0x50] sm:$0xff] }
  0x15   :  { %271 = vmatprep.mubr.f32.mxu0 %v5875_v3  ;;  %v53_v12 = vld [vmem:[%s8703_s0 + $0x60] sm:$0xff]  ;;  %v54_v13 = vld [vmem:[%s8703_s0 + $0x68] sm:$0xff]  ;;  %v55_v14 = vld [vmem:[%s8703_s0 + $0x70] sm:$0xff] }
  0x16   :  { %v56_v15 = vld [vmem:[%s8703_s0 + $0x80] sm:$0xff]  ;;  %v57_v16 = vld [vmem:[%s8703_s0 + $0x88] sm:$0xff]  ;;  %v58_v17 = vld [vmem:[%s8703_s0 + $0x90] sm:$0xff] }
  0x17   :  { %v59_v18 = vld [vmem:[%s8703_s0 + $0xa0] sm:$0xff]  ;;  %v60_v19 = vld [vmem:[%s8703_s0 + $0xa8] sm:$0xff]  ;;  %v61_v20 = vld [vmem:[%s8703_s0 + $0xb0] sm:$0xff] }
  0x18   :  { %4741 = vmatmul.mubr.msk.f32.gmra.mrb[6].mxu0 %vm109_vm3, %v79_v32  ;;  %v62_v21 = vld [vmem:[%s8703_s0 + $0xc0] sm:$0xff]  ;;  %v63_v22 = vld [vmem:[%s8703_s0 + $0xc8] sm:$0xff]  ;;  %v64_v23 = vld [vmem:[%s8703_s0 + $0xd0] sm:$0xff] }
  0x19   :  { %277 = vmatprep.mubr.f32.mxu0 %v5875_v3  ;;  %v65_v24 = vld [vmem:[%s8703_s0 + $0xe0] sm:$0xff]  ;;  %v66_v25 = vld [vmem:[%s8703_s0 + $0xe8] sm:$0xff]  ;;  %v67_v26 = vld [vmem:[%s8703_s0 + $0xf0] sm:$0xff] }
  0x1a   :  { %v4822_v27 = vld [vmem:[%s8702_s1 + $0xc0] sm:$0xff]  ;;  %v4824_v28 = vld [vmem:[%s8702_s1 + $0xd0] sm:$0xff]  ;;  %v4827_v29 = vld [vmem:[%s8702_s1 + $0xe8] sm:$0xff] }
  0x1b   :  { %v4829_v30 = vld [vmem:[%s8702_s1 + $0xf8] sm:$0xf]  ;;  %v685_v31 = vld [vmem:[%s8703_s0 + $0x2] sm:$0xff]  ;;  %v5243_v32 = vpack.c.bf16 %v4824_v28, %v4822_v27  ;;  %v701_v55 = vld [vmem:[%s8703_s0 + $0xaa] sm:$0xff] }
  0x1c   :  { %4742 = vmatmul.mubr.msk.f32.gmra.mrb[8].mxu0 %vm109_vm3, %v80_v33  ;;  %v5245_v33 = vpack.c.bf16 %v4829_v30, %v4827_v29  ;;  %v699_v53 = vld [vmem:[%s8703_s0 + $0x92] sm:$0xff]  ;;  %v700_v54 = vld [vmem:[%s8703_s0 + $0xa2] sm:$0xff]  ;;  %v707_v61 = vld [vmem:[%s8703_s0 + $0xea] sm:$0xff] }
  0x1d   :  { %283 = vmatprep.mubr.f32.mxu0 %v5875_v3  ;;  %v702_v56 = vld [vmem:[%s8703_s0 + $0xb2] sm:$0xff]  ;;  %v706_v60 = vld [vmem:[%s8703_s0 + $0xe2] sm:$0xff] }
  0x1e   :  { %v708_v62 = vld [vmem:[%s8703_s0 + $0xf2] sm:$0xff]  ;;  %v4856_v63 = vld [vmem:[%s8702_s1 + $0x100] sm:$0xff]  ;;  %v1790_v28 = vld [vmem:[%s8704_s2 + $0x8] sm:$0xff] }
  0x1f   :  { %v1058_v10 = vld [vmem:[%s8703_s0 + $0x33] sm:$0xff]  ;;  %v1789_v27 = vld [vmem:[%s8704_s2] sm:$0xff] }
  0x20   :  { %4743 = vmatmul.mubr.msk.f32.gmra.mrb[10].mxu0 %vm109_vm3, %v81_v34  ;;  %v4826_v34 = vld [vmem:[%s8702_s1 + $0xe0] sm:$0xff]  ;;  %v1791_v29 = vld [vmem:[%s8704_s2 + $0x10] sm:$0xff]  ;;  %v5262_v30 = vpack.c.bf16 %v1790_v28, %v1789_v27 }
  0x21   :  { %289 = vmatprep.mubr.f32.mxu0 %v5875_v3  ;;  %v1434_v27 = vld [vmem:[%s8703_s0 + $0x8c] sm:$0xff]  ;;  %v1435_v28 = vld [vmem:[%s8703_s0 + $0x94] sm:$0xff] }
  0x24   :  { %4744 = vmatmul.mubr.msk.f32.gmra.mrb[12].mxu0 %vm109_vm3, %v82_v35  ;;  %v4828_v35 = vld [vmem:[%s8702_s1 + $0xf0] sm:$0xf] }
  0x25   :  { %295 = vmatprep.mubr.f32.mxu0 %v5875_v3 }
  0x28   :  { %4745 = vmatmul.mubr.msk.f32.gmra.mrb[14].mxu0 %vm109_vm3, %v83_v36  ;;  %v4857_v36 = vld [vmem:[%s8702_s1 + $0x108] sm:$0xff] }
  0x29   :  { %301 = vmatprep.mubr.f32.mxu0 %v5875_v3 }
  0x2c   :  { %4746 = vmatmul.mubr.msk.f32.gmra.mrb[16].mxu0 %vm109_vm3, %v84_v37  ;;  %v4859_v37 = vld [vmem:[%s8702_s1 + $0x118] sm:$0xff] }
  0x2d   :  { %307 = vmatprep.mubr.f32.mxu0 %v5875_v3 }
  0x30   :  { %4747 = vmatmul.mubr.msk.f32.gmra.mrb[18].mxu0 %vm109_vm3, %v85_v38  ;;  %v686_v38 = vld [vmem:[%s8703_s0 + $0xa] sm:$0xff] }
  0x31   :  { %313 = vmatprep.mubr.f32.mxu0 %v5875_v3 }
  0x34   :  { %4748 = vmatmul.mubr.msk.f32.gmra.mrb[20].mxu0 %vm109_vm3, %v86_v39  ;;  %v5248_v39 = vpack.c.bf16 %v4828_v35, %v4826_v34  ;;  %v1793_v34 = vld [vmem:[%s8704_s2 + $0x20] sm:$0xff]  ;;  %v1794_v35 = vld [vmem:[%s8704_s2 + $0x28] sm:$0xff] }
  0x35   :  { %319 = vmatprep.mubr.f32.mxu0 %v5875_v3 }
  0x38   :  { %4749 = vmatmul.mubr.msk.f32.gmra.mrb[22].mxu0 %vm109_vm3, %v87_v40  ;;  %v5251_v40 = vpack.c.bf16 %v4859_v37, %v4857_v36  ;;  %v5268_v36 = vpack.c.bf16 %v1794_v35, %v1793_v34  ;;  %v1071_v37 = vld [vmem:[%s8703_s0 + $0xc3] sm:$0xff]  ;;  %v1441_v34 = vld [vmem:[%s8703_s0 + $0xd4] sm:$0xff] }
  0x39   :  { %325 = vmatprep.mubr.f32.mxu0 %v5875_v3  ;;  %v1817_v35 = vld [vmem:[%s8704_s2 + $0xe0] sm:$0xff] }
  0x3c   :  { %4750 = vmatmul.mubr.msk.f32.gmra.mrb[24].mxu0 %vm109_vm3, %v88_v41  ;;  %v687_v41 = vld [vmem:[%s8703_s0 + $0x12] sm:$0xff] }
  0x3d   :  { %331 = vmatprep.mubr.f32.mxu0 %v5875_v3 }
  0x40   :  { %4751 = vmatmul.mubr.msk.f32.gmra.mrb[26].mxu0 %vm109_vm3, %v89_v42  ;;  %v688_v42 = vld [vmem:[%s8703_s0 + $0x22] sm:$0xff] }
  0x41   :  { %337 = vmatprep.mubr.f32.mxu0 %v5875_v3 }
  0x44   :  { %4752 = vmatmul.mubr.msk.f32.gmra.mrb[28].mxu0 %vm109_vm3, %v90_v43  ;;  %v689_v43 = vld [vmem:[%s8703_s0 + $0x2a] sm:$0xff] }
  0x45   :  { %343 = vmatprep.mubr.f32.mxu0 %v5875_v3 }
  0x48   :  { %4753 = vmatmul.mubr.msk.f32.gmra.mrb[30].mxu0 %vm109_vm3, %v91_v44  ;;  %v690_v44 = vld [vmem:[%s8703_s0 + $0x32] sm:$0xff] }
  0x49   :  { %349 = vmatprep.mubr.f32.mxu0 %v5875_v3 }
  0x4c   :  { %4754 = vmatmul.mubr.msk.f32.gmra.mrb[32].mxu0 %vm109_vm3, %v92_v45  ;;  %v691_v45 = vld [vmem:[%s8703_s0 + $0x42] sm:$0xff] }
  0x4d   :  { %355 = vmatprep.mubr.f32.mxu0 %v5875_v3 }
  0x50   :  { %4755 = vmatmul.mubr.msk.f32.gmra.mrb[34].mxu0 %vm109_vm3, %v93_v46  ;;  %v692_v46 = vld [vmem:[%s8703_s0 + $0x4a] sm:$0xff] }
  0x51   :  { %361 = vmatprep.mubr.f32.mxu0 %v5875_v3 }
  0x54   :  { %4756 = vmatmul.mubr.msk.f32.gmra.mrb[36].mxu0 %vm109_vm3, %v94_v47  ;;  %v693_v47 = vld [vmem:[%s8703_s0 + $0x52] sm:$0xff] }
  0x55   :  { %367 = vmatprep.mubr.f32.mxu0 %v5875_v3 }
  0x58   :  { %4757 = vmatmul.mubr.msk.f32.gmra.mrb[38].mxu0 %vm109_vm3, %v95_v48  ;;  %v694_v48 = vld [vmem:[%s8703_s0 + $0x62] sm:$0xff] }
  0x59   :  { %373 = vmatprep.mubr.f32.mxu0 %v5875_v3 }
  0x5c   :  { %4758 = vmatmul.mubr.msk.f32.gmra.mrb[40].mxu0 %vm109_vm3, %v96_v49  ;;  %v695_v49 = vld [vmem:[%s8703_s0 + $0x6a] sm:$0xff] }
  0x5d   :  { %379 = vmatprep.mubr.f32.mxu0 %v5875_v3 }
  0x60   :  { %4759 = vmatmul.mubr.msk.f32.gmra.mrb[42].mxu0 %vm109_vm3, %v97_v50  ;;  %v696_v50 = vld [vmem:[%s8703_s0 + $0x72] sm:$0xff] }
  0x61   :  { %385 = vmatprep.mubr.f32.mxu0 %v5875_v3 }
  0x64   :  { %4760 = vmatmul.mubr.msk.f32.gmra.mrb[44].mxu0 %vm109_vm3, %v98_v51  ;;  %v697_v51 = vld [vmem:[%s8703_s0 + $0x82] sm:$0xff] }
  0x65   :  { %391 = vmatprep.mubr.f32.mxu0 %v5875_v3 }
  0x68   :  { %4761 = vmatmul.mubr.msk.f32.gmra.mrb[46].mxu0 %vm109_vm3, %v99_v52  ;;  %v698_v52 = vld [vmem:[%s8703_s0 + $0x8a] sm:$0xff] }
  0x69   :  { %540 = vmatprep.mubr.f32.mxu0 %v5875_v3 }
  0x6c   :  { %4764 = vmatmul.mubr.msk.f32.vlgmr.msra.gmra.mrb[0].mxu0 %vm109_vm3, %v44_v57  ;;  %v703_v57 = vld [vmem:[%s8703_s0 + $0xc2] sm:$0xff] }
  0x6d   :  { %5234 = vmatpush1.bf16.msra.mxu0 %v5233_v58  ;;  %546 = vmatprep.mubr.f32.mxu0 %v5875_v3  ;;  %v704_v58 = vld [vmem:[%s8703_s0 + $0xca] sm:$0xff] }
  0x6e   :  { %5237 = vmatprep.subr.msk.bf16.mxu0 %vm5971_vm2, %v5235_v59  ;;  %v705_v59 = vld [vmem:[%s8703_s0 + $0xd2] sm:$0xff] }
  0x70   :  { %4765 = vmatmul.mubr.msk.f32.gmra.mrb[2].mxu0 %vm109_vm3, %v45_v0  ;;  %v4858_v0 = vld [vmem:[%s8702_s1 + $0x110] sm:$0xff] }
  0x71   :  { %552 = vmatprep.mubr.f32.mxu0 %v5875_v3  ;;  %5240 = vmatpush1.bf16.msk.msra.mxu0 %vm5971_vm2, %v5238_v1  ;;  %v4861_v1 = vld [vmem:[%s8702_s1 + $0x128] sm:$0xff] }
  0x72   :  { %5242 = vmatprep.subr.bf16.mxu0 %v5241_v2  ;;  %v4863_v2 = vld [vmem:[%s8702_s1 + $0x138] sm:$0xf] }
  0x74   :  { %4766 = vmatmul.mubr.msk.f32.gmra.mrb[4].mxu0 %vm109_vm3, %v46_v4  ;;  %v1053_v4 = vld [vmem:[%s8703_s0 + $0x3] sm:$0xff] }
  0x75   :  { %558 = vmatprep.mubr.f32.mxu0 %v5875_v3 }
  0x78   :  { %4767 = vmatmul.mubr.msk.f32.gmra.mrb[6].mxu0 %vm109_vm3, %v47_v5  ;;  %v5253_v5 = vpack.c.bf16 %v4858_v0, %v4856_v63  ;;  %v1808_v63 = vld [vmem:[%s8704_s2 + $0x98] sm:$0xff] }
  0x79   :  { %564 = vmatprep.mubr.f32.mxu0 %v5875_v3 }
  0x7c   :  { %4768 = vmatmul.mubr.msk.f32.gmra.mrb[8].mxu0 %vm109_vm3, %v48_v6  ;;  %v5255_v6 = vpack.c.bf16 %v4863_v2, %v4861_v1  ;;  %v1422_v1 = vld [vmem:[%s8703_s0 + $0xc] sm:$0xff]  ;;  %v1809_v2 = vld [vmem:[%s8704_s2 + $0xa0] sm:$0xff] }
  0x7d   :  { %570 = vmatprep.mubr.f32.mxu0 %v5875_v3 }
  0x80   :  { %4769 = vmatmul.mubr.msk.f32.gmra.mrb[10].mxu0 %vm109_vm3, %v49_v7  ;;  %v4860_v7 = vld [vmem:[%s8702_s1 + $0x120] sm:$0xff] }
  0x81   :  { %576 = vmatprep.mubr.f32.mxu0 %v5875_v3 }
  0x84   :  { %4770 = vmatmul.mubr.msk.f32.gmra.mrb[12].mxu0 %vm109_vm3, %v50_v8  ;;  %v4862_v8 = vld [vmem:[%s8702_s1 + $0x130] sm:$0xf] }
  0x85   :  { %582 = vmatprep.mubr.f32.mxu0 %v5875_v3 }
  0x88   :  { %4771 = vmatmul.mubr.msk.f32.gmra.mrb[14].mxu0 %vm109_vm3, %v51_v9  ;;  %v1054_v9 = vld [vmem:[%s8703_s0 + $0xb] sm:$0xff] }
  0x89   :  { %588 = vmatprep.mubr.f32.mxu0 %v5875_v3 }
  0x8c   :  { %4772 = vmatmul.mubr.msk.f32.gmra.mrb[16].mxu0 %vm109_vm3, %v52_v11  ;;  %v5258_v11 = vpack.c.bf16 %v4862_v8, %v4860_v7  ;;  %v1811_v7 = vld [vmem:[%s8704_s2 + $0xb0] sm:$0xff]  ;;  %v1812_v8 = vld [vmem:[%s8704_s2 + $0xb8] sm:$0xff] }
  0x8d   :  { %594 = vmatprep.mubr.f32.mxu0 %v5875_v3 }
  0x90   :  { %4773 = vmatmul.mubr.msk.f32.gmra.mrb[18].mxu0 %vm109_vm3, %v53_v12  ;;  %v1055_v12 = vld [vmem:[%s8703_s0 + $0x13] sm:$0xff] }
  0x91   :  { %600 = vmatprep.mubr.f32.mxu0 %v5875_v3 }
  0x94   :  { %4774 = vmatmul.mubr.msk.f32.gmra.mrb[20].mxu0 %vm109_vm3, %v54_v13  ;;  %v1056_v13 = vld [vmem:[%s8703_s0 + $0x23] sm:$0xff] }
  0x95   :  { %606 = vmatprep.mubr.f32.mxu0 %v5875_v3 }
  0x98   :  { %4775 = vmatmul.mubr.msk.f32.gmra.mrb[22].mxu0 %vm109_vm3, %v55_v14  ;;  %v1057_v14 = vld [vmem:[%s8703_s0 + $0x2b] sm:$0xff] }
  0x99   :  { %612 = vmatprep.mubr.f32.mxu0 %v5875_v3 }
  0x9c   :  { %4776 = vmatmul.mubr.msk.f32.gmra.mrb[24].mxu0 %vm109_vm3, %v56_v15  ;;  %v1059_v15 = vld [vmem:[%s8703_s0 + $0x43] sm:$0xff] }
  0x9d   :  { %618 = vmatprep.mubr.f32.mxu0 %v5875_v3 }
  0xa0   :  { %4777 = vmatmul.mubr.msk.f32.gmra.mrb[26].mxu0 %vm109_vm3, %v57_v16  ;;  %v1060_v16 = vld [vmem:[%s8703_s0 + $0x4b] sm:$0xff] }
  0xa1   :  { %624 = vmatprep.mubr.f32.mxu0 %v5875_v3 }
  0xa4   :  { %4778 = vmatmul.mubr.msk.f32.gmra.mrb[28].mxu0 %vm109_vm3, %v58_v17  ;;  %v1061_v17 = vld [vmem:[%s8703_s0 + $0x53] sm:$0xff] }
  0xa5   :  { %630 = vmatprep.mubr.f32.mxu0 %v5875_v3 }
  0xa8   :  { %4779 = vmatmul.mubr.msk.f32.gmra.mrb[30].mxu0 %vm109_vm3, %v59_v18  ;;  %v1062_v18 = vld [vmem:[%s8703_s0 + $0x63] sm:$0xff] }
  0xa9   :  { %636 = vmatprep.mubr.f32.mxu0 %v5875_v3 }
  0xac   :  { %4780 = vmatmul.mubr.msk.f32.gmra.mrb[32].mxu0 %vm109_vm3, %v60_v19  ;;  %v1063_v19 = vld [vmem:[%s8703_s0 + $0x6b] sm:$0xff] }
  0xad   :  { %642 = vmatprep.mubr.f32.mxu0 %v5875_v3 }
  0xb0   :  { %4781 = vmatmul.mubr.msk.f32.gmra.mrb[34].mxu0 %vm109_vm3, %v61_v20  ;;  %v1064_v20 = vld [vmem:[%s8703_s0 + $0x73] sm:$0xff] }
  0xb1   :  { %648 = vmatprep.mubr.f32.mxu0 %v5875_v3 }
  0xb4   :  { %4782 = vmatmul.mubr.msk.f32.gmra.mrb[36].mxu0 %vm109_vm3, %v62_v21  ;;  %v1065_v21 = vld [vmem:[%s8703_s0 + $0x83] sm:$0xff] }
  0xb5   :  { %654 = vmatprep.mubr.f32.mxu0 %v5875_v3 }
  0xb8   :  { %4783 = vmatmul.mubr.msk.f32.gmra.mrb[38].mxu0 %vm109_vm3, %v63_v22  ;;  %v1066_v22 = vld [vmem:[%s8703_s0 + $0x8b] sm:$0xff] }
  0xb9   :  { %660 = vmatprep.mubr.f32.mxu0 %v5875_v3 }
  0xbc   :  { %4784 = vmatmul.mubr.msk.f32.gmra.mrb[40].mxu0 %vm109_vm3, %v64_v23  ;;  %v1067_v23 = vld [vmem:[%s8703_s0 + $0x93] sm:$0xff] }
  0xbd   :  { %666 = vmatprep.mubr.f32.mxu0 %v5875_v3 }
  0xc0   :  { %4785 = vmatmul.mubr.msk.f32.gmra.mrb[42].mxu0 %vm109_vm3, %v65_v24  ;;  %v1068_v24 = vld [vmem:[%s8703_s0 + $0xa3] sm:$0xff] }
  0xc1   :  { %672 = vmatprep.mubr.f32.mxu0 %v5875_v3 }
  0xc4   :  { %4786 = vmatmul.mubr.msk.f32.gmra.mrb[44].mxu0 %vm109_vm3, %v66_v25  ;;  %v1069_v25 = vld [vmem:[%s8703_s0 + $0xab] sm:$0xff] }
  0xc5   :  { %678 = vmatprep.mubr.f32.mxu0 %v5875_v3 }
  0xc8   :  { %4787 = vmatmul.mubr.msk.f32.gmra.mrb[46].mxu0 %vm109_vm3, %v67_v26  ;;  %v5877_v26 = vmov 0.0|0.0  }
  0xc9   :  { %860 = vmatprep.mubr.f32.mxu0 %v5875_v3  ;;  %5261 = vmatprep.subr.bf16.mxu1 %v5877_v26 }
  0xca   :  { %5263 = vmatpush1.bf16.msra.mxu1 %v5262_v30  ;;  %v1437_v30 = vld [vmem:[%s8703_s0 + $0xac] sm:$0xff] }
  0xcb   :  { %5264 = vmatprep.subr.bf16.mxu1 %v5877_v26 }
  0xcc   :  { %4798 = vmatmul.mubr.msk.f32.vlgmr.msra.gmra.mrb[0].mxu0 %vm109_vm3, %v685_v31  ;;  %v1792_v31 = vld [vmem:[%s8704_s2 + $0x18] sm:$0xff] }
  0xcd   :  { %5244 = vmatpush1.bf16.msra.mxu0 %v5243_v32  ;;  %866 = vmatprep.mubr.f32.mxu0 %v5875_v3  ;;  %v5265_v32 = vpack.c.bf16 %v1792_v31, %v1791_v29  ;;  %v1436_v29 = vld [vmem:[%s8703_s0 + $0xa4] sm:$0xff]  ;;  %v1438_v31 = vld [vmem:[%s8703_s0 + $0xb4] sm:$0xff] }
  0xce   :  { %5247 = vmatprep.subr.msk.bf16.mxu0 %vm5971_vm2, %v5245_v33  ;;  %v1070_v33 = vld [vmem:[%s8703_s0 + $0xb3] sm:$0xff] }
  0xcf   :  { %5266 = vmatpush1.bf16.msra.mxu1 %v5265_v32  ;;  %v1439_v32 = vld [vmem:[%s8703_s0 + $0xc4] sm:$0xff] }
  0xd0   :  { %4799 = vmatmul.mubr.msk.f32.gmra.mrb[2].mxu0 %vm109_vm3, %v686_v38  ;;  %5267 = vmatprep.subr.bf16.mxu1 %v5877_v26  ;;  %v1795_v38 = vld [vmem:[%s8704_s2 + $0x30] sm:$0xff] }
  0xd1   :  { %872 = vmatprep.mubr.f32.mxu0 %v5875_v3  ;;  %5250 = vmatpush1.bf16.msk.msra.mxu0 %vm5971_vm2, %v5248_v39  ;;  %v1796_v39 = vld [vmem:[%s8704_s2 + $0x38] sm:$0xff] }
  0xd2   :  { %5252 = vmatprep.subr.bf16.mxu0 %v5251_v40  ;;  %v5271_v40 = vpack.c.bf16 %v1796_v39, %v1795_v38  ;;  %v1443_v39 = vld [vmem:[%s8703_s0 + $0xec] sm:$0xff] }
  0xd3   :  { %5269 = vmatpush1.bf16.msra.mxu1 %v5268_v36  ;;  %v1818_v36 = vld [vmem:[%s8704_s2 + $0xe8] sm:$0xff] }
  0xd4   :  { %4800 = vmatmul.mubr.msk.f32.gmra.mrb[4].mxu0 %vm109_vm3, %v687_v41  ;;  %v1072_v41 = vld [vmem:[%s8703_s0 + $0xcb] sm:$0xff]  ;;  %5270 = vmatprep.subr.bf16.mxu1 %v5877_v26  ;;  %v5304_v38 = vpack.c.bf16 %v1818_v36, %v1817_v35  ;;  %v2100_v35 = vld [vmem:[%s8705_s3 + $0xb8] sm:$0xff] }
  0xd5   :  { %878 = vmatprep.mubr.f32.mxu0 %v5875_v3 }
  0xd7   :  { %5272 = vmatpush1.bf16.msra.mxu1 %v5271_v40  ;;  %v1444_v40 = vld [vmem:[%s8703_s0 + $0xf4] sm:$0xff] }
  0xd8   :  { %4801 = vmatmul.mubr.msk.f32.gmra.mrb[6].mxu0 %vm109_vm3, %v688_v42  ;;  %v1797_v42 = vld [vmem:[%s8704_s2 + $0x40] sm:$0xff]  ;;  %5273 = vmatprep.subr.bf16.mxu1 %v5877_v26 }
  0xd9   :  { %884 = vmatprep.mubr.f32.mxu0 %v5875_v3 }
  0xdc   :  { %4802 = vmatmul.mubr.msk.f32.gmra.mrb[8].mxu0 %vm109_vm3, %v689_v43  ;;  %v1798_v43 = vld [vmem:[%s8704_s2 + $0x48] sm:$0xff] }
  0xdd   :  { %890 = vmatprep.mubr.f32.mxu0 %v5875_v3 }
  0xe0   :  { %4803 = vmatmul.mubr.msk.f32.gmra.mrb[10].mxu0 %vm109_vm3, %v690_v44  ;;  %v5274_v44 = vpack.c.bf16 %v1798_v43, %v1797_v42  ;;  %v2078_v42 = vld [vmem:[%s8705_s3 + $0x8] sm:$0xff] }
  0xe1   :  { %896 = vmatprep.mubr.f32.mxu0 %v5875_v3 }
  0xe2   :  { %5275 = vmatpush1.bf16.msra.mxu1 %v5274_v44 }
  0xe3   :  { %5276 = vmatprep.subr.bf16.mxu1 %v5877_v26 }
  0xe4   :  { %4804 = vmatmul.mubr.msk.f32.gmra.mrb[12].mxu0 %vm109_vm3, %v691_v45  ;;  %v1073_v45 = vld [vmem:[%s8703_s0 + $0xd3] sm:$0xff] }
  0xe5   :  { %902 = vmatprep.mubr.f32.mxu0 %v5875_v3 }
  0xe8   :  { %4805 = vmatmul.mubr.msk.f32.gmra.mrb[14].mxu0 %vm109_vm3, %v692_v46  ;;  %v1799_v46 = vld [vmem:[%s8704_s2 + $0x50] sm:$0xff] }
  0xe9   :  { %908 = vmatprep.mubr.f32.mxu0 %v5875_v3 }
  0xec   :  { %4806 = vmatmul.mubr.msk.f32.gmra.mrb[16].mxu0 %vm109_vm3, %v693_v47  ;;  %v1800_v47 = vld [vmem:[%s8704_s2 + $0x58] sm:$0xff] }
  0xed   :  { %914 = vmatprep.mubr.f32.mxu0 %v5875_v3 }
  0xf0   :  { %4807 = vmatmul.mubr.msk.f32.gmra.mrb[18].mxu0 %vm109_vm3, %v694_v48  ;;  %v5277_v48 = vpack.c.bf16 %v1800_v47, %v1799_v46  ;;  %v2079_v46 = vld [vmem:[%s8705_s3 + $0x10] sm:$0xff]  ;;  %v2080_v47 = vld [vmem:[%s8705_s3 + $0x18] sm:$0xff] }
  0xf1   :  { %920 = vmatprep.mubr.f32.mxu0 %v5875_v3 }
  0xf2   :  { %5278 = vmatpush1.bf16.msra.mxu1 %v5277_v48 }
  0xf3   :  { %5279 = vmatprep.subr.bf16.mxu1 %v5877_v26 }
  0xf4   :  { %4808 = vmatmul.mubr.msk.f32.gmra.mrb[20].mxu0 %vm109_vm3, %v695_v49  ;;  %v1074_v49 = vld [vmem:[%s8703_s0 + $0xe3] sm:$0xff] }
  0xf5   :  { %926 = vmatprep.mubr.f32.mxu0 %v5875_v3 }
  0xf8   :  { %4809 = vmatmul.mubr.msk.f32.gmra.mrb[22].mxu0 %vm109_vm3, %v696_v50  ;;  %v1801_v50 = vld [vmem:[%s8704_s2 + $0x60] sm:$0xff] }
  0xf9   :  { %932 = vmatprep.mubr.f32.mxu0 %v5875_v3 }
  0xfc   :  { %4810 = vmatmul.mubr.msk.f32.gmra.mrb[24].mxu0 %vm109_vm3, %v697_v51  ;;  %v1802_v51 = vld [vmem:[%s8704_s2 + $0x68] sm:$0xff] }
  0xfd   :  { %938 = vmatprep.mubr.f32.mxu0 %v5875_v3 }
 0x100   :  { %4811 = vmatmul.mubr.msk.f32.gmra.mrb[26].mxu0 %vm109_vm3, %v698_v52  ;;  %v5280_v52 = vpack.c.bf16 %v1802_v51, %v1801_v50  ;;  %v2081_v51 = vld [vmem:[%s8705_s3 + $0x20] sm:$0xff] }
 0x101   :  { %944 = vmatprep.mubr.f32.mxu0 %v5875_v3 }
 0x102   :  { %5281 = vmatpush1.bf16.msra.mxu1 %v5280_v52  ;;  %v2082_v52 = vld [vmem:[%s8705_s3 + $0x28] sm:$0xff] }
 0x103   :  { %5282 = vmatprep.subr.bf16.mxu1 %v5877_v26 }
 0x104   :  { %4812 = vmatmul.mubr.msk.f32.gmra.mrb[28].mxu0 %vm109_vm3, %v699_v53  ;;  %v1075_v53 = vld [vmem:[%s8703_s0 + $0xeb] sm:$0xff] }
 0x105   :  { %950 = vmatprep.mubr.f32.mxu0 %v5875_v3 }
 0x108   :  { %4813 = vmatmul.mubr.msk.f32.gmra.mrb[30].mxu0 %vm109_vm3, %v700_v54  ;;  %v1803_v54 = vld [vmem:[%s8704_s2 + $0x70] sm:$0xff] }
 0x109   :  { %956 = vmatprep.mubr.f32.mxu0 %v5875_v3 }
 0x10c   :  { %4814 = vmatmul.mubr.msk.f32.gmra.mrb[32].mxu0 %vm109_vm3, %v701_v55  ;;  %v1804_v55 = vld [vmem:[%s8704_s2 + $0x78] sm:$0xff] }
 0x10d   :  { %962 = vmatprep.mubr.f32.mxu0 %v5875_v3 }
 0x110   :  { %4815 = vmatmul.mubr.msk.f32.gmra.mrb[34].mxu0 %vm109_vm3, %v702_v56  ;;  %v5283_v56 = vpack.c.bf16 %v1804_v55, %v1803_v54  ;;  %v5313_v54 = vpack.c.bf16 %v2082_v52, %v2081_v51 }
 0x111   :  { %968 = vmatprep.mubr.f32.mxu0 %v5875_v3 }
 0x112   :  { %5284 = vmatpush1.bf16.msra.mxu1 %v5283_v56  ;;  %v2083_v56 = vld [vmem:[%s8705_s3 + $0x30] sm:$0xff] }
 0x113   :  { %5285 = vmatprep.subr.bf16.mxu1 %v5877_v26 }
 0x114   :  { %4816 = vmatmul.mubr.msk.f32.gmra.mrb[36].mxu0 %vm109_vm3, %v703_v57  ;;  %v1076_v57 = vld [vmem:[%s8703_s0 + $0xf3] sm:$0xff] }
 0x115   :  { %974 = vmatprep.mubr.f32.mxu0 %v5875_v3 }
 0x118   :  { %4817 = vmatmul.mubr.msk.f32.gmra.mrb[38].mxu0 %vm109_vm3, %v704_v58  ;;  %v1805_v58 = vld [vmem:[%s8704_s2 + $0x80] sm:$0xff] }
 0x119   :  { %980 = vmatprep.mubr.f32.mxu0 %v5875_v3 }
 0x11c   :  { %4818 = vmatmul.mubr.msk.f32.gmra.mrb[40].mxu0 %vm109_vm3, %v705_v59  ;;  %v1806_v59 = vld [vmem:[%s8704_s2 + $0x88] sm:$0xff] }
 0x11d   :  { %986 = vmatprep.mubr.f32.mxu0 %v5875_v3 }
 0x120   :  { %4819 = vmatmul.mubr.msk.f32.gmra.mrb[42].mxu0 %vm109_vm3, %v706_v60  ;;  %v5286_v60 = vpack.c.bf16 %v1806_v59, %v1805_v58 }
 0x121   :  { %992 = vmatprep.mubr.f32.mxu0 %v5875_v3 }
 0x122   :  { %5287 = vmatpush1.bf16.msra.mxu1 %v5286_v60 }
 0x123   :  { %5288 = vmatprep.subr.bf16.mxu1 %v5877_v26 }
 0x124   :  { %4820 = vmatmul.mubr.msk.f32.gmra.mrb[44].mxu0 %vm109_vm3, %v707_v61  ;;  %v1421_v61 = vld [vmem:[%s8703_s0 + $0x4] sm:$0xff] }
 0x125   :  { %998 = vmatprep.mubr.f32.mxu0 %v5875_v3 }
 0x128   :  { %4821 = vmatmul.mubr.msk.f32.gmra.mrb[46].mxu0 %vm109_vm3, %v708_v62  ;;  %v1807_v62 = vld [vmem:[%s8704_s2 + $0x90] sm:$0xff] }
 0x129   :  { %1228 = vmatprep.mubr.f32.mxu0 %v5875_v3  ;;  %v5289_v0 = vpack.c.bf16 %v1808_v63, %v1807_v62  ;;  %v2086_v62 = vld [vmem:[%s8705_s3 + $0x48] sm:$0xff] }
 0x12b   :  { %5290 = vmatpush1.bf16.msra.mxu1 %v5289_v0 }
 0x12c   :  { %4832 = vmatmul.mubr.msk.f32.vlgmr.msra.gmra.mrb[0].mxu0 %vm109_vm3, %v1053_v4  ;;  %v1810_v4 = vld [vmem:[%s8704_s2 + $0xa8] sm:$0xff]  ;;  %5291 = vmatprep.subr.bf16.mxu1 %v5877_v26 }
 0x12d   :  { %5254 = vmatpush1.bf16.msra.mxu0 %v5253_v5  ;;  %1234 = vmatprep.mubr.f32.mxu0 %v5875_v3  ;;  %v5292_v5 = vpack.c.bf16 %v1810_v4, %v1809_v2  ;;  %v2087_v2 = vld [vmem:[%s8705_s3 + $0x50] sm:$0xff]  ;;  %v2088_v4 = vld [vmem:[%s8705_s3 + $0x58] sm:$0xff] }
 0x12e   :  { %5257 = vmatprep.subr.msk.bf16.mxu0 %vm5971_vm2, %v5255_v6  ;;  %v1423_v6 = vld [vmem:[%s8703_s0 + $0x14] sm:$0xff] }
 0x12f   :  { %5293 = vmatpush1.bf16.msra.mxu1 %v5292_v5 }
 0x130   :  { %4833 = vmatmul.mubr.msk.f32.gmra.mrb[2].mxu0 %vm109_vm3, %v1054_v9  ;;  %v5295_v9 = vpack.c.bf16 %v1812_v8, %v1811_v7  ;;  %5294 = vmatprep.subr.bf16.mxu1 %v5877_v26  ;;  %v2089_v8 = vld [vmem:[%s8705_s3 + $0x60] sm:$0xff] }
 0x131   :  { %1240 = vmatprep.mubr.f32.mxu0 %v5875_v3  ;;  %5260 = vmatpush1.bf16.msk.msra.mxu0 %vm5971_vm2, %v5258_v11  ;;  %v1424_v11 = vld [vmem:[%s8703_s0 + $0x24] sm:$0xff]  ;;  %vm4287_vm2 = vcmask 1048192  }
 0x133   :  { %5296 = vmatpush1.bf16.msra.mxu1 %v5295_v9  ;;  %v2090_v9 = vld [vmem:[%s8705_s3 + $0x68] sm:$0xff] }
 0x134   :  { %4834 = vmatmul.mubr.msk.f32.gmra.mrb[4].mxu0 %vm109_vm3, %v1055_v12  ;;  %v1813_v12 = vld [vmem:[%s8704_s2 + $0xc0] sm:$0xff]  ;;  %5297 = vmatprep.subr.bf16.mxu1 %v5877_v26 }
 0x135   :  { %1246 = vmatprep.mubr.f32.mxu0 %v5875_v3 }
 0x138   :  { %4835 = vmatmul.mubr.msk.f32.gmra.mrb[6].mxu0 %vm109_vm3, %v1056_v13  ;;  %v1814_v13 = vld [vmem:[%s8704_s2 + $0xc8] sm:$0xff] }
 0x139   :  { %1252 = vmatprep.mubr.f32.mxu0 %v5875_v3 }
 0x13c   :  { %4836 = vmatmul.mubr.msk.f32.gmra.mrb[8].mxu0 %vm109_vm3, %v1057_v14  ;;  %v5298_v14 = vpack.c.bf16 %v1814_v13, %v1813_v12  ;;  %v5325_v12 = vpack.c.bf16 %v2090_v9, %v2089_v8 }
 0x13d   :  { %1258 = vmatprep.mubr.f32.mxu0 %v5875_v3 }
 0x13e   :  { %5299 = vmatpush1.bf16.msra.mxu1 %v5298_v14  ;;  %v2091_v14 = vld [vmem:[%s8705_s3 + $0x70] sm:$0xff] }
 0x13f   :  { %5300 = vmatprep.subr.bf16.mxu1 %v5877_v26 }
 0x140   :  { %4837 = vmatmul.mubr.msk.f32.gmra.mrb[10].mxu0 %vm109_vm3, %v1058_v10  ;;  %v1425_v10 = vld [vmem:[%s8703_s0 + $0x2c] sm:$0xff] }
 0x141   :  { %1264 = vmatprep.mubr.f32.mxu0 %v5875_v3 }
 0x144   :  { %4838 = vmatmul.mubr.msk.f32.gmra.mrb[12].mxu0 %vm109_vm3, %v1059_v15  ;;  %v1815_v15 = vld [vmem:[%s8704_s2 + $0xd0] sm:$0xff] }
 0x145   :  { %1270 = vmatprep.mubr.f32.mxu0 %v5875_v3 }
 0x148   :  { %4839 = vmatmul.mubr.msk.f32.gmra.mrb[14].mxu0 %vm109_vm3, %v1060_v16  ;;  %v1816_v16 = vld [vmem:[%s8704_s2 + $0xd8] sm:$0xff] }
 0x149   :  { %1276 = vmatprep.mubr.f32.mxu0 %v5875_v3 }
 0x14c   :  { %4840 = vmatmul.mubr.msk.f32.gmra.mrb[16].mxu0 %vm109_vm3, %v1061_v17  ;;  %v5301_v17 = vpack.c.bf16 %v1816_v16, %v1815_v15 }
 0x14d   :  { %1282 = vmatprep.mubr.f32.mxu0 %v5875_v3 }
 0x14e   :  { %5302 = vmatpush1.bf16.msra.mxu1 %v5301_v17 }
 0x14f   :  { %5303 = vmatprep.subr.bf16.mxu1 %v5877_v26 }
 0x150   :  { %4841 = vmatmul.mubr.msk.f32.gmra.mrb[18].mxu0 %vm109_vm3, %v1062_v18  ;;  %v1426_v18 = vld [vmem:[%s8703_s0 + $0x34] sm:$0xff] }
 0x151   :  { %1288 = vmatprep.mubr.f32.mxu0 %v5875_v3 }
 0x152   :  { %5305 = vmatpush1.bf16.msra.mxu1 %v5304_v38 }
 0x153   :  { %5306 = vmatprep.subr.bf16.mxu1 %v5877_v26 }
 0x154   :  { %4842 = vmatmul.mubr.msk.f32.gmra.mrb[20].mxu0 %vm109_vm3, %v1063_v19  ;;  %v1427_v19 = vld [vmem:[%s8703_s0 + $0x44] sm:$0xff] }
 0x155   :  { %1294 = vmatprep.mubr.f32.mxu0 %v5875_v3 }
 0x158   :  { %4843 = vmatmul.mubr.msk.f32.gmra.mrb[22].mxu0 %vm109_vm3, %v1064_v20  ;;  %v1428_v20 = vld [vmem:[%s8703_s0 + $0x4c] sm:$0xff] }
 0x159   :  { %1300 = vmatprep.mubr.f32.mxu0 %v5875_v3 }
 0x15c   :  { %4844 = vmatmul.mubr.msk.f32.gmra.mrb[24].mxu0 %vm109_vm3, %v1065_v21  ;;  %v1429_v21 = vld [vmem:[%s8703_s0 + $0x54] sm:$0xff] }
 0x15d   :  { %1306 = vmatprep.mubr.f32.mxu0 %v5875_v3 }
 0x160   :  { %4845 = vmatmul.mubr.msk.f32.gmra.mrb[26].mxu0 %vm109_vm3, %v1066_v22  ;;  %v1430_v22 = vld [vmem:[%s8703_s0 + $0x64] sm:$0xff] }
 0x161   :  { %1312 = vmatprep.mubr.f32.mxu0 %v5875_v3 }
 0x164   :  { %4846 = vmatmul.mubr.msk.f32.gmra.mrb[28].mxu0 %vm109_vm3, %v1067_v23  ;;  %v1431_v23 = vld [vmem:[%s8703_s0 + $0x6c] sm:$0xff] }
 0x165   :  { %1318 = vmatprep.mubr.f32.mxu0 %v5875_v3 }
 0x168   :  { %4847 = vmatmul.mubr.msk.f32.gmra.mrb[30].mxu0 %vm109_vm3, %v1068_v24  ;;  %v1432_v24 = vld [vmem:[%s8703_s0 + $0x74] sm:$0xff] }
 0x169   :  { %1324 = vmatprep.mubr.f32.mxu0 %v5875_v3 }
 0x16c   :  { %4848 = vmatmul.mubr.msk.f32.gmra.mrb[32].mxu0 %vm109_vm3, %v1069_v25  ;;  %v1433_v25 = vld [vmem:[%s8703_s0 + $0x84] sm:$0xff] }
 0x16d   :  { %1330 = vmatprep.mubr.f32.mxu0 %v5875_v3 }
 0x170   :  { %4849 = vmatmul.mubr.msk.f32.gmra.mrb[34].mxu0 %vm109_vm3, %v1070_v33  ;;  %v1440_v33 = vld [vmem:[%s8703_s0 + $0xcc] sm:$0xff] }
 0x171   :  { %1336 = vmatprep.mubr.f32.mxu0 %v5875_v3 }
 0x174   :  { %4850 = vmatmul.mubr.msk.f32.gmra.mrb[36].mxu0 %vm109_vm3, %v1071_v37  ;;  %v1442_v37 = vld [vmem:[%s8703_s0 + $0xe4] sm:$0xff] }
 0x175   :  { %1342 = vmatprep.mubr.f32.mxu0 %v5875_v3 }
 0x178   :  { %4851 = vmatmul.mubr.msk.f32.gmra.mrb[38].mxu0 %vm109_vm3, %v1072_v41  ;;  %v2077_v41 = vld [vmem:[%s8705_s3] sm:$0xff] }
 0x179   :  { %1348 = vmatprep.mubr.f32.mxu0 %v5875_v3  ;;  %v5307_v44 = vpack.c.bf16 %v2078_v42, %v2077_v41 }
 0x17c   :  { %4852 = vmatmul.mubr.msk.f32.gmra.mrb[40].mxu0 %vm109_vm3, %v1073_v45 }
 0x17d   :  { %1354 = vmatprep.mubr.f32.mxu0 %v5875_v3 }
 0x180   :  { %4853 = vmatmul.mubr.msk.f32.gmra.mrb[42].mxu0 %vm109_vm3, %v1074_v49  ;;  %v5310_v49 = vpack.c.bf16 %v2080_v47, %v2079_v46  ;;  %v2103_v46 = vld [vmem:[%s8705_s3 + $0xd0] sm:$0xff]  ;;  %v2104_v47 = vld [vmem:[%s8705_s3 + $0xd8] sm:$0xff] }
 0x181   :  { %1360 = vmatprep.mubr.f32.mxu0 %v5875_v3  ;;  %v5346_v51 = vpack.c.bf16 %v2104_v47, %v2103_v46  ;;  %v4961_v46 = vld [vmem:[%s8706_s5 + $0x1a0] sm:$0xff] }
 0x184   :  { %4854 = vmatmul.mubr.msk.f32.gmra.mrb[44].mxu0 %vm109_vm3, %v1075_v53 }
 0x185   :  { %1366 = vmatprep.mubr.f32.mxu0 %v5875_v3 }
 0x188   :  { %4855 = vmatmul.mubr.msk.f32.gmra.mrb[46].mxu0 %vm109_vm3, %v1076_v57  ;;  %v2084_v57 = vld [vmem:[%s8705_s3 + $0x38] sm:$0xff] }
 0x189   :  { %1596 = vmatprep.mubr.f32.mxu0 %v5875_v3  ;;  %v5316_v59 = vpack.c.bf16 %v2084_v57, %v2083_v56  ;;  %v2106_v56 = vld [vmem:[%s8705_s3 + $0xe8] sm:$0xff] }
 0x18c   :  { %4866 = vmatmul.mubr.msk.f32.vlgmr.msra.gmra.mrb[0].mxu0 %vm109_vm3, %v1421_v61  ;;  %v2085_v61 = vld [vmem:[%s8705_s3 + $0x40] sm:$0xff] }
 0x18d   :  { %1602 = vmatprep.mubr.f32.mxu0 %v5875_v3  ;;  %v5319_v0 = vpack.c.bf16 %v2086_v62, %v2085_v61 }
 0x190   :  { %4867 = vmatmul.mubr.msk.f32.gmra.mrb[2].mxu0 %vm109_vm3, %v1422_v1 }
 0x191   :  { %1608 = vmatprep.mubr.f32.mxu0 %v5875_v3 }
 0x194   :  { %4868 = vmatmul.mubr.msk.f32.gmra.mrb[4].mxu0 %vm109_vm3, %v1423_v6  ;;  %v5322_v6 = vpack.c.bf16 %v2088_v4, %v2087_v2 }
 0x195   :  { %1614 = vmatprep.mubr.f32.mxu0 %v5875_v3 }
 0x198   :  { %4869 = vmatmul.mubr.msk.f32.gmra.mrb[6].mxu0 %vm109_vm3, %v1424_v11 }
 0x199   :  { %1620 = vmatprep.mubr.f32.mxu0 %v5875_v3 }
 0x19c   :  { %4870 = vmatmul.mubr.msk.f32.gmra.mrb[8].mxu0 %vm109_vm3, %v1425_v10  ;;  %v2092_v10 = vld [vmem:[%s8705_s3 + $0x78] sm:$0xff] }
 0x19d   :  { %1626 = vmatprep.mubr.f32.mxu0 %v5875_v3  ;;  %v5328_v16 = vpack.c.bf16 %v2092_v10, %v2091_v14 }
 0x1a0   :  { %4871 = vmatmul.mubr.msk.f32.gmra.mrb[10].mxu0 %vm109_vm3, %v1426_v18  ;;  %v2093_v18 = vld [vmem:[%s8705_s3 + $0x80] sm:$0xff] }
 0x1a1   :  { %1632 = vmatprep.mubr.f32.mxu0 %v5875_v3 }
 0x1a4   :  { %4872 = vmatmul.mubr.msk.f32.gmra.mrb[12].mxu0 %vm109_vm3, %v1427_v19  ;;  %v2094_v19 = vld [vmem:[%s8705_s3 + $0x88] sm:$0xff] }
 0x1a5   :  { %1638 = vmatprep.mubr.f32.mxu0 %v5875_v3 }
 0x1a8   :  { %4873 = vmatmul.mubr.msk.f32.gmra.mrb[14].mxu0 %vm109_vm3, %v1428_v20 }
 0x1a9   :  { %1644 = vmatprep.mubr.f32.mxu0 %v5875_v3 }
 0x1ac   :  { %4874 = vmatmul.mubr.msk.f32.gmra.mrb[16].mxu0 %vm109_vm3, %v1429_v21  ;;  %v5331_v21 = vpack.c.bf16 %v2094_v19, %v2093_v18 }
 0x1ad   :  { %1650 = vmatprep.mubr.f32.mxu0 %v5875_v3 }
 0x1b0   :  { %4875 = vmatmul.mubr.msk.f32.gmra.mrb[18].mxu0 %vm109_vm3, %v1430_v22 }
 0x1b1   :  { %1656 = vmatprep.mubr.f32.mxu0 %v5875_v3 }
 0x1b4   :  { %4876 = vmatmul.mubr.msk.f32.gmra.mrb[20].mxu0 %vm109_vm3, %v1431_v23  ;;  %v2095_v23 = vld [vmem:[%s8705_s3 + $0x90] sm:$0xff] }
 0x1b5   :  { %1662 = vmatprep.mubr.f32.mxu0 %v5875_v3 }
 0x1b8   :  { %4877 = vmatmul.mubr.msk.f32.gmra.mrb[22].mxu0 %vm109_vm3, %v1432_v24  ;;  %v2096_v24 = vld [vmem:[%s8705_s3 + $0x98] sm:$0xff] }
 0x1b9   :  { %1668 = vmatprep.mubr.f32.mxu0 %v5875_v3 }
 0x1bc   :  { %4878 = vmatmul.mubr.msk.f32.gmra.mrb[24].mxu0 %vm109_vm3, %v1433_v25 }
 0x1bd   :  { %1674 = vmatprep.mubr.f32.mxu0 %v5875_v3 }
 0x1c0   :  { %4879 = vmatmul.mubr.msk.f32.gmra.mrb[26].mxu0 %vm109_vm3, %v1434_v27  ;;  %v5334_v27 = vpack.c.bf16 %v2096_v24, %v2095_v23 }
 0x1c1   :  { %1680 = vmatprep.mubr.f32.mxu0 %v5875_v3 }
 0x1c4   :  { %4880 = vmatmul.mubr.msk.f32.gmra.mrb[28].mxu0 %vm109_vm3, %v1435_v28 }
 0x1c5   :  { %1686 = vmatprep.mubr.f32.mxu0 %v5875_v3 }
 0x1c8   :  { %4881 = vmatmul.mubr.msk.f32.gmra.mrb[30].mxu0 %vm109_vm3, %v1436_v29  ;;  %v2097_v29 = vld [vmem:[%s8705_s3 + $0xa0] sm:$0xff] }
 0x1c9   :  { %1692 = vmatprep.mubr.f32.mxu0 %v5875_v3 }
 0x1cc   :  { %4882 = vmatmul.mubr.msk.f32.gmra.mrb[32].mxu0 %vm109_vm3, %v1437_v30  ;;  %v2098_v30 = vld [vmem:[%s8705_s3 + $0xa8] sm:$0xff] }
 0x1cd   :  { %1698 = vmatprep.mubr.f32.mxu0 %v5875_v3 }
 0x1d0   :  { %4883 = vmatmul.mubr.msk.f32.gmra.mrb[34].mxu0 %vm109_vm3, %v1438_v31 }
 0x1d1   :  { %1704 = vmatprep.mubr.f32.mxu0 %v5875_v3 }
 0x1d4   :  { %4884 = vmatmul.mubr.msk.f32.gmra.mrb[36].mxu0 %vm109_vm3, %v1439_v32  ;;  %v5337_v32 = vpack.c.bf16 %v2098_v30, %v2097_v29 }
 0x1d5   :  { %1710 = vmatprep.mubr.f32.mxu0 %v5875_v3 }
 0x1d8   :  { %4885 = vmatmul.mubr.msk.f32.gmra.mrb[38].mxu0 %vm109_vm3, %v1440_v33 }
 0x1d9   :  { %1716 = vmatprep.mubr.f32.mxu0 %v5875_v3 }
 0x1dc   :  { %4886 = vmatmul.mubr.msk.f32.gmra.mrb[40].mxu0 %vm109_vm3, %v1441_v34  ;;  %v2099_v34 = vld [vmem:[%s8705_s3 + $0xb0] sm:$0xff] }
 0x1dd   :  { %1722 = vmatprep.mubr.f32.mxu0 %v5875_v3 }
 0x1e0   :  { %4887 = vmatmul.mubr.msk.f32.gmra.mrb[42].mxu0 %vm109_vm3, %v1442_v37  ;;  %v5340_v37 = vpack.c.bf16 %v2100_v35, %v2099_v34  ;;  %v4956_v34 = vld [vmem:[%s8706_s5 + $0x178] sm:$0xff]  ;;  %v4958_v35 = vld [vmem:[%s8706_s5 + $0x188] sm:$0xff] }
 0x1e1   :  { %1728 = vmatprep.mubr.f32.mxu0 %v5875_v3 }
 0x1e4   :  { %4888 = vmatmul.mubr.msk.f32.gmra.mrb[44].mxu0 %vm109_vm3, %v1443_v39  ;;  %v2101_v39 = vld [vmem:[%s8705_s3 + $0xc0] sm:$0xff] }
 0x1e5   :  { %1734 = vmatprep.mubr.f32.mxu0 %v5875_v3 }
 0x1e8   :  { %4889 = vmatmul.mubr.msk.f32.gmra.mrb[46].mxu0 %vm109_vm3, %v1444_v40  ;;  %v2102_v40 = vld [vmem:[%s8705_s3 + $0xc8] sm:$0xff]  ;;  %vm4355_vm3 = vcmask 916736  }
 0x1e9   :  { %v5343_v42 = vpack.c.bf16 %v2102_v40, %v2101_v39  ;;  %v4960_v40 = vld [vmem:[%s8706_s5 + $0x198] sm:$0xff] }
 0x25f   :  { %v6808_v43 = vpop.f32.mrb[0].mxu0 }
 0x260   :  { %v6810_v45 = vpop.f32.mrb[1].mxu0 }
 0x261   :  { %4890 = vmatprep.mubr.msk.f32.mxu1 %vm1819_vm4, %v6810_v45 }
 0x262   :  { %1957 = vmatmul.mubr.f32.vlgmr.msra.gmra.mrb[0].mxu1 %v6808_v43 }
 0x263   :  { %v6821_v48 = vpop.f32.mrb[2].mxu0  ;;  %5308 = vmatpush1.bf16.msra.mxu1 %v5307_v44 }
 0x264   :  { %v6823_v50 = vpop.f32.mrb[3].mxu0  ;;  %5309 = vmatprep.subr.bf16.mxu1 %v5877_v26 }
 0x265   :  { %4891 = vmatprep.mubr.msk.f32.mxu1 %vm1819_vm4, %v6823_v50 }
 0x266   :  { %1962 = vmatmul.mubr.f32.gmra.mrb[2].mxu1 %v6821_v48 }
 0x267   :  { %v6835_v53 = vpop.f32.mrb[4].mxu0  ;;  %5311 = vmatpush1.bf16.msra.mxu1 %v5310_v49 }
 0x268   :  { %v6837_v55 = vpop.f32.mrb[5].mxu0  ;;  %5312 = vmatprep.subr.bf16.mxu1 %v5877_v26 }
 0x269   :  { %4892 = vmatprep.mubr.msk.f32.mxu1 %vm1819_vm4, %v6837_v55 }
 0x26a   :  { %1967 = vmatmul.mubr.f32.gmra.mrb[4].mxu1 %v6835_v53 }
 0x26b   :  { %v6849_v58 = vpop.f32.mrb[6].mxu0  ;;  %5314 = vmatpush1.bf16.msra.mxu1 %v5313_v54  ;;  %v2105_v54 = vld [vmem:[%s8705_s3 + $0xe0] sm:$0xff] }
 0x26c   :  { %v6851_v60 = vpop.f32.mrb[7].mxu0  ;;  %5315 = vmatprep.subr.bf16.mxu1 %v5877_v26 }
 0x26d   :  { %4893 = vmatprep.mubr.msk.f32.mxu1 %vm1819_vm4, %v6851_v60 }
 0x26e   :  { %1972 = vmatmul.mubr.f32.gmra.mrb[6].mxu1 %v6849_v58 }
 0x26f   :  { %v6863_v63 = vpop.f32.mrb[8].mxu0  ;;  %5317 = vmatpush1.bf16.msra.mxu1 %v5316_v59  ;;  %v5349_v59 = vpack.c.bf16 %v2106_v56, %v2105_v54  ;;  %v4963_v54 = vld [vmem:[%s8706_s5 + $0x1b0] sm:$0xff]  ;;  %v4965_v56 = vld [vmem:[%s8706_s5 + $0x1c0] sm:$0xff] }
 0x270   :  { %v6865_v1 = vpop.f32.mrb[9].mxu0  ;;  %5318 = vmatprep.subr.bf16.mxu1 %v5877_v26 }
 0x271   :  { %4894 = vmatprep.mubr.msk.f32.mxu1 %vm1819_vm4, %v6865_v1 }
 0x272   :  { %1977 = vmatmul.mubr.f32.gmra.mrb[8].mxu1 %v6863_v63 }
 0x273   :  { %v6877_v5 = vpop.f32.mrb[10].mxu0  ;;  %5320 = vmatpush1.bf16.msra.mxu1 %v5319_v0 }
 0x274   :  { %v6879_v7 = vpop.f32.mrb[11].mxu0  ;;  %5321 = vmatprep.subr.bf16.mxu1 %v5877_v26 }
 0x275   :  { %4895 = vmatprep.mubr.msk.f32.mxu1 %vm1819_vm4, %v6879_v7 }
 0x276   :  { %1982 = vmatmul.mubr.f32.gmra.mrb[10].mxu1 %v6877_v5 }
 0x277   :  { %v6891_v11 = vpop.f32.mrb[12].mxu0  ;;  %5323 = vmatpush1.bf16.msra.mxu1 %v5322_v6 }
 0x278   :  { %v6893_v13 = vpop.f32.mrb[13].mxu0  ;;  %5324 = vmatprep.subr.bf16.mxu1 %v5877_v26 }
 0x279   :  { %4896 = vmatprep.mubr.msk.f32.mxu1 %vm1819_vm4, %v6893_v13 }
 0x27a   :  { %1987 = vmatmul.mubr.f32.gmra.mrb[12].mxu1 %v6891_v11 }
 0x27b   :  { %v6905_v15 = vpop.f32.mrb[14].mxu0  ;;  %5326 = vmatpush1.bf16.msra.mxu1 %v5325_v12 }
 0x27c   :  { %v6907_v17 = vpop.f32.mrb[15].mxu0  ;;  %5327 = vmatprep.subr.bf16.mxu1 %v5877_v26 }
 0x27d   :  { %4897 = vmatprep.mubr.msk.f32.mxu1 %vm1819_vm4, %v6907_v17 }
 0x27e   :  { %1992 = vmatmul.mubr.f32.gmra.mrb[14].mxu1 %v6905_v15 }
 0x27f   :  { %v6919_v20 = vpop.f32.mrb[16].mxu0  ;;  %5329 = vmatpush1.bf16.msra.mxu1 %v5328_v16 }
 0x280   :  { %v6921_v22 = vpop.f32.mrb[17].mxu0  ;;  %5330 = vmatprep.subr.bf16.mxu1 %v5877_v26 }
 0x281   :  { %4898 = vmatprep.mubr.msk.f32.mxu1 %vm1819_vm4, %v6921_v22 }
 0x282   :  { %1997 = vmatmul.mubr.f32.gmra.mrb[16].mxu1 %v6919_v20 }
 0x283   :  { %v6933_v25 = vpop.f32.mrb[18].mxu0  ;;  %5332 = vmatpush1.bf16.msra.mxu1 %v5331_v21 }
 0x284   :  { %v6935_v28 = vpop.f32.mrb[19].mxu0  ;;  %5333 = vmatprep.subr.bf16.mxu1 %v5877_v26 }
 0x285   :  { %4899 = vmatprep.mubr.msk.f32.mxu1 %vm1819_vm4, %v6935_v28 }
 0x286   :  { %2002 = vmatmul.mubr.f32.gmra.mrb[18].mxu1 %v6933_v25 }
 0x287   :  { %v6947_v31 = vpop.f32.mrb[20].mxu0  ;;  %5335 = vmatpush1.bf16.msra.mxu1 %v5334_v27 }
 0x288   :  { %v6949_v33 = vpop.f32.mrb[21].mxu0  ;;  %5336 = vmatprep.subr.bf16.mxu1 %v5877_v26 }
 0x289   :  { %4900 = vmatprep.mubr.msk.f32.mxu1 %vm1819_vm4, %v6949_v33 }
 0x28a   :  { %2007 = vmatmul.mubr.f32.gmra.mrb[20].mxu1 %v6947_v31 }
 0x28b   :  { %v6961_v36 = vpop.f32.mrb[22].mxu0  ;;  %5338 = vmatpush1.bf16.msra.mxu1 %v5337_v32  ;;  %v4953_v32 = vld [vmem:[%s8706_s5 + $0x160] sm:$0xff] }
 0x28c   :  { %v6963_v38 = vpop.f32.mrb[23].mxu0  ;;  %5339 = vmatprep.subr.bf16.mxu1 %v5877_v26 }
 0x28d   :  { %4901 = vmatprep.mubr.msk.f32.mxu1 %vm1819_vm4, %v6963_v38 }
 0x28e   :  { %2012 = vmatmul.mubr.f32.gmra.mrb[22].mxu1 %v6961_v36 }
 0x28f   :  { %v6975_v41 = vpop.f32.mrb[24].mxu0  ;;  %5341 = vmatpush1.bf16.msra.mxu1 %v5340_v37  ;;  %v4955_v37 = vld [vmem:[%s8706_s5 + $0x170] sm:$0xff] }
 0x290   :  { %v6977_v44 = vpop.f32.mrb[25].mxu0  ;;  %5342 = vmatprep.subr.bf16.mxu1 %v5877_v26 }
 0x291   :  { %4902 = vmatprep.mubr.msk.f32.mxu1 %vm1819_vm4, %v6977_v44 }
 0x292   :  { %2017 = vmatmul.mubr.f32.gmra.mrb[24].mxu1 %v6975_v41 }
 0x293   :  { %v6989_v49 = vpop.f32.mrb[26].mxu0  ;;  %5344 = vmatpush1.bf16.msra.mxu1 %v5343_v42 }
 0x294   :  { %v6991_v52 = vpop.f32.mrb[27].mxu0  ;;  %5345 = vmatprep.subr.bf16.mxu1 %v5877_v26 }
 0x295   :  { %4903 = vmatprep.mubr.msk.f32.mxu1 %vm1819_vm4, %v6991_v52 }
 0x296   :  { %2022 = vmatmul.mubr.f32.gmra.mrb[26].mxu1 %v6989_v49 }
 0x297   :  { %v7003_v57 = vpop.f32.mrb[28].mxu0  ;;  %5347 = vmatpush1.bf16.msra.mxu1 %v5346_v51  ;;  %v4966_v51 = vld [vmem:[%s8706_s5 + $0x1c8] sm:$0xff] }
 0x298   :  { %v7005_v61 = vpop.f32.mrb[29].mxu0  ;;  %5348 = vmatprep.subr.bf16.mxu1 %v5877_v26 }
 0x299   :  { %4904 = vmatprep.mubr.msk.f32.mxu1 %vm1819_vm4, %v7005_v61 }
 0x29a   :  { %2027 = vmatmul.mubr.f32.gmra.mrb[28].mxu1 %v7003_v57 }
 0x29b   :  { %v7011_v62 = vpop.f32.mrb[30].mxu0  ;;  %5350 = vmatpush1.bf16.msra.mxu1 %v5349_v59 }
 0x29c   :  { %v7013_v0 = vpop.f32.mrb[31].mxu0 }
 0x29d   :  { %4905 = vmatprep.mubr.msk.f32.mxu1 %vm1819_vm4, %v7013_v0 }
 0x29e   :  { %2032 = vmatmul.mubr.f32.gmra.mrb[30].mxu1 %v7011_v62 }
 0x29f   :  { %v7018_v2 = vpop.f32.mrb[32].mxu0 }
 0x2a0   :  { %v7020_v4 = vpop.f32.mrb[33].mxu0 }
 0x2a1   :  { %4906 = vmatprep.mubr.msk.f32.mxu1 %vm1819_vm4, %v7020_v4 }
 0x2a2   :  { %2037 = vmatmul.mubr.f32.gmra.mrb[32].mxu1 %v7018_v2 }
 0x2a3   :  { %v7025_v6 = vpop.f32.mrb[34].mxu0 }
 0x2a4   :  { %v1702_v8 = vpop.f32.mrb[35].mxu0 }
 0x2a5   :  { %4907 = vmatprep.mubr.msk.f32.mxu1 %vm1819_vm4, %v1702_v8 }
 0x2a6   :  { %2042 = vmatmul.mubr.f32.gmra.mrb[34].mxu1 %v7025_v6 }
 0x2a7   :  { %v1706_v9 = vpop.f32.mrb[36].mxu0 }
 0x2a8   :  { %v1708_v12 = vpop.f32.mrb[37].mxu0 }
 0x2a9   :  { %4908 = vmatprep.mubr.msk.f32.mxu1 %vm1819_vm4, %v1708_v12 }
 0x2aa   :  { %2047 = vmatmul.mubr.f32.gmra.mrb[36].mxu1 %v1706_v9 }
 0x2ab   :  { %v1712_v14 = vpop.f32.mrb[38].mxu0 }
 0x2ac   :  { %v1714_v10 = vpop.f32.mrb[39].mxu0 }
 0x2ad   :  { %4909 = vmatprep.mubr.msk.f32.mxu1 %vm1819_vm4, %v1714_v10 }
 0x2ae   :  { %2052 = vmatmul.mubr.f32.gmra.mrb[38].mxu1 %v1712_v14 }
 0x2af   :  { %v7031_v16 = vpop.f32.mrb[40].mxu0 }
 0x2b0   :  { %v1720_v18 = vpop.f32.mrb[41].mxu0 }
 0x2b1   :  { %4910 = vmatprep.mubr.msk.f32.mxu1 %vm1819_vm4, %v1720_v18 }
 0x2b2   :  { %2057 = vmatmul.mubr.f32.gmra.mrb[40].mxu1 %v7031_v16 }
 0x2b3   :  { %v7035_v19 = vpop.f32.mrb[42].mxu0 }
 0x2b4   :  { %v1726_v21 = vpop.f32.mrb[43].mxu0 }
 0x2b5   :  { %4911 = vmatprep.mubr.msk.f32.mxu1 %vm1819_vm4, %v1726_v21 }
 0x2b6   :  { %2062 = vmatmul.mubr.f32.gmra.mrb[42].mxu1 %v7035_v19 }
 0x2b7   :  { %v1730_v23 = vpop.f32.mrb[44].mxu0 }
 0x2b8   :  { %v1732_v24 = vpop.f32.mrb[45].mxu0 }
 0x2b9   :  { %4912 = vmatprep.mubr.msk.f32.mxu1 %vm1819_vm4, %v1732_v24 }
 0x2ba   :  { %2067 = vmatmul.mubr.f32.gmra.mrb[44].mxu1 %v1730_v23 }
 0x2bb   :  { %v7040_v27 = vpop.f32.mrb[46].mxu0 }
 0x2bc   :  { %v1738_v29 = vpop.f32.mrb[47].mxu0 }
 0x2bd   :  { %4913 = vmatprep.mubr.msk.f32.mxu1 %vm1819_vm4, %v1738_v29 }
 0x2be   :  { %2072 = vmatmul.mubr.f32.gmra.mrb[46].mxu1 %v7040_v27 }
 0x2bf   :  { %4914 = vmatprep.mubr.msk.f32.mxu1 %vm1819_vm4, %v6810_v45  ;;  %v4942_v45 = vld [vmem:[%s8706_s5 + $0x108] sm:$0xff] }
 0x2c2   :  { %2172 = vmatmul.mubr.f32.vlgmr.msra.gmra.mrb[48].mxu1 %v6808_v43  ;;  %v4940_v43 = vld [vmem:[%s8706_s5 + $0xf8] sm:$0xff] }
 0x2c3   :  { %4915 = vmatprep.mubr.msk.f32.mxu1 %vm1819_vm4, %v6823_v50  ;;  %v5351_v50 = vpack.c.bf16 %v4942_v45, %v4940_v43 }
 0x2c5   :  { %5352 = vmatprep.subr.bf16.mxu1 %v5351_v50 }
 0x2c6   :  { %2177 = vmatmul.mubr.f32.gmra.mrb[50].mxu1 %v6821_v48  ;;  %v4939_v48 = vld [vmem:[%s8706_s5 + $0xf0] sm:$0xff] }
 0x2c7   :  { %4916 = vmatprep.mubr.msk.f32.mxu1 %vm1819_vm4, %v6837_v55 }
 0x2ca   :  { %2182 = vmatmul.mubr.f32.gmra.mrb[52].mxu1 %v6835_v53  ;;  %v4941_v53 = vld [vmem:[%s8706_s5 + $0x100] sm:$0xff] }
 0x2cb   :  { %4917 = vmatprep.mubr.msk.f32.mxu1 %vm1819_vm4, %v6851_v60  ;;  %v5353_v55 = vpack.c.bf16 %v4941_v53, %v4939_v48  ;;  %v4946_v60 = vld [vmem:[%s8706_s5 + $0x128] sm:$0xff] }
 0x2cd   :  { %5354 = vmatpush1.bf16.msra.mxu1 %v5353_v55 }
 0x2ce   :  { %2187 = vmatmul.mubr.f32.gmra.mrb[54].mxu1 %v6849_v58  ;;  %v4944_v58 = vld [vmem:[%s8706_s5 + $0x118] sm:$0xff] }
 0x2cf   :  { %4918 = vmatprep.mubr.msk.f32.mxu1 %vm1819_vm4, %v6865_v1  ;;  %v4943_v1 = vld [vmem:[%s8706_s5 + $0x110] sm:$0xff] }
 0x2d2   :  { %2192 = vmatmul.mubr.f32.gmra.mrb[56].mxu1 %v6863_v63  ;;  %v5355_v63 = vpack.c.bf16 %v4946_v60, %v4944_v58 }
 0x2d3   :  { %4919 = vmatprep.mubr.msk.f32.mxu1 %vm1819_vm4, %v6879_v7 }
 0x2d4   :  { %5356 = vmatprep.subr.bf16.mxu1 %v5355_v63 }
 0x2d6   :  { %2197 = vmatmul.mubr.f32.gmra.mrb[58].mxu1 %v6877_v5  ;;  %v4945_v5 = vld [vmem:[%s8706_s5 + $0x120] sm:$0xff] }
 0x2d7   :  { %4920 = vmatprep.mubr.msk.f32.mxu1 %vm1819_vm4, %v6893_v13  ;;  %v5357_v7 = vpack.c.bf16 %v4945_v5, %v4943_v1  ;;  %v4950_v13 = vld [vmem:[%s8706_s5 + $0x148] sm:$0xff] }
 0x2d9   :  { %5358 = vmatpush1.bf16.msra.mxu1 %v5357_v7 }
 0x2da   :  { %2202 = vmatmul.mubr.f32.gmra.mrb[60].mxu1 %v6891_v11  ;;  %v4948_v11 = vld [vmem:[%s8706_s5 + $0x138] sm:$0xff] }
 0x2db   :  { %4921 = vmatprep.mubr.msk.f32.mxu1 %vm1819_vm4, %v6907_v17  ;;  %v4947_v17 = vld [vmem:[%s8706_s5 + $0x130] sm:$0xff] }
 0x2de   :  { %2207 = vmatmul.mubr.f32.gmra.mrb[62].mxu1 %v6905_v15  ;;  %v5359_v15 = vpack.c.bf16 %v4950_v13, %v4948_v11 }
 0x2df   :  { %4922 = vmatprep.mubr.msk.f32.mxu1 %vm1819_vm4, %v6921_v22 }
 0x2e0   :  { %5360 = vmatprep.subr.bf16.mxu1 %v5359_v15 }
 0x2e2   :  { %2212 = vmatmul.mubr.f32.gmra.mrb[64].mxu1 %v6919_v20  ;;  %v4949_v20 = vld [vmem:[%s8706_s5 + $0x140] sm:$0xff] }
 0x2e3   :  { %4923 = vmatprep.mubr.msk.f32.mxu1 %vm1819_vm4, %v6935_v28  ;;  %v5361_v22 = vpack.c.bf16 %v4949_v20, %v4947_v17  ;;  %v4954_v28 = vld [vmem:[%s8706_s5 + $0x168] sm:$0xff] }
 0x2e5   :  { %5362 = vmatpush1.bf16.msra.mxu1 %v5361_v22 }
 0x2e6   :  { %2217 = vmatmul.mubr.f32.gmra.mrb[66].mxu1 %v6933_v25  ;;  %v4952_v25 = vld [vmem:[%s8706_s5 + $0x158] sm:$0xff] }
 0x2e7   :  { %4924 = vmatprep.mubr.msk.f32.mxu1 %vm1819_vm4, %v6949_v33  ;;  %v5363_v30 = vpack.c.bf16 %v4954_v28, %v4952_v25 }
 0x2e9   :  { %5364 = vmatprep.subr.bf16.mxu1 %v5363_v30  ;;  %v2934_v30 = vld [vmem:[%s8706_s5 + $0x8] sm:$0xff] }
 0x2ea   :  { %2222 = vmatmul.mubr.f32.gmra.mrb[68].mxu1 %v6947_v31  ;;  %v4951_v31 = vld [vmem:[%s8706_s5 + $0x150] sm:$0xff] }
 0x2eb   :  { %4925 = vmatprep.mubr.msk.f32.mxu1 %vm1819_vm4, %v6963_v38  ;;  %v5365_v33 = vpack.c.bf16 %v4953_v32, %v4951_v31  ;;  %v4957_v38 = vld [vmem:[%s8706_s5 + $0x180] sm:$0xff]  ;;  %v2936_v31 = vld [vmem:[%s8706_s5 + $0x18] sm:$0xff] }
 0x2ec   :  { %v5369_v39 = vpack.c.bf16 %v4957_v38, %v4955_v37  ;;  %v5379_v32 = vpack.c.bf16 %v2936_v31, %v2934_v30 }
 0x2ed   :  { %5366 = vmatpush1.bf16.msra.mxu1 %v5365_v33 }
 0x2ee   :  { %2227 = vmatmul.mubr.f32.gmra.mrb[70].mxu1 %v6961_v36  ;;  %v5367_v36 = vpack.c.bf16 %v4958_v35, %v4956_v34 }
 0x2ef   :  { %4926 = vmatprep.mubr.msk.f32.mxu1 %vm1819_vm4, %v6977_v44  ;;  %v4959_v44 = vld [vmem:[%s8706_s5 + $0x190] sm:$0xff] }
 0x2f0   :  { %5368 = vmatprep.subr.bf16.mxu1 %v5367_v36  ;;  %v5373_v47 = vpack.c.bf16 %v4961_v46, %v4959_v44 }
 0x2f1   :  { %5370 = vmatpush1.bf16.msra.mxu1 %v5369_v39 }
 0x2f2   :  { %2232 = vmatmul.mubr.f32.gmra.mrb[72].mxu1 %v6975_v41  ;;  %v4962_v41 = vld [vmem:[%s8706_s5 + $0x1a8] sm:$0xff] }
 0x2f3   :  { %4927 = vmatprep.mubr.msk.f32.mxu1 %vm1819_vm4, %v6991_v52  ;;  %v5371_v42 = vpack.c.bf16 %v4962_v41, %v4960_v40 }
 0x2f5   :  { %5372 = vmatprep.subr.bf16.mxu1 %v5371_v42 }
 0x2f6   :  { %2237 = vmatmul.mubr.f32.gmra.mrb[74].mxu1 %v6989_v49  ;;  %v4964_v49 = vld [vmem:[%s8706_s5 + $0x1b8] sm:$0xff] }
 0x2f7   :  { %4928 = vmatprep.mubr.msk.f32.mxu1 %vm1819_vm4, %v7005_v61  ;;  %5374 = vmatpush1.bf16.msra.mxu1 %v5373_v47  ;;  %v5375_v52 = vpack.c.bf16 %v4966_v51, %v4964_v49 }
 0x2f9   :  { %5376 = vmatprep.subr.bf16.mxu1 %v5375_v52 }
 0x2fa   :  { %2242 = vmatmul.mubr.f32.gmra.mrb[76].mxu1 %v7003_v57  ;;  %v5377_v57 = vpack.c.bf16 %v4965_v56, %v4963_v54  ;;  %v7252_v56 = vld [vmem:[%s8707_s4] ss:$0 sm:$0xff] }
 0x2fb   :  { %4929 = vmatprep.mubr.msk.f32.mxu1 %vm1819_vm4, %v7013_v0  ;;  %v4967_v0 = vld [vmem:[%s8706_s5 + $0x1d0] sm:$0xff] }
 0x2fc   :  { %5378 = vmatpush1.bf16.msra.mxu1 %v5377_v57 }
 0x2fe   :  { %2247 = vmatmul.mubr.f32.gmra.mrb[78].mxu1 %v7011_v62  ;;  %v4968_v62 = vld [vmem:[%s8706_s5 + $0x1d8] sm:$0xff] }
 0x2ff   :  { %4930 = vmatprep.mubr.msk.f32.mxu1 %vm1819_vm4, %v7020_v4  ;;  %3054 = vmatprep.subr.mxu1 %v4968_v62 }
 0x300   :  { %3055 = vmatpush1.msra.mxu1 %v4967_v0 }
 0x301   :  { %5380 = vmatprep.subr.bf16.mxu1 %v5379_v32 }
 0x302   :  { %2252 = vmatmul.mubr.f32.gmra.mrb[80].mxu1 %v7018_v2 }
 0x303   :  { %4931 = vmatprep.mubr.msk.f32.mxu1 %vm1819_vm4, %v1702_v8 }
 0x306   :  { %2257 = vmatmul.mubr.f32.gmra.mrb[82].mxu1 %v7025_v6 }
 0x307   :  { %4932 = vmatprep.mubr.msk.f32.mxu1 %vm1819_vm4, %v1708_v12 }
 0x30a   :  { %2262 = vmatmul.mubr.f32.gmra.mrb[84].mxu1 %v1706_v9 }
 0x30b   :  { %4933 = vmatprep.mubr.msk.f32.mxu1 %vm1819_vm4, %v1714_v10 }
 0x30e   :  { %2267 = vmatmul.mubr.f32.gmra.mrb[86].mxu1 %v1712_v14 }
 0x30f   :  { %4934 = vmatprep.mubr.msk.f32.mxu1 %vm1819_vm4, %v1720_v18 }
 0x312   :  { %2272 = vmatmul.mubr.f32.gmra.mrb[88].mxu1 %v7031_v16 }
 0x313   :  { %4935 = vmatprep.mubr.msk.f32.mxu1 %vm1819_vm4, %v1726_v21 }
 0x316   :  { %2277 = vmatmul.mubr.f32.gmra.mrb[90].mxu1 %v7035_v19 }
 0x317   :  { %4936 = vmatprep.mubr.msk.f32.mxu1 %vm1819_vm4, %v1732_v24 }
 0x31a   :  { %2282 = vmatmul.mubr.f32.gmra.mrb[92].mxu1 %v1730_v23 }
 0x31b   :  { %4937 = vmatprep.mubr.msk.f32.mxu1 %vm1819_vm4, %v1738_v29  ;;  %vm4422_vm4 = vcmask 1048448  }
 0x31e   :  { %2287 = vmatmul.mubr.f32.gmra.mrb[94].mxu1 %v7040_v27 }
 0x31f   :  { %3090 = vmatprep.mubr.f32.mxu1 %v5875_v3 }
 0x335   :  { %v1958_v59 = vpop.f32.mrb[0].mxu1 }
 0x336   :  { %v1960_v61 = vpop.f32.mrb[1].mxu1 }
 0x339   :  { %v1963_v2 = vpop.f32.mrb[2].mxu1 }
 0x33a   :  { %v1965_v4 = vpop.f32.mrb[3].mxu1 }
 0x33d   :  { %v7197_v6 = vpop.f32.mrb[4].mxu1 }
 0x33e   :  { %v1970_v8 = vpop.f32.mrb[5].mxu1 }
 0x341   :  { %v7199_v9 = vpop.f32.mrb[6].mxu1 }
 0x342   :  { %v1975_v12 = vpop.f32.mrb[7].mxu1 }
 0x345   :  { %v7201_v14 = vpop.f32.mrb[8].mxu1 }
 0x346   :  { %v1980_v10 = vpop.f32.mrb[9].mxu1 }
 0x349   :  { %v7203_v16 = vpop.f32.mrb[10].mxu1 }
 0x34a   :  { %v1985_v18 = vpop.f32.mrb[11].mxu1 }
 0x34d   :  { %v7205_v19 = vpop.f32.mrb[12].mxu1 }
 0x34e   :  { %v1990_v21 = vpop.f32.mrb[13].mxu1 }
 0x351   :  { %v7207_v23 = vpop.f32.mrb[14].mxu1 }
 0x352   :  { %v1995_v24 = vpop.f32.mrb[15].mxu1 }
 0x355   :  { %v7209_v27 = vpop.f32.mrb[16].mxu1 }
 0x356   :  { %v2000_v29 = vpop.f32.mrb[17].mxu1 }
 0x359   :  { %v7211_v43 = vpop.f32.mrb[18].mxu1 }
 0x35a   :  { %v2005_v45 = vpop.f32.mrb[19].mxu1 }
 0x35d   :  { %v7213_v48 = vpop.f32.mrb[20].mxu1 }
 0x35e   :  { %v2010_v50 = vpop.f32.mrb[21].mxu1 }
 0x361   :  { %v7215_v53 = vpop.f32.mrb[22].mxu1 }
 0x362   :  { %v2015_v55 = vpop.f32.mrb[23].mxu1 }
 0x365   :  { %v7217_v58 = vpop.f32.mrb[24].mxu1 }
 0x366   :  { %v2020_v60 = vpop.f32.mrb[25].mxu1 }
 0x369   :  { %v7219_v63 = vpop.f32.mrb[26].mxu1 }
 0x36a   :  { %v2025_v1 = vpop.f32.mrb[27].mxu1 }
 0x36d   :  { %v7221_v5 = vpop.f32.mrb[28].mxu1 }
 0x36e   :  { %v2030_v7 = vpop.f32.mrb[29].mxu1 }
 0x371   :  { %v7223_v11 = vpop.f32.mrb[30].mxu1 }
 0x372   :  { %v2035_v13 = vpop.f32.mrb[31].mxu1 }
 0x375   :  { %v7225_v15 = vpop.f32.mrb[32].mxu1 }
 0x376   :  { %v2040_v17 = vpop.f32.mrb[33].mxu1 }
 0x379   :  { %v7227_v20 = vpop.f32.mrb[34].mxu1 }
 0x37a   :  { %v2045_v22 = vpop.f32.mrb[35].mxu1 }
 0x37d   :  { %v7229_v25 = vpop.f32.mrb[36].mxu1 }
 0x37e   :  { %v2050_v28 = vpop.f32.mrb[37].mxu1 }
 0x381   :  { %v7237_v33 = vpop.f32.mrb[38].mxu1 }
 0x382   :  { %v2055_v34 = vpop.f32.mrb[39].mxu1 }
 0x385   :  { %v7239_v35 = vpop.f32.mrb[40].mxu1 }
 0x386   :  { %v2060_v36 = vpop.f32.mrb[41].mxu1 }
 0x389   :  { %v7241_v37 = vpop.f32.mrb[42].mxu1 }
 0x38a   :  { %v2065_v38 = vpop.f32.mrb[43].mxu1 }
 0x38d   :  { %v7243_v39 = vpop.f32.mrb[44].mxu1 }
 0x38e   :  { %v2070_v40 = vpop.f32.mrb[45].mxu1 }
 0x391   :  { %v7245_v41 = vpop.f32.mrb[46].mxu1 }
 0x392   :  { %v2075_v42 = vpop.f32.mrb[47].mxu1 }
 0x395   :  { %v2173_v44 = vpop.f32.mrb[48].mxu1 }
 0x396   :  { %v2292_v46 = vmax.f32 %v1958_v59, %v2173_v44  ;;  %v2175_v47 = vpop.f32.mrb[49].mxu1 }
 0x398   :  { %2317 = vst.msk [vmem:[#allocation2] sm:$0xff] %vm2316_vm5, %v2292_v46 }
 0x399   :  { %v2178_v49 = vpop.f32.mrb[50].mxu1 }
 0x39a   :  { %v2293_v51 = vmax.f32 %v1963_v2, %v2178_v49  ;;  %v2180_v52 = vpop.f32.mrb[51].mxu1 }
 0x39c   :  { %2318 = vst.msk [vmem:[#allocation2 + $0x8] sm:$0xff] %vm2316_vm5, %v2293_v51 }
 0x39d   :  { %v2183_v54 = vpop.f32.mrb[52].mxu1 }
 0x39e   :  { %v2294_v57 = vmax.f32 %v7197_v6, %v2183_v54  ;;  %v2185_v61 = vpop.f32.mrb[53].mxu1 }
 0x39f   :  { %v2342_v62 = vld [vmem:[#allocation2] sm:$0x1]  ;;  %v2350_v0 = vld [vmem:[#allocation2 + $0x1] sm:$0x1]  ;;  %v2397_v59 = vld [vmem:[#allocation2 + $0x2] sm:$0x1] }
 0x3a0   :  { %v2358_v4 = vmax.f32 %v2342_v62, %v2350_v0  ;;  %v2405_v8 = vld [vmem:[#allocation2 + $0x3] sm:$0x1]  ;;  %v2445_v12 = vld [vmem:[#allocation2 + $0x4] sm:$0x1]  ;;  %v2453_v10 = vld [vmem:[#allocation2 + $0x5] sm:$0x1] }
 0x3a1   :  { %2319 = vst.msk [vmem:[#allocation2 + $0x10] sm:$0xff] %vm2316_vm5, %v2294_v57  ;;  %v2413_v2 = vmax.f32 %v2397_v59, %v2405_v8  ;;  %v2461_v18 = vmax.f32 %v2445_v12, %v2453_v10  ;;  %v2493_v21 = vld [vmem:[#allocation2 + $0x6] sm:$0x1]  ;;  %v2501_v24 = vld [vmem:[#allocation2 + $0x7] sm:$0x1]  ;;  %v2188_v29 = vpop.f32.mrb[54].mxu1 }
 0x3a2   :  { %v2372_v45 = vadd.f32 %v7252_v56, %v2358_v4  ;;  %v2509_v50 = vmax.f32 %v2493_v21, %v2501_v24  ;;  %v2295_v6 = vmax.f32 %v7199_v9, %v2188_v29  ;;  %v2190_v55 = vpop.f32.mrb[55].mxu1 }
 0x3a3   :  { %v2421_v60 = vadd.f32 %v7252_v56, %v2413_v2  ;;  %v2469_v1 = vadd.f32 %v7252_v56, %v2461_v18  ;;  %v2541_v7 = vld [vmem:[#allocation2 + $0x8] sm:$0x1]  ;;  %v2549_v13 = vld [vmem:[#allocation2 + $0x9] sm:$0x1]  ;;  %v2589_v17 = vld [vmem:[#allocation2 + $0xa] sm:$0x1] }
 0x3a4   :  { %v2380_v22 = vmax.f32 %v2372_v45, 0.0  ;;  %v2517_v28 = vadd.f32 %v7252_v56, %v2509_v50  ;;  %v2557_v30 = vmax.f32 %v2541_v7, %v2549_v13  ;;  %v2597_v31 = vld [vmem:[#allocation2 + $0xb] sm:$0x1]  ;;  %v2637_v32 = vld [vmem:[#allocation2 + $0xc] sm:$0x1]  ;;  %2320 = vst.msk [vmem:[#allocation2 + $0x18] sm:$0xff] %vm2316_vm5, %v2295_v6 }
 0x3a5   :  { %v2429_v34 = vmax.f32 %v2421_v60, 0.0  ;;  %v2477_v36 = vmax.f32 %v2469_v1, 0.0  ;;  %v2605_v38 = vmax.f32 %v2589_v17, %v2597_v31  ;;  %v2645_v9 = vld [vmem:[#allocation2 + $0xd] sm:$0x1]  ;;  %v2685_v40 = vld [vmem:[#allocation2 + $0xe] sm:$0x1] }
 0x3a6   :  { %2389 = vst.msk [vmem:[#allocation3] sm:$0x1] %vm2388_vm6, %v2380_v22  ;;  %v2525_v42 = vmax.f32 %v2517_v28, 0.0  ;;  %v2565_v44 = vadd.f32 %v7252_v56, %v2557_v30  ;;  %v2653_v46 = vmax.f32 %v2637_v32, %v2645_v9  ;;  %v2693_v47 = vld [vmem:[#allocation2 + $0xf] sm:$0x1]  ;;  %v2193_v49 = vpop.f32.mrb[56].mxu1 }
 0x3a7   :  { %2437 = vst.msk [vmem:[#allocation3 + $0x1] sm:$0x1] %vm2388_vm6, %v2429_v34  ;;  %2485 = vst.msk [vmem:[#allocation3 + $0x2] sm:$0x1] %vm2388_vm6, %v2477_v36  ;;  %v2613_v51 = vadd.f32 %v7252_v56, %v2605_v38  ;;  %v2701_v52 = vmax.f32 %v2685_v40, %v2693_v47  ;;  %v2296_v62 = vmax.f32 %v7201_v14, %v2193_v49  ;;  %v2195_v10 = vpop.f32.mrb[57].mxu1 }
 0x3a8   :  { %v2733_v54 = vld [vmem:[#allocation2 + $0x10] sm:$0x1]  ;;  %v2741_v57 = vld [vmem:[#allocation2 + $0x11] sm:$0x1]  ;;  %v2781_v61 = vld [vmem:[#allocation2 + $0x12] sm:$0x1]  ;;  %v2661_v59 = vadd.f32 %v7252_v56, %v2653_v46 }
 0x3a9   :  { %2533 = vst.msk [vmem:[#allocation3 + $0x3] sm:$0x1] %vm2388_vm6, %v2525_v42  ;;  %v2573_v0 = vmax.f32 %v2565_v44, 0.0  ;;  %v2749_v4 = vmax.f32 %v2733_v54, %v2741_v57  ;;  %v2789_v8 = vld [vmem:[#allocation2 + $0x13] sm:$0x1]  ;;  %v2621_v2 = vmax.f32 %v2613_v51, 0.0  ;;  %v2709_v18 = vadd.f32 %v7252_v56, %v2701_v52 }
 0x3aa   :  { %v2829_v12 = vld [vmem:[#allocation2 + $0x14] sm:$0x1]  ;;  %v2797_v21 = vmax.f32 %v2781_v61, %v2789_v8  ;;  %v2837_v24 = vld [vmem:[#allocation2 + $0x15] sm:$0x1]  ;;  %v2877_v29 = vld [vmem:[#allocation2 + $0x16] sm:$0x1] }
 0x3ab   :  { %2321 = vst.msk [vmem:[#allocation2 + $0x20] sm:$0xff] %vm2316_vm5, %v2296_v62  ;;  %v2198_v45 = vpop.f32.mrb[58].mxu1  ;;  %v2669_v14 = vmax.f32 %v2661_v59, 0.0  ;;  %v2757_v50 = vadd.f32 %v7252_v56, %v2749_v4  ;;  %v2845_v6 = vmax.f32 %v2829_v12, %v2837_v24  ;;  %v2885_v55 = vld [vmem:[#allocation2 + $0x17] sm:$0x1]  ;;  %v2717_v7 = vmax.f32 %v2709_v18, 0.0 }
 0x3ac   :  { %2581 = vst.msk [vmem:[#allocation3 + $0x4] sm:$0x1] %vm2388_vm6, %v2573_v0  ;;  %v2297_v60 = vmax.f32 %v7203_v16, %v2198_v45  ;;  %v2200_v1 = vpop.f32.mrb[59].mxu1  ;;  %2629 = vst.msk [vmem:[#allocation3 + $0x5] sm:$0x1] %vm2388_vm6, %v2621_v2  ;;  %v2805_v13 = vadd.f32 %v7252_v56, %v2797_v21  ;;  %v2893_v17 = vmax.f32 %v2877_v29, %v2885_v55  ;;  %v2933_v51 = vld [vmem:[%s8706_s5] sm:$0xff] }
 0x3ad   :  { %2677 = vst.msk [vmem:[#allocation3 + $0x6] sm:$0x1] %vm2388_vm6, %v2669_v14  ;;  %v2765_v22 = vmax.f32 %v2757_v50, 0.0  ;;  %v2853_v28 = vadd.f32 %v7252_v56, %v2845_v6  ;;  %v2398_v30 = vld [vmem:[#allocation2 + $0x1a] sm:$0x1]  ;;  %v2203_v9 = vpop.f32.mrb[60].mxu1 }
 0x3ae   :  { %v2406_v31 = vld [vmem:[#allocation2 + $0x1b] sm:$0x1]  ;;  %2322 = vst.msk [vmem:[#allocation2 + $0x28] sm:$0xff] %vm2316_vm5, %v2297_v60  ;;  %v2813_v32 = vmax.f32 %v2805_v13, 0.0  ;;  %v2901_v16 = vadd.f32 %v7252_v56, %v2893_v17  ;;  %v2446_v36 = vld [vmem:[#allocation2 + $0x1c] sm:$0x1]  ;;  %v2298_v47 = vmax.f32 %v7205_v19, %v2203_v9 }
 0x3af   :  { %2725 = vst.msk [vmem:[#allocation3 + $0x7] sm:$0x1] %vm2388_vm6, %v2717_v7  ;;  %v2414_v34 = vmax.f32 %v2398_v30, %v2406_v31  ;;  %v2454_v38 = vld [vmem:[#allocation2 + $0x1d] sm:$0x1]  ;;  %2773 = vst.msk [vmem:[#allocation3 + $0x8] sm:$0x1] %vm2388_vm6, %v2765_v22 }
 0x3b0   :  { %v2861_v40 = vmax.f32 %v2853_v28, 0.0  ;;  %v2462_v42 = vmax.f32 %v2446_v36, %v2454_v38  ;;  %v2494_v44 = vld [vmem:[#allocation2 + $0x1e] sm:$0x1]  ;;  %v2502_v46 = vld [vmem:[#allocation2 + $0x1f] sm:$0x1]  ;;  %v2205_v49 = vpop.f32.mrb[61].mxu1 }
 0x3b1   :  { %2821 = vst.msk [vmem:[#allocation3 + $0x9] sm:$0x1] %vm2388_vm6, %v2813_v32  ;;  %v2909_v52 = vmax.f32 %v2901_v16, 0.0  ;;  %v2422_v54 = vadd.f32 %v7252_v56, %v2414_v34  ;;  %v2510_v57 = vmax.f32 %v2494_v44, %v2502_v46  ;;  %v2935_v61 = vld [vmem:[%s8706_s5 + $0x10] sm:$0xff]  ;;  %v2938_v62 = vld [vmem:[%s8706_s5 + $0x28] sm:$0xff]  ;;  %v2940_v19 = vld [vmem:[%s8706_s5 + $0x38] sm:$0xff] }
 0x3b2   :  { %2869 = vst.msk [vmem:[#allocation3 + $0xa] sm:$0x1] %vm2388_vm6, %v2861_v40  ;;  %v2542_v0 = vld [vmem:[#allocation2 + $0x20] sm:$0x1]  ;;  %v2550_v59 = vld [vmem:[#allocation2 + $0x21] sm:$0x1]  ;;  %v2470_v8 = vadd.f32 %v7252_v56, %v2462_v42  ;;  %v5381_v13 = vpack.c.bf16 %v2935_v61, %v2933_v51  ;;  %v5383_v17 = vpack.c.bf16 %v2940_v19, %v2938_v62 }
 0x3b3   :  { %v2590_v4 = vld [vmem:[#allocation2 + $0x22] sm:$0x1]  ;;  %2323 = vst.msk [vmem:[#allocation2 + $0x30] sm:$0xff] %vm2316_vm5, %v2298_v47  ;;  %v2558_v12 = vmax.f32 %v2542_v0, %v2550_v59  ;;  %v2598_v10 = vld [vmem:[#allocation2 + $0x23] sm:$0x1]  ;;  %v2518_v21 = vadd.f32 %v7252_v56, %v2510_v57  ;;  %v2208_v50 = vpop.f32.mrb[62].mxu1 }
 0x3b4   :  { %2917 = vst.msk [vmem:[#allocation3 + $0xb] sm:$0x1] %vm2388_vm6, %v2909_v52  ;;  %v2638_v2 = vld [vmem:[#allocation2 + $0x24] sm:$0x1]  ;;  %v2646_v18 = vld [vmem:[#allocation2 + $0x25] sm:$0x1]  ;;  %v2606_v24 = vmax.f32 %v2590_v4, %v2598_v10  ;;  %v2299_v7 = vmax.f32 %v7207_v23, %v2208_v50 }
 0x3b5   :  { %v2654_v29 = vmax.f32 %v2638_v2, %v2646_v18  ;;  %v2686_v45 = vld [vmem:[#allocation2 + $0x26] sm:$0x1]  ;;  %v2694_v14 = vld [vmem:[#allocation2 + $0x27] sm:$0x1]  ;;  %v2430_v6 = vmax.f32 %v2422_v54, 0.0  ;;  %v2939_v28 = vld [vmem:[%s8706_s5 + $0x30] sm:$0xff]  ;;  %v2566_v30 = vadd.f32 %v7252_v56, %v2558_v12 }
 0x3b6   :  { %v2702_v55 = vmax.f32 %v2686_v45, %v2694_v14  ;;  %v2734_v60 = vld [vmem:[#allocation2 + $0x28] sm:$0x1]  ;;  %v2742_v1 = vld [vmem:[#allocation2 + $0x29] sm:$0x1]  ;;  %v2937_v22 = vld [vmem:[%s8706_s5 + $0x20] sm:$0xff]  ;;  %v2614_v31 = vadd.f32 %v7252_v56, %v2606_v24  ;;  %2324 = vst.msk [vmem:[#allocation2 + $0x38] sm:$0xff] %vm2316_vm5, %v2299_v7 }
 0x3b7   :  { %2438 = vst.msk [vmem:[#allocation3 + $0x11] sm:$0x1] %vm2388_vm6, %v2430_v6  ;;  %v2210_v32 = vpop.f32.mrb[63].mxu1  ;;  %v2963_v23 = vld [vmem:[#allocation3 + $0x1] sm:$0xff]  ;;  %v2944_v34 = vld [vmem:[%s8706_s5 + $0x58] sm:$0xff]  ;;  %v2662_v36 = vadd.f32 %v7252_v56, %v2654_v29  ;;  %v2750_v38 = vmax.f32 %v2734_v60, %v2742_v1  ;;  %v2478_v40 = vmax.f32 %v2470_v8, 0.0  ;;  %v5385_v52 = vpack.c.bf16 %v2939_v28, %v2937_v22 }
 0x3b8   :  { %v2942_v16 = vld [vmem:[%s8706_s5 + $0x48] sm:$0xff]  ;;  %v2213_v9 = vpop.f32.mrb[64].mxu1  ;;  %4969 = vmatmul.mubr.msk.f32.vlgmr.msra.gmra.mrb[96].mxu1 %vm2316_vm5, %v2963_v23  ;;  %v2526_v42 = vmax.f32 %v2518_v21, 0.0  ;;  %v7325_v44 = vld [vmem:[%s8706_s5 + $0x40] sm:$0xff]  ;;  %v7330_v46 = vld [vmem:[%s8706_s5 + $0x50] sm:$0xff]  ;;  %v2710_v47 = vadd.f32 %v7252_v56, %v2702_v55  ;;  %v2574_v12 = vmax.f32 %v2566_v30, 0.0 }
 0x3b9   :  { %v2300_v51 = vmax.f32 %v7209_v27, %v2213_v9  ;;  %3096 = vmatprep.mubr.f32.mxu1 %v5875_v3  ;;  %5382 = vmatpush1.bf16.msra.mxu1 %v5381_v13  ;;  %v2946_v54 = vld [vmem:[%s8706_s5 + $0x68] sm:$0xff]  ;;  %v2948_v57 = vld [vmem:[%s8706_s5 + $0x78] sm:$0xff]  ;;  %2486 = vst.msk [vmem:[#allocation3 + $0x12] sm:$0x1] %vm2388_vm6, %v2478_v40  ;;  %v5387_v27 = vpack.c.bf16 %v2944_v34, %v2942_v16  ;;  %v2215_v8 = vpop.f32.mrb[65].mxu1  ;;  %v2622_v24 = vmax.f32 %v2614_v31, 0.0 }
 0x3ba   :  { %v2399_v49 = vld [vmem:[#allocation2 + $0x32] sm:$0x1]  ;;  %v2407_v61 = vld [vmem:[#allocation2 + $0x33] sm:$0x1]  ;;  %v2447_v62 = vld [vmem:[#allocation2 + $0x34] sm:$0x1]  ;;  %5384 = vmatprep.subr.bf16.mxu1 %v5383_v17  ;;  %v5389_v10 = vpack.c.bf16 %v7330_v46, %v7325_v44  ;;  %v2758_v2 = vadd.f32 %v7252_v56, %v2750_v38 }
 0x3bb   :  { %v2455_v19 = vld [vmem:[#allocation2 + $0x35] sm:$0x1]  ;;  %2534 = vst.msk [vmem:[#allocation3 + $0x13] sm:$0x1] %vm2388_vm6, %v2526_v42  ;;  %v2415_v0 = vmax.f32 %v2399_v49, %v2407_v61  ;;  %v2495_v59 = vld [vmem:[#allocation2 + $0x36] sm:$0x1] }
 0x3bc   :  { %v2503_v4 = vld [vmem:[#allocation2 + $0x37] sm:$0x1]  ;;  %2325 = vst.msk [vmem:[#allocation2 + $0x40] sm:$0xff] %vm2316_vm5, %v2300_v51  ;;  %v2463_v18 = vmax.f32 %v2447_v62, %v2455_v19  ;;  %v2218_v21 = vpop.f32.mrb[66].mxu1  ;;  %v2670_v29 = vmax.f32 %v2662_v36, 0.0  ;;  %v2718_v55 = vmax.f32 %v2710_v47, 0.0 }
 0x3bd   :  { %v2423_v45 = vadd.f32 %v7252_v56, %v2415_v0  ;;  %v2511_v14 = vmax.f32 %v2495_v59, %v2503_v4  ;;  %v2301_v50 = vmax.f32 %v7211_v43, %v2218_v21  ;;  %v2220_v6 = vpop.f32.mrb[67].mxu1  ;;  %2582 = vst.msk [vmem:[#allocation3 + $0x14] sm:$0x1] %vm2388_vm6, %v2574_v12  ;;  %5386 = vmatpush1.bf16.msra.mxu1 %v5385_v52  ;;  %v2945_v60 = vld [vmem:[%s8706_s5 + $0x60] sm:$0xff]  ;;  %v2947_v1 = vld [vmem:[%s8706_s5 + $0x70] sm:$0xff]  ;;  %v2950_v28 = vld [vmem:[%s8706_s5 + $0x88] sm:$0xff] }
 0x3be   :  { %v2543_v7 = vld [vmem:[#allocation2 + $0x38] sm:$0x1]  ;;  %v2551_v13 = vld [vmem:[#allocation2 + $0x39] sm:$0x1]  ;;  %v2591_v17 = vld [vmem:[#allocation2 + $0x3a] sm:$0x1]  ;;  %5388 = vmatprep.subr.bf16.mxu1 %v5387_v27  ;;  %v5391_v43 = vpack.c.bf16 %v2948_v57, %v2946_v54  ;;  %v2471_v31 = vadd.f32 %v7252_v56, %v2463_v18  ;;  %v5393_v34 = vpack.c.bf16 %v2947_v1, %v2945_v60 }
 0x3bf   :  { %2630 = vst.msk [vmem:[#allocation3 + $0x15] sm:$0x1] %vm2388_vm6, %v2622_v24  ;;  %2678 = vst.msk [vmem:[#allocation3 + $0x16] sm:$0x1] %vm2388_vm6, %v2670_v29  ;;  %v2599_v22 = vld [vmem:[#allocation2 + $0x3b] sm:$0x1]  ;;  %v2559_v32 = vmax.f32 %v2543_v7, %v2551_v13  ;;  %v2519_v9 = vadd.f32 %v7252_v56, %v2511_v14 }
 0x3c0   :  { %2326 = vst.msk [vmem:[#allocation2 + $0x48] sm:$0xff] %vm2316_vm5, %v2301_v50  ;;  %v2952_v30 = vld [vmem:[%s8706_s5 + $0x98] sm:$0xff]  ;;  %v2223_v23 = vpop.f32.mrb[68].mxu1  ;;  %v2766_v16 = vmax.f32 %v2758_v2, 0.0  ;;  %v2949_v36 = vld [vmem:[%s8706_s5 + $0x80] sm:$0xff]  ;;  %v2951_v38 = vld [vmem:[%s8706_s5 + $0x90] sm:$0xff]  ;;  %v2607_v40 = vmax.f32 %v2591_v17, %v2599_v22 }
 0x3c1   :  { %2726 = vst.msk [vmem:[#allocation3 + $0x17] sm:$0x1] %vm2388_vm6, %v2718_v55  ;;  %v2639_v42 = vld [vmem:[#allocation2 + $0x3c] sm:$0x1]  ;;  %v2647_v44 = vld [vmem:[#allocation2 + $0x3d] sm:$0x1]  ;;  %v2302_v46 = vmax.f32 %v7213_v48, %v2223_v23  ;;  %5390 = vmatpush1.bf16.msra.mxu1 %v5389_v10  ;;  %v5395_v54 = vpack.c.bf16 %v2952_v30, %v2950_v28  ;;  %v2567_v61 = vadd.f32 %v7252_v56, %v2559_v32 }
 0x3c2   :  { %v2225_v47 = vpop.f32.mrb[69].mxu1  ;;  %v2431_v49 = vmax.f32 %v2423_v45, 0.0  ;;  %v2687_v51 = vld [vmem:[#allocation2 + $0x3e] sm:$0x1]  ;;  %v2695_v52 = vld [vmem:[#allocation2 + $0x3f] sm:$0x1]  ;;  %5392 = vmatprep.subr.bf16.mxu1 %v5391_v43  ;;  %v2655_v62 = vmax.f32 %v2639_v42, %v2647_v44  ;;  %v5397_v0 = vpack.c.bf16 %v2951_v38, %v2949_v36  ;;  %v2615_v8 = vadd.f32 %v7252_v56, %v2607_v40 }
 0x3c3   :  { %2774 = vst.msk [vmem:[#allocation3 + $0x18] sm:$0x1] %vm2388_vm6, %v2766_v16  ;;  %v2954_v57 = vld [vmem:[%s8706_s5 + $0xa8] sm:$0xff]  ;;  %v2956_v48 = vld [vmem:[%s8706_s5 + $0xb8] sm:$0xff]  ;;  %v2228_v19 = vpop.f32.mrb[70].mxu1  ;;  %v2479_v27 = vmax.f32 %v2471_v31, 0.0  ;;  %v2703_v12 = vmax.f32 %v2687_v51, %v2695_v52 }
 0x3c4   :  { %2327 = vst.msk [vmem:[#allocation2 + $0x50] sm:$0xff] %vm2316_vm5, %v2302_v46  ;;  %v2953_v59 = vld [vmem:[%s8706_s5 + $0xa0] sm:$0xff]  ;;  %v2955_v4 = vld [vmem:[%s8706_s5 + $0xb0] sm:$0xff]  ;;  %v2303_v18 = vmax.f32 %v7215_v53, %v2228_v19  ;;  %v2230_v21 = vpop.f32.mrb[71].mxu1  ;;  %v2527_v24 = vmax.f32 %v2519_v9, 0.0  ;;  %v5399_v45 = vpack.c.bf16 %v2956_v48, %v2954_v57  ;;  %v2958_v50 = vld [vmem:[%s8706_s5 + $0xc8] sm:$0xff]  ;;  %v2663_v6 = vadd.f32 %v7252_v56, %v2655_v62 }
 0x3c5   :  { %2439 = vst.msk [vmem:[#allocation3 + $0x21] sm:$0x1] %vm2388_vm6, %v2431_v49  ;;  %v2735_v10 = vld [vmem:[#allocation2 + $0x40] sm:$0x1]  ;;  %v2743_v2 = vld [vmem:[#allocation2 + $0x41] sm:$0x1]  ;;  %5394 = vmatpush1.bf16.msra.mxu1 %v5393_v34  ;;  %v5401_v13 = vpack.c.bf16 %v2955_v4, %v2953_v59  ;;  %v2711_v43 = vadd.f32 %v7252_v56, %v2703_v12 }
 0x3c6   :  { %2487 = vst.msk [vmem:[#allocation3 + $0x22] sm:$0x1] %vm2388_vm6, %v2479_v27  ;;  %5396 = vmatprep.subr.bf16.mxu1 %v5395_v54  ;;  %2535 = vst.msk [vmem:[#allocation3 + $0x23] sm:$0x1] %vm2388_vm6, %v2527_v24  ;;  %v2960_v53 = vld [vmem:[%s8706_s5 + $0xd8] sm:$0xff]  ;;  %v2751_v55 = vmax.f32 %v2735_v10, %v2743_v2  ;;  %v2233_v1 = vpop.f32.mrb[72].mxu1 }
 0x3c7   :  { %v2400_v29 = vld [vmem:[#allocation2 + $0x4a] sm:$0x1]  ;;  %v2408_v14 = vld [vmem:[#allocation2 + $0x4b] sm:$0x1]  ;;  %2328 = vst.msk [vmem:[#allocation2 + $0x58] sm:$0xff] %vm2316_vm5, %v2303_v18  ;;  %v2575_v7 = vmax.f32 %v2567_v61, 0.0  ;;  %v2304_v31 = vmax.f32 %v7217_v58, %v2233_v1  ;;  %v5403_v38 = vpack.c.bf16 %v2960_v53, %v2958_v50 }
 0x3c8   :  { %v2448_v60 = vld [vmem:[#allocation2 + $0x4c] sm:$0x1]  ;;  %v2957_v17 = vld [vmem:[%s8706_s5 + $0xc0] sm:$0xff]  ;;  %v2416_v22 = vmax.f32 %v2400_v29, %v2408_v14  ;;  %v2456_v28 = vld [vmem:[#allocation2 + $0x4d] sm:$0x1]  ;;  %v2235_v32 = vpop.f32.mrb[73].mxu1  ;;  %v2759_v58 = vadd.f32 %v7252_v56, %v2751_v55 }
 0x3c9   :  { %v2623_v23 = vmax.f32 %v2615_v8, 0.0  ;;  %5398 = vmatpush1.bf16.msra.mxu1 %v5397_v0  ;;  %v2959_v16 = vld [vmem:[%s8706_s5 + $0xd0] sm:$0xff]  ;;  %v2496_v34 = vld [vmem:[#allocation2 + $0x4e] sm:$0x1]  ;;  %v2504_v36 = vld [vmem:[#allocation2 + $0x4f] sm:$0x1]  ;;  %v2464_v9 = vmax.f32 %v2448_v60, %v2456_v28 }
 0x3ca   :  { %v2964_v30 = vld [vmem:[#allocation3 + $0x11] sm:$0xff]  ;;  %2583 = vst.msk [vmem:[#allocation3 + $0x24] sm:$0x1] %vm2388_vm6, %v2575_v7  ;;  %5400 = vmatprep.subr.bf16.mxu1 %v5399_v45  ;;  %v2238_v40 = vpop.f32.mrb[74].mxu1  ;;  %v2671_v42 = vmax.f32 %v2663_v6, 0.0  ;;  %v5405_v44 = vpack.c.bf16 %v2959_v16, %v2957_v17  ;;  %v2424_v46 = vadd.f32 %v7252_v56, %v2416_v22  ;;  %v2512_v47 = vmax.f32 %v2496_v34, %v2504_v36  ;;  %v2962_v62 = vld [vmem:[%s8706_s5 + $0xe8] sm:$0xff] }
 0x3cb   :  { %4970 = vmatmul.mubr.msk.f32.gmra.mrb[98].mxu1 %vm2316_vm5, %v2964_v30  ;;  %2329 = vst.msk [vmem:[#allocation2 + $0x60] sm:$0xff] %vm2316_vm5, %v2304_v31  ;;  %v2544_v49 = vld [vmem:[#allocation2 + $0x50] sm:$0x1]  ;;  %v2552_v51 = vld [vmem:[#allocation2 + $0x51] sm:$0x1]  ;;  %v2305_v52 = vmax.f32 %v7219_v63, %v2238_v40  ;;  %v2240_v54 = vpop.f32.mrb[75].mxu1  ;;  %v2472_v27 = vadd.f32 %v7252_v56, %v2464_v9 }
 0x3cc   :  { %3102 = vmatprep.mubr.f32.mxu1 %v5875_v3  ;;  %2631 = vst.msk [vmem:[#allocation3 + $0x25] sm:$0x1] %vm2388_vm6, %v2623_v23  ;;  %v2719_v57 = vmax.f32 %v2711_v43, 0.0  ;;  %v2592_v48 = vld [vmem:[#allocation2 + $0x52] sm:$0x1]  ;;  %v4986_v63 = vld [vmem:[%s8706_s5 + $0x1e8] sm:$0xff]  ;;  %v2560_v0 = vmax.f32 %v2544_v49, %v2552_v51  ;;  %v2520_v8 = vadd.f32 %v7252_v56, %v2512_v47 }
 0x3cd   :  { %5402 = vmatpush1.bf16.msra.mxu1 %v5401_v13  ;;  %v2600_v61 = vld [vmem:[#allocation2 + $0x53] sm:$0x1]  ;;  %2679 = vst.msk [vmem:[#allocation3 + $0x26] sm:$0x1] %vm2388_vm6, %v2671_v42  ;;  %v4988_v19 = vld [vmem:[%s8706_s5 + $0x1f8] sm:$0xff]  ;;  %v2243_v59 = vpop.f32.mrb[76].mxu1 }
 0x3ce   :  { %5404 = vmatprep.subr.bf16.mxu1 %v5403_v38  ;;  %2330 = vst.msk [vmem:[#allocation2 + $0x68] sm:$0xff] %vm2316_vm5, %v2305_v52  ;;  %v2767_v4 = vmax.f32 %v2759_v58, 0.0  ;;  %v2608_v12 = vmax.f32 %v2592_v48, %v2600_v61  ;;  %v2640_v10 = vld [vmem:[#allocation2 + $0x54] sm:$0x1]  ;;  %v2648_v2 = vld [vmem:[#allocation2 + $0x55] sm:$0x1]  ;;  %v2306_v18 = vmax.f32 %v7221_v5, %v2243_v59  ;;  %v5407_v50 = vpack.c.bf16 %v4988_v19, %v4986_v63 }
 0x3cf   :  { %2727 = vst.msk [vmem:[#allocation3 + $0x27] sm:$0x1] %vm2388_vm6, %v2719_v57  ;;  %v2245_v21 = vpop.f32.mrb[77].mxu1  ;;  %v2432_v24 = vmax.f32 %v2424_v46, 0.0  ;;  %v2688_v29 = vld [vmem:[#allocation2 + $0x56] sm:$0x1]  ;;  %v2568_v53 = vadd.f32 %v7252_v56, %v2560_v0  ;;  %v2656_v5 = vmax.f32 %v2640_v10, %v2648_v2 }
 0x3d0   :  { %v2696_v45 = vld [vmem:[#allocation2 + $0x57] sm:$0x1]  ;;  %2775 = vst.msk [vmem:[#allocation3 + $0x28] sm:$0x1] %vm2388_vm6, %v2767_v4  ;;  %v2961_v14 = vld [vmem:[%s8706_s5 + $0xe0] sm:$0xff]  ;;  %v2480_v55 = vmax.f32 %v2472_v27, 0.0  ;;  %v2616_v60 = vadd.f32 %v7252_v56, %v2608_v12 }
 0x3d1   :  { %5406 = vmatpush1.bf16.msra.mxu1 %v5405_v44  ;;  %2331 = vst.msk [vmem:[#allocation2 + $0x70] sm:$0xff] %vm2316_vm5, %v2306_v18  ;;  %v2248_v6 = vpop.f32.mrb[78].mxu1  ;;  %v2704_v1 = vmax.f32 %v2688_v29, %v2696_v45  ;;  %v2736_v7 = vld [vmem:[#allocation2 + $0x58] sm:$0x1]  ;;  %v2744_v13 = vld [vmem:[#allocation2 + $0x59] sm:$0x1]  ;;  %v2664_v34 = vadd.f32 %v7252_v56, %v2656_v5 }
 0x3d2   :  { %3191 = vmatprep.subr.mxu1 %v2962_v62  ;;  %2440 = vst.msk [vmem:[#allocation3 + $0x31] sm:$0x1] %vm2388_vm6, %v2432_v24  ;;  %v2307_v17 = vmax.f32 %v7223_v11, %v2248_v6  ;;  %v2250_v43 = vpop.f32.mrb[79].mxu1  ;;  %v2528_v22 = vmax.f32 %v2520_v8, 0.0  ;;  %v2401_v28 = vld [vmem:[#allocation2 + $0x62] sm:$0x1]  ;;  %v2752_v11 = vmax.f32 %v2736_v7, %v2744_v13 }
 0x3d3   :  { %v2409_v30 = vld [vmem:[#allocation2 + $0x63] sm:$0x1]  ;;  %2488 = vst.msk [vmem:[#allocation3 + $0x32] sm:$0x1] %vm2388_vm6, %v2480_v55  ;;  %v2343_v31 = vld [vmem:[#allocation2 + $0x18] sm:$0x1]  ;;  %v2712_v42 = vadd.f32 %v7252_v56, %v2704_v1 }
 0x3d4   :  { %v2351_v32 = vld [vmem:[#allocation2 + $0x19] sm:$0x1]  ;;  %v7444_v23 = vld [vmem:[#allocation2 + $0x2a] sm:$0x1]  ;;  %2332 = vst.msk [vmem:[#allocation2 + $0x78] sm:$0xff] %vm2316_vm5, %v2307_v17  ;;  %v2576_v58 = vmax.f32 %v2568_v53, 0.0  ;;  %v2417_v44 = vmax.f32 %v2401_v28, %v2409_v30  ;;  %v2760_v59 = vadd.f32 %v7252_v56, %v2752_v11 }
 0x3d5   :  { %3192 = vmatpush1.msra.mxu1 %v2961_v14  ;;  %2536 = vst.msk [vmem:[#allocation3 + $0x33] sm:$0x1] %vm2388_vm6, %v2528_v22  ;;  %v2790_v16 = vld [vmem:[#allocation2 + $0x2b] sm:$0x1]  ;;  %v2449_v36 = vld [vmem:[#allocation2 + $0x64] sm:$0x1]  ;;  %v2359_v61 = vmax.f32 %v2343_v31, %v2351_v32 }
 0x3d6   :  { %5408 = vmatprep.subr.bf16.mxu1 %v5407_v50  ;;  %v2253_v38 = vpop.f32.mrb[80].mxu1  ;;  %v7449_v9 = vld [vmem:[#allocation2 + $0x2c] sm:$0x1]  ;;  %v7451_v40 = vld [vmem:[#allocation2 + $0x2d] sm:$0x1]  ;;  %v2624_v52 = vmax.f32 %v2616_v60, 0.0  ;;  %v2425_v24 = vadd.f32 %v7252_v56, %v2417_v44 }
 0x3d7   :  { %v2457_v46 = vld [vmem:[#allocation2 + $0x65] sm:$0x1]  ;;  %v2308_v49 = vmax.f32 %v7225_v15, %v2253_v38  ;;  %v2255_v51 = vpop.f32.mrb[81].mxu1  ;;  %v2878_v54 = vld [vmem:[#allocation2 + $0x2e] sm:$0x1]  ;;  %v2798_v15 = vmax.f32 %v7444_v23, %v2790_v16  ;;  %v2672_v12 = vmax.f32 %v2664_v34, 0.0  ;;  %v2846_v6 = vmax.f32 %v7449_v9, %v7451_v40 }
 0x3d8   :  { %v2965_v47 = vld [vmem:[#allocation3 + $0x21] sm:$0xff]  ;;  %2584 = vst.msk [vmem:[#allocation3 + $0x34] sm:$0x1] %vm2388_vm6, %v2576_v58  ;;  %v2886_v62 = vld [vmem:[#allocation2 + $0x2f] sm:$0x1]  ;;  %v2465_v4 = vmax.f32 %v2449_v36, %v2457_v46  ;;  %v2720_v5 = vmax.f32 %v2712_v42, 0.0  ;;  %v7478_v13 = vadd.f32 %v7252_v56, %v2359_v61 }
 0x3d9   :  { %v2497_v57 = vld [vmem:[#allocation2 + $0x66] sm:$0x1]  ;;  %v2505_v48 = vld [vmem:[#allocation2 + $0x67] sm:$0x1]  ;;  %4971 = vmatmul.mubr.msk.f32.gmra.mrb[100].mxu1 %vm2316_vm5, %v2965_v47  ;;  %v2344_v63 = vld [vmem:[#allocation2 + $0x30] sm:$0x1]  ;;  %v2894_v55 = vmax.f32 %v2878_v54, %v2886_v62  ;;  %v7489_v30 = vadd.f32 %v7252_v56, %v2798_v15 }
 0x3da   :  { %v2352_v19 = vld [vmem:[#allocation2 + $0x31] sm:$0x1]  ;;  %2333 = vst.msk [vmem:[#allocation2 + $0x80] sm:$0xff] %vm2316_vm5, %v2308_v49  ;;  %3108 = vmatprep.mubr.f32.mxu1 %v5875_v3  ;;  %v2783_v27 = vld [vmem:[#allocation2 + $0x42] sm:$0x1]  ;;  %v2258_v8 = vpop.f32.mrb[82].mxu1  ;;  %v2513_v29 = vmax.f32 %v2497_v57, %v2505_v48  ;;  %v2473_v31 = vadd.f32 %v7252_v56, %v2465_v4  ;;  %v7503_v49 = vadd.f32 %v7252_v56, %v2846_v6 }
 0x3db   :  { %2632 = vst.msk [vmem:[#allocation3 + $0x35] sm:$0x1] %vm2388_vm6, %v2624_v52  ;;  %v2791_v0 = vld [vmem:[#allocation2 + $0x43] sm:$0x1]  ;;  %v7462_v10 = vld [vmem:[#allocation2 + $0x44] sm:$0x1]  ;;  %v2309_v50 = vmax.f32 %v7227_v20, %v2258_v8  ;;  %v2360_v17 = vmax.f32 %v2344_v63, %v2352_v19  ;;  %v7506_v51 = vadd.f32 %v7252_v56, %v2894_v55 }
 0x3dc   :  { %v7464_v2 = vld [vmem:[#allocation2 + $0x45] sm:$0x1]  ;;  %v7466_v18 = vld [vmem:[#allocation2 + $0x46] sm:$0x1]  ;;  %v7468_v21 = vld [vmem:[#allocation2 + $0x47] sm:$0x1]  ;;  %v2799_v43 = vmax.f32 %v2783_v27, %v2791_v0  ;;  %v2521_v58 = vadd.f32 %v7252_v56, %v2513_v29 }
 0x3dd   :  { %v2545_v45 = vld [vmem:[#allocation2 + $0x68] sm:$0x1]  ;;  %v2553_v14 = vld [vmem:[#allocation2 + $0x69] sm:$0x1]  ;;  %v2260_v53 = vpop.f32.mrb[83].mxu1  ;;  %2334 = vst.msk [vmem:[#allocation2 + $0x88] sm:$0xff] %vm2316_vm5, %v2309_v50  ;;  %v2847_v52 = vmax.f32 %v7462_v10, %v7464_v2  ;;  %v2895_v54 = vmax.f32 %v7466_v18, %v7468_v21 }
 0x3de   :  { %v7474_v60 = vld [vmem:[#allocation2 + $0x48] sm:$0x1]  ;;  %v2593_v1 = vld [vmem:[#allocation2 + $0x6a] sm:$0x1]  ;;  %v2601_v7 = vld [vmem:[#allocation2 + $0x6b] sm:$0x1]  ;;  %v2561_v32 = vmax.f32 %v2545_v45, %v2553_v14  ;;  %v7519_v62 = vadd.f32 %v7252_v56, %v2799_v43 }
 0x3df   :  { %2680 = vst.msk [vmem:[#allocation3 + $0x36] sm:$0x1] %vm2388_vm6, %v2672_v12  ;;  %v7480_v22 = vld [vmem:[#allocation2 + $0x49] sm:$0x1]  ;;  %v7482_v20 = vld [vmem:[#allocation2 + $0x6c] sm:$0x1]  ;;  %v2609_v9 = vmax.f32 %v2593_v1, %v2601_v7  ;;  %v7549_v1 = vadd.f32 %v7252_v56, %v2847_v52  ;;  %v7552_v7 = vadd.f32 %v7252_v56, %v2895_v54 }
 0x3e0   :  { %v7484_v28 = vld [vmem:[#allocation2 + $0x6d] sm:$0x1]  ;;  %2728 = vst.msk [vmem:[#allocation3 + $0x37] sm:$0x1] %vm2388_vm6, %v2720_v5  ;;  %v7492_v23 = vld [vmem:[#allocation2 + $0x6e] sm:$0x1]  ;;  %v2361_v63 = vmax.f32 %v7474_v60, %v7480_v22 }
 0x3e1   :  { %v7494_v16 = vld [vmem:[#allocation2 + $0x6f] sm:$0x1]  ;;  %v2768_v34 = vmax.f32 %v2760_v59, 0.0  ;;  %v2263_v11 = vpop.f32.mrb[84].mxu1  ;;  %v7496_v36 = vld [vmem:[#allocation2 + $0x5a] sm:$0x1]  ;;  %v2657_v0 = vmax.f32 %v7482_v20, %v7484_v28  ;;  %v2569_v59 = vadd.f32 %v7252_v56, %v2561_v32  ;;  %v2617_v29 = vadd.f32 %v7252_v56, %v2609_v9 }
 0x3e2   :  { %v7498_v38 = vld [vmem:[#allocation2 + $0x5b] sm:$0x1]  ;;  %v2737_v40 = vld [vmem:[#allocation2 + $0x70] sm:$0x1]  ;;  %v2745_v42 = vld [vmem:[#allocation2 + $0x71] sm:$0x1]  ;;  %v2310_v44 = vmax.f32 %v7229_v25, %v2263_v11  ;;  %v7516_v25 = vadd.f32 %v7252_v56, %v2360_v17  ;;  %v2705_v4 = vmax.f32 %v7492_v23, %v7494_v16  ;;  %v7567_v23 = vadd.f32 %v7252_v56, %v2361_v63 }
 0x3e3   :  { %v2265_v46 = vpop.f32.mrb[85].mxu1  ;;  %v2433_v47 = vmax.f32 %v2425_v24, 0.0  ;;  %v7512_v57 = vld [vmem:[#allocation2 + $0x5c] sm:$0x1]  ;;  %v2402_v48 = vld [vmem:[#allocation2 + $0x7a] sm:$0x1]  ;;  %v2753_v8 = vmax.f32 %v2737_v40, %v2745_v42  ;;  %v2800_v17 = vmax.f32 %v7496_v36, %v7498_v38 }
 0x3e4   :  { %v2410_v61 = vld [vmem:[#allocation2 + $0x7b] sm:$0x1]  ;;  %2776 = vst.msk [vmem:[#allocation3 + $0x38] sm:$0x1] %vm2388_vm6, %v2768_v34  ;;  %v2840_v19 = vld [vmem:[#allocation2 + $0x5d] sm:$0x1]  ;;  %v7572_v34 = vadd.f32 %v7252_v56, %v2657_v0  ;;  %v2713_v9 = vadd.f32 %v7252_v56, %v2705_v4 }
 0x3e5   :  { %v7523_v15 = vld [vmem:[#allocation2 + $0x5e] sm:$0x1]  ;;  %v7525_v27 = vld [vmem:[#allocation2 + $0x5f] sm:$0x1]  ;;  %2335 = vst.msk [vmem:[#allocation2 + $0x90] sm:$0xff] %vm2316_vm5, %v2310_v44  ;;  %v2268_v2 = vpop.f32.mrb[86].mxu1  ;;  %v2418_v50 = vmax.f32 %v2402_v48, %v2410_v61  ;;  %v2848_v43 = vmax.f32 %v7512_v57, %v2840_v19  ;;  %v7584_v40 = vadd.f32 %v7252_v56, %v2753_v8 }
 0x3e6   :  { %2441 = vst.msk [vmem:[#allocation3 + $0x41] sm:$0x1] %vm2388_vm6, %v2433_v47  ;;  %v2450_v12 = vld [vmem:[#allocation2 + $0x7c] sm:$0x1]  ;;  %v2458_v10 = vld [vmem:[#allocation2 + $0x7d] sm:$0x1]  ;;  %v2311_v6 = vmax.f32 %v7237_v33, %v2268_v2  ;;  %v2896_v16 = vmax.f32 %v7523_v15, %v7525_v27  ;;  %v7599_v27 = vadd.f32 %v7252_v56, %v2800_v17 }
 0x3e7   :  { %v2481_v18 = vmax.f32 %v2473_v31, 0.0  ;;  %v7534_v21 = vld [vmem:[#allocation2 + $0x60] sm:$0x1]  ;;  %v7536_v24 = vld [vmem:[#allocation2 + $0x61] sm:$0x1]  ;;  %v2270_v55 = vpop.f32.mrb[87].mxu1  ;;  %v2466_v11 = vmax.f32 %v2450_v12, %v2458_v10  ;;  %v7593_v54 = vadd.f32 %v7252_v56, %v2418_v50  ;;  %v7602_v0 = vadd.f32 %v7252_v56, %v2848_v43 }
 0x3e8   :  { %v7539_v45 = vld [vmem:[#allocation2 + $0x72] sm:$0x1]  ;;  %v7541_v14 = vld [vmem:[#allocation2 + $0x73] sm:$0x1]  ;;  %v7543_v53 = vld [vmem:[#allocation2 + $0x7e] sm:$0x1] }
 0x3e9   :  { %v7545_v5 = vld [vmem:[#allocation2 + $0x7f] sm:$0x1]  ;;  %v2529_v60 = vmax.f32 %v2521_v58, 0.0  ;;  %v7557_v22 = vld [vmem:[#allocation2 + $0x74] sm:$0x1]  ;;  %2336 = vst.msk [vmem:[#allocation2 + $0x98] sm:$0xff] %vm2316_vm5, %v2311_v6  ;;  %v2801_v4 = vmax.f32 %v7539_v45, %v7541_v14  ;;  %v7617_v10 = vadd.f32 %v7252_v56, %v2466_v11 }
 0x3ea   :  { %v7559_v20 = vld [vmem:[#allocation2 + $0x75] sm:$0x1]  ;;  %v7561_v28 = vld [vmem:[#allocation2 + $0x76] sm:$0x1]  ;;  %v7563_v33 = vld [vmem:[#allocation2 + $0x77] sm:$0x1]  ;;  %v2514_v42 = vmax.f32 %v7543_v53, %v7545_v5 }
 0x3eb   :  { %v2546_v31 = vld [vmem:[#allocation2 + $0x80] sm:$0x1]  ;;  %v2554_v32 = vld [vmem:[#allocation2 + $0x81] sm:$0x1]  ;;  %2489 = vst.msk [vmem:[#allocation3 + $0x42] sm:$0x1] %vm2388_vm6, %v2481_v18  ;;  %v2897_v12 = vmax.f32 %v7561_v28, %v7563_v33  ;;  %v7648_v33 = vadd.f32 %v7252_v56, %v2896_v16 }
 0x3ec   :  { %v7574_v36 = vld [vmem:[#allocation2 + $0x82] sm:$0x1]  ;;  %v7576_v38 = vld [vmem:[#allocation2 + $0x83] sm:$0x1]  ;;  %v7578_v58 = vld [vmem:[#allocation2 + $0x84] sm:$0x1]  ;;  %v2562_v57 = vmax.f32 %v2546_v31, %v2554_v32 }
 0x3ed   :  { %2537 = vst.msk [vmem:[#allocation3 + $0x43] sm:$0x1] %vm2388_vm6, %v2529_v60  ;;  %v7588_v44 = vld [vmem:[#allocation2 + $0x85] sm:$0x1]  ;;  %v7590_v46 = vld [vmem:[#allocation2 + $0x86] sm:$0x1]  ;;  %v2610_v2 = vmax.f32 %v7574_v36, %v7576_v38  ;;  %v2522_v60 = vadd.f32 %v7252_v56, %v2514_v42 }
 0x3ee   :  { %v2273_v47 = vpop.f32.mrb[88].mxu1  ;;  %v2577_v52 = vmax.f32 %v2569_v59, 0.0  ;;  %v7595_v48 = vld [vmem:[#allocation2 + $0x87] sm:$0x1]  ;;  %v2966_v61 = vld [vmem:[#allocation3 + $0x31] sm:$0xff]  ;;  %v2625_v15 = vmax.f32 %v2617_v29, 0.0  ;;  %v2362_v59 = vmax.f32 %v7534_v21, %v7536_v24  ;;  %v2658_v29 = vmax.f32 %v7578_v58, %v7588_v44 }
 0x3ef   :  { %v2312_v63 = vmax.f32 %v7239_v35, %v2273_v47  ;;  %v2275_v19 = vpop.f32.mrb[89].mxu1  ;;  %v7608_v8 = vld [vmem:[#allocation2 + $0x88] sm:$0x1]  ;;  %4972 = vmatmul.mubr.msk.f32.gmra.mrb[102].mxu1 %vm2316_vm5, %v2966_v61  ;;  %v2849_v35 = vmax.f32 %v7557_v22, %v7559_v20  ;;  %v2746_v18 = vld [vmem:[#allocation2 + $0x89] sm:$0x1]  ;;  %v2706_v45 = vmax.f32 %v7590_v46, %v7595_v48  ;;  %v2673_v53 = vmax.f32 %v7572_v34, 0.0 }
 0x3f0   :  { %2585 = vst.msk [vmem:[#allocation3 + $0x44] sm:$0x1] %vm2388_vm6, %v2577_v52  ;;  %v7621_v21 = vld [vmem:[#allocation2 + $0x92] sm:$0x1]  ;;  %v7623_v24 = vld [vmem:[#allocation2 + $0x93] sm:$0x1]  ;;  %3114 = vmatprep.mubr.f32.mxu1 %v5875_v3  ;;  %v2570_v17 = vadd.f32 %v7252_v56, %v2562_v57  ;;  %v7651_v31 = vadd.f32 %v7252_v56, %v2362_v59  ;;  %v2754_v32 = vmax.f32 %v7608_v8, %v2746_v18 }
 0x3f1   :  { %2337 = vst.msk [vmem:[#allocation2 + $0xa0] sm:$0xff] %vm2316_vm5, %v2312_v63  ;;  %v7632_v14 = vld [vmem:[#allocation2 + $0x94] sm:$0x1]  ;;  %v7634_v50 = vld [vmem:[#allocation2 + $0x95] sm:$0x1]  ;;  %v2721_v5 = vmax.f32 %v2713_v9, 0.0 }
 0x3f2   :  { %2633 = vst.msk [vmem:[#allocation3 + $0x45] sm:$0x1] %vm2388_vm6, %v2625_v15  ;;  %v7637_v6 = vld [vmem:[#allocation2 + $0x78] sm:$0x1]  ;;  %v7639_v55 = vld [vmem:[#allocation2 + $0x79] sm:$0x1] }
 0x3f3   :  { %v7643_v43 = vld [vmem:[#allocation2 + $0x96] sm:$0x1]  ;;  %v2769_v22 = vmax.f32 %v7584_v40, 0.0  ;;  %v2278_v20 = vpop.f32.mrb[90].mxu1  ;;  %v2434_v28 = vmax.f32 %v7593_v54, 0.0  ;;  %v2419_v54 = vmax.f32 %v7621_v21, %v7623_v24  ;;  %v2482_v8 = vmax.f32 %v7617_v10, 0.0 }
 0x3f4   :  { %v7654_v34 = vld [vmem:[#allocation2 + $0x8a] sm:$0x1]  ;;  %v7656_v11 = vld [vmem:[#allocation2 + $0x8b] sm:$0x1]  ;;  %v7658_v36 = vld [vmem:[#allocation2 + $0x8c] sm:$0x1]  ;;  %v2313_v56 = vmax.f32 %v7241_v37, %v2278_v20 }
 0x3f5   :  { %v7660_v38 = vld [vmem:[#allocation2 + $0x8d] sm:$0x1]  ;;  %v7662_v58 = vld [vmem:[#allocation2 + $0x8e] sm:$0x1]  ;;  %v7664_v9 = vld [vmem:[#allocation2 + $0x8f] sm:$0x1]  ;;  %v2802_v10 = vmax.f32 %v7654_v34, %v7656_v11 }
 0x3f6   :  { %v2507_v40 = vld [vmem:[#allocation2 + $0x97] sm:$0x1]  ;;  %v2547_v16 = vld [vmem:[#allocation2 + $0x98] sm:$0x1]  ;;  %v2555_v42 = vld [vmem:[#allocation2 + $0x99] sm:$0x1] }
 0x3f7   :  { %2681 = vst.msk [vmem:[#allocation3 + $0x46] sm:$0x1] %vm2388_vm6, %v2673_v53  ;;  %2729 = vst.msk [vmem:[#allocation3 + $0x47] sm:$0x1] %vm2388_vm6, %v2721_v5  ;;  %v7672_v44 = vld [vmem:[%s8707_s4] ss:$0 sm:$0xff]  ;;  %v2563_v53 = vmax.f32 %v2547_v16, %v2555_v42 }
 0x3f8   :  { %v7675_v46 = vadd.f32 %v7672_v44, %v2801_v4  ;;  %v7678_v47 = vadd.f32 %v7672_v44, %v2849_v35  ;;  %v7681_v52 = vadd.f32 %v7672_v44, %v2897_v12  ;;  %v7685_v57 = vld [vmem:[#allocation2 + $0x9a] sm:$0x1]  ;;  %v7687_v37 = vld [vmem:[#allocation2 + $0x9b] sm:$0x1]  ;;  %v7689_v48 = vld [vmem:[#allocation2 + $0x9c] sm:$0x1]  ;;  %v2618_v61 = vadd.f32 %v7672_v44, %v2610_v2 }
 0x3f9   :  { %2777 = vst.msk [vmem:[#allocation3 + $0x48] sm:$0x1] %vm2388_vm6, %v2769_v22  ;;  %2442 = vst.msk [vmem:[#allocation3 + $0x51] sm:$0x1] %vm2388_vm6, %v2434_v28  ;;  %v2666_v63 = vadd.f32 %v7672_v44, %v2658_v29  ;;  %v2714_v19 = vadd.f32 %v7672_v44, %v2706_v45  ;;  %v7696_v15 = vld [vmem:[#allocation2 + $0x9d] sm:$0x1]  ;;  %v2467_v35 = vmax.f32 %v7632_v14, %v7634_v50 }
 0x3fa   :  { %v7698_v59 = vld [vmem:[#allocation2 + $0x9e] sm:$0x1]  ;;  %2338 = vst.msk [vmem:[#allocation2 + $0xa8] sm:$0xff] %vm2316_vm5, %v2313_v56  ;;  %v2280_v4 = vpop.f32.mrb[91].mxu1  ;;  %v2515_v12 = vmax.f32 %v7643_v43, %v2507_v40  ;;  %v2699_v18 = vld [vmem:[#allocation2 + $0x9f] sm:$0x1]  ;;  %v2363_v29 = vmax.f32 %v7637_v6, %v7639_v55  ;;  %v2762_v45 = vadd.f32 %v7672_v44, %v2754_v32  ;;  %v2850_v14 = vmax.f32 %v7658_v36, %v7660_v38 }
 0x3fb   :  { %v2283_v2 = vpop.f32.mrb[92].mxu1  ;;  %v2530_v21 = vmax.f32 %v2522_v60, 0.0  ;;  %v2578_v24 = vmax.f32 %v2570_v17, 0.0  ;;  %2490 = vst.msk [vmem:[#allocation3 + $0x52] sm:$0x1] %vm2388_vm6, %v2482_v8  ;;  %v2898_v50 = vmax.f32 %v7662_v58, %v7664_v9  ;;  %v7717_v60 = vadd.f32 %v7672_v44, %v2419_v54 }
 0x3fc   :  { %v2314_v5 = vmax.f32 %v7243_v39, %v2283_v2  ;;  %v2739_v6 = vld [vmem:[#allocation2 + $0xa0] sm:$0x1]  ;;  %v2747_v55 = vld [vmem:[#allocation2 + $0xa1] sm:$0x1]  ;;  %v2348_v39 = vld [vmem:[#allocation2 + $0x90] sm:$0x1]  ;;  %v2611_v43 = vmax.f32 %v7685_v57, %v7687_v37  ;;  %v2659_v22 = vmax.f32 %v7689_v48, %v7696_v15  ;;  %v2707_v20 = vmax.f32 %v7698_v59, %v2699_v18 }
 0x3fd   :  { %2538 = vst.msk [vmem:[#allocation3 + $0x53] sm:$0x1] %vm2388_vm6, %v2530_v21  ;;  %2586 = vst.msk [vmem:[#allocation3 + $0x54] sm:$0x1] %vm2388_vm6, %v2578_v24  ;;  %v2356_v17 = vld [vmem:[#allocation2 + $0x91] sm:$0x1]  ;;  %v2475_v34 = vadd.f32 %v7672_v44, %v2467_v35  ;;  %v7729_v11 = vadd.f32 %v7672_v44, %v2515_v12  ;;  %v2571_v9 = vadd.f32 %v7672_v44, %v2563_v53 }
 0x3fe   :  { %2339 = vst.msk [vmem:[#allocation2 + $0xb0] sm:$0xff] %vm2316_vm5, %v2314_v5  ;;  %v2285_v28 = vpop.f32.mrb[93].mxu1  ;;  %v2626_v32 = vmax.f32 %v2618_v61, 0.0  ;;  %v2674_v38 = vmax.f32 %v2666_v63, 0.0  ;;  %v2722_v58 = vmax.f32 %v2714_v19, 0.0  ;;  %v2755_v40 = vmax.f32 %v2739_v6, %v2747_v55 }
 0x3ff   :  { %v2288_v36 = vpop.f32.mrb[94].mxu1  ;;  %v7732_v16 = vld [vmem:[#allocation2 + $0xa2] sm:$0x1]  ;;  %v7734_v42 = vld [vmem:[#allocation2 + $0xa3] sm:$0x1]  ;;  %v2770_v19 = vmax.f32 %v2762_v45, 0.0  ;;  %v7747_v15 = vadd.f32 %v7672_v44, %v2363_v29  ;;  %v7750_v59 = vadd.f32 %v7672_v44, %v2802_v10  ;;  %v7753_v4 = vadd.f32 %v7672_v44, %v2850_v14 }
 0x400   :  { %v7736_v56 = vld [vmem:[#allocation2 + $0xa4] sm:$0x1]  ;;  %v7738_v54 = vld [vmem:[#allocation2 + $0xa5] sm:$0x1]  ;;  %v7740_v57 = vld [vmem:[#allocation2 + $0xa6] sm:$0x1]  ;;  %v2315_v61 = vmax.f32 %v7245_v41, %v2288_v36  ;;  %v2364_v8 = vmax.f32 %v2348_v39, %v2356_v17  ;;  %v7763_v18 = vadd.f32 %v7672_v44, %v2898_v50  ;;  %v2619_v2 = vadd.f32 %v7672_v44, %v2611_v43 }
 0x401   :  { %v7742_v37 = vld [vmem:[#allocation2 + $0xa7] sm:$0x1]  ;;  %v2290_v63 = vpop.f32.mrb[95].mxu1  ;;  %2634 = vst.msk [vmem:[#allocation3 + $0x55] sm:$0x1] %vm2388_vm6, %v2626_v32  ;;  %v2667_v21 = vadd.f32 %v7672_v44, %v2659_v22  ;;  %v2715_v24 = vadd.f32 %v7672_v44, %v2707_v20  ;;  %v2435_v6 = vmax.f32 %v7717_v60, 0.0  ;;  %v2763_v39 = vadd.f32 %v7672_v44, %v2755_v40 }
 0x402   :  { %v2967_v48 = vld [vmem:[#allocation3 + $0x41] sm:$0xff]  ;;  %v7758_v12 = vld [vmem:[#allocation2 + $0xa9] sm:$0x1]  ;;  %v2404_v41 = vld [vmem:[#allocation2 + $0xaa] sm:$0x1]  ;;  %2340 = vst.msk [vmem:[#allocation2 + $0xb8] sm:$0xff] %vm2316_vm5, %v2315_v61  ;;  %v7775_v20 = vadd.f32 %v7672_v44, %v2364_v8  ;;  %v2803_v28 = vmax.f32 %v7732_v16, %v7734_v42  ;;  %v2851_v32 = vmax.f32 %v7736_v56, %v7738_v54  ;;  %v2899_v36 = vmax.f32 %v7740_v57, %v7742_v37 }
 0x403   :  { %4973 = vmatmul.mubr.msk.f32.gmra.mrb[104].mxu1 %vm2316_vm5, %v2967_v48  ;;  %v7756_v35 = vld [vmem:[#allocation2 + $0xa8] sm:$0x1]  ;;  %2682 = vst.msk [vmem:[#allocation3 + $0x56] sm:$0x1] %vm2388_vm6, %v2674_v38  ;;  %2730 = vst.msk [vmem:[#allocation3 + $0x57] sm:$0x1] %vm2388_vm6, %v2722_v58 }
 0x404   :  { %v2412_v29 = vld [vmem:[#allocation2 + $0xab] sm:$0x1]  ;;  %v2452_v45 = vld [vmem:[#allocation2 + $0xac] sm:$0x1]  ;;  %v2460_v53 = vld [vmem:[#allocation2 + $0xad] sm:$0x1]  ;;  %3120 = vmatprep.mubr.f32.mxu1 %v5875_v3 }
 0x405   :  { %2778 = vst.msk [vmem:[#allocation3 + $0x58] sm:$0x1] %vm2388_vm6, %v2770_v19  ;;  %v2420_v5 = vmax.f32 %v2404_v41, %v2412_v29  ;;  %v2468_v10 = vmax.f32 %v2452_v45, %v2460_v53  ;;  %v2500_v14 = vld [vmem:[#allocation2 + $0xae] sm:$0x1]  ;;  %v2508_v50 = vld [vmem:[#allocation2 + $0xaf] sm:$0x1]  ;;  %v7793_v41 = vadd.f32 %v7672_v44, %v2803_v28  ;;  %v7796_v29 = vadd.f32 %v7672_v44, %v2851_v32 }
 0x406   :  { %v2483_v55 = vmax.f32 %v2475_v34, 0.0  ;;  %v2516_v17 = vmax.f32 %v2500_v14, %v2508_v50  ;;  %v2531_v43 = vmax.f32 %v7729_v11, 0.0  ;;  %v2579_v22 = vmax.f32 %v2571_v9, 0.0  ;;  %v2548_v60 = vld [vmem:[#allocation2 + $0xb0] sm:$0x1] }
 0x407   :  { %v2556_v34 = vld [vmem:[#allocation2 + $0xb1] sm:$0x1]  ;;  %v2596_v38 = vld [vmem:[#allocation2 + $0xb2] sm:$0x1]  ;;  %2443 = vst.msk [vmem:[#allocation3 + $0x61] sm:$0x1] %vm2388_vm6, %v2435_v6  ;;  %v2365_v11 = vmax.f32 %v7756_v35, %v7758_v12  ;;  %v2428_v58 = vadd.f32 %v7672_v44, %v2420_v5  ;;  %v2476_v9 = vadd.f32 %v7672_v44, %v2468_v10 }
 0x408   :  { %2491 = vst.msk [vmem:[#allocation3 + $0x62] sm:$0x1] %vm2388_vm6, %v2483_v55  ;;  %v2564_v40 = vmax.f32 %v2548_v60, %v2556_v34  ;;  %v2604_v16 = vld [vmem:[#allocation2 + $0xb3] sm:$0x1]  ;;  %v2644_v42 = vld [vmem:[#allocation2 + $0xb4] sm:$0x1]  ;;  %v2524_v19 = vadd.f32 %v7672_v44, %v2516_v17 }
 0x409   :  { %v2652_v56 = vld [vmem:[#allocation2 + $0xb5] sm:$0x1]  ;;  %2539 = vst.msk [vmem:[#allocation3 + $0x63] sm:$0x1] %vm2388_vm6, %v2531_v43  ;;  %2587 = vst.msk [vmem:[#allocation3 + $0x64] sm:$0x1] %vm2388_vm6, %v2579_v22  ;;  %v2612_v54 = vmax.f32 %v2596_v38, %v2604_v16  ;;  %v2379_v17 = vadd.f32 %v7672_v44, %v2365_v11 }
 0x40a   :  { %v2660_v57 = vmax.f32 %v2644_v42, %v2652_v56  ;;  %v2692_v37 = vld [vmem:[#allocation2 + $0xb6] sm:$0x1]  ;;  %v2700_v48 = vld [vmem:[#allocation2 + $0xb7] sm:$0x1]  ;;  %v2627_v61 = vmax.f32 %v2619_v2, 0.0  ;;  %v2675_v63 = vmax.f32 %v2667_v21, 0.0  ;;  %v2572_v45 = vadd.f32 %v7672_v44, %v2564_v40 }
 0x40b   :  { %v2708_v8 = vmax.f32 %v2692_v37, %v2700_v48  ;;  %v2723_v35 = vmax.f32 %v2715_v24, 0.0  ;;  %v2771_v12 = vmax.f32 %v2763_v39, 0.0  ;;  %v2620_v53 = vadd.f32 %v7672_v44, %v2612_v54  ;;  %v2740_v5 = vld [vmem:[#allocation2 + $0xb8] sm:$0x1]  ;;  %v2748_v10 = vld [vmem:[#allocation2 + $0xb9] sm:$0x1] }
 0x40c   :  { %v2788_v14 = vld [vmem:[#allocation2 + $0xba] sm:$0x1]  ;;  %2635 = vst.msk [vmem:[#allocation3 + $0x65] sm:$0x1] %vm2388_vm6, %v2627_v61  ;;  %2683 = vst.msk [vmem:[#allocation3 + $0x66] sm:$0x1] %vm2388_vm6, %v2675_v63  ;;  %v7803_v2 = vadd.f32 %v7672_v44, %v2899_v36  ;;  %v2668_v21 = vadd.f32 %v7672_v44, %v2660_v57  ;;  %v2756_v50 = vmax.f32 %v2740_v5, %v2748_v10 }
 0x40d   :  { %v2716_v24 = vadd.f32 %v7672_v44, %v2708_v8  ;;  %v2796_v6 = vld [vmem:[#allocation2 + $0xbb] sm:$0x1]  ;;  %v2836_v55 = vld [vmem:[#allocation2 + $0xbc] sm:$0x1]  ;;  %v2844_v39 = vld [vmem:[#allocation2 + $0xbd] sm:$0x1] }
 0x40e   :  { %2731 = vst.msk [vmem:[#allocation3 + $0x67] sm:$0x1] %vm2388_vm6, %v2723_v35  ;;  %2779 = vst.msk [vmem:[#allocation3 + $0x68] sm:$0x1] %vm2388_vm6, %v2771_v12  ;;  %v2804_v43 = vmax.f32 %v2788_v14, %v2796_v6  ;;  %v2852_v22 = vmax.f32 %v2836_v55, %v2844_v39  ;;  %v2884_v28 = vld [vmem:[#allocation2 + $0xbe] sm:$0x1]  ;;  %v2764_v34 = vadd.f32 %v7672_v44, %v2756_v50 }
 0x40f   :  { %v2892_v32 = vld [vmem:[#allocation2 + $0xbf] sm:$0x1]  ;;  %v2968_v36 = vld [vmem:[#allocation3 + $0x51] sm:$0xff]  ;;  %v2436_v60 = vmax.f32 %v2428_v58, 0.0  ;;  %v2484_v40 = vmax.f32 %v2476_v9, 0.0  ;;  %v2532_v16 = vmax.f32 %v2524_v19, 0.0 }
 0x410   :  { %v2900_v38 = vmax.f32 %v2884_v28, %v2892_v32  ;;  %4974 = vmatmul.mubr.msk.f32.gmra.mrb[106].mxu1 %vm2316_vm5, %v2968_v36  ;;  %v2812_v42 = vadd.f32 %v7672_v44, %v2804_v43  ;;  %v7814_v56 = vadd.f32 %v7672_v44, %v2852_v22  ;;  %v2580_v11 = vmax.f32 %v2572_v45, 0.0  ;;  %v4992_v10 = vld [vmem:[%s8706_s5 + $0x218] sm:$0xff]  ;;  %v4994_v50 = vld [vmem:[%s8706_s5 + $0x228] sm:$0xff]  ;;  %v4995_v43 = vld [vmem:[%s8706_s5 + $0x230] sm:$0xff] }
 0x411   :  { %3126 = vmatprep.mubr.f32.mxu1 %v5875_v3  ;;  %2444 = vst.msk [vmem:[#allocation3 + $0x71] sm:$0x1] %vm2388_vm6, %v2436_v60  ;;  %v2628_v54 = vmax.f32 %v2620_v53, 0.0  ;;  %2492 = vst.msk [vmem:[#allocation3 + $0x72] sm:$0x1] %vm2388_vm6, %v2484_v40  ;;  %v2676_v9 = vmax.f32 %v2668_v21, 0.0 }
 0x412   :  { %v7819_v58 = vadd.f32 %v7672_v44, %v2900_v38  ;;  %2540 = vst.msk [vmem:[#allocation3 + $0x73] sm:$0x1] %vm2388_vm6, %v2532_v16  ;;  %v2724_v57 = vmax.f32 %v2716_v24, 0.0  ;;  %v2772_v37 = vmax.f32 %v2764_v34, 0.0  ;;  %2588 = vst.msk [vmem:[#allocation3 + $0x74] sm:$0x1] %vm2388_vm6, %v2580_v11 }
 0x413   :  { %2636 = vst.msk [vmem:[#allocation3 + $0x75] sm:$0x1] %vm2388_vm6, %v2628_v54  ;;  %v2381_v48 = vmax.f32 %v7478_v13, 0.0  ;;  %v2382_v61 = vmax.f32 %v7516_v25, 0.0  ;;  %v2383_v63 = vmax.f32 %v7567_v23, 0.0  ;;  %v2384_v44 = vmax.f32 %v7651_v31, 0.0 }
 0x414   :  { %2684 = vst.msk [vmem:[#allocation3 + $0x76] sm:$0x1] %vm2388_vm6, %v2676_v9  ;;  %2732 = vst.msk [vmem:[#allocation3 + $0x77] sm:$0x1] %vm2388_vm6, %v2724_v57  ;;  %v2385_v19 = vmax.f32 %v7747_v15, 0.0  ;;  %v2386_v8 = vmax.f32 %v7775_v20, 0.0 }
 0x415   :  { %2780 = vst.msk [vmem:[#allocation3 + $0x78] sm:$0x1] %vm2388_vm6, %v2772_v37  ;;  %v2387_v35 = vmax.f32 %v2379_v17, 0.0  ;;  %v2814_v12 = vmax.f32 %v7489_v30, 0.0  ;;  %v2969_v13 = vld [vmem:[#allocation3 + $0x61] sm:$0xff]  ;;  %v2815_v25 = vmax.f32 %v7519_v62, 0.0 }
 0x416   :  { %2390 = vst.msk [vmem:[#allocation3 + $0x10] sm:$0x1] %vm2388_vm6, %v2381_v48  ;;  %2391 = vst.msk [vmem:[#allocation3 + $0x20] sm:$0x1] %vm2388_vm6, %v2382_v61  ;;  %v2816_v23 = vmax.f32 %v7599_v27, 0.0  ;;  %v2817_v31 = vmax.f32 %v7675_v46, 0.0  ;;  %4975 = vmatmul.mubr.msk.f32.gmra.mrb[108].mxu1 %vm2316_vm5, %v2969_v13 }
 0x417   :  { %2392 = vst.msk [vmem:[#allocation3 + $0x30] sm:$0x1] %vm2388_vm6, %v2383_v63  ;;  %2393 = vst.msk [vmem:[#allocation3 + $0x40] sm:$0x1] %vm2388_vm6, %v2384_v44  ;;  %v2818_v15 = vmax.f32 %v7750_v59, 0.0  ;;  %v2819_v30 = vmax.f32 %v7793_v41, 0.0  ;;  %3132 = vmatprep.mubr.f32.mxu1 %v5875_v3 }
 0x418   :  { %2394 = vst.msk [vmem:[#allocation3 + $0x50] sm:$0x1] %vm2388_vm6, %v2385_v19  ;;  %2395 = vst.msk [vmem:[#allocation3 + $0x60] sm:$0x1] %vm2388_vm6, %v2386_v8  ;;  %v2820_v20 = vmax.f32 %v2812_v42, 0.0  ;;  %v2862_v62 = vmax.f32 %v7503_v49, 0.0 }
 0x419   :  { %2396 = vst.msk [vmem:[#allocation3 + $0x70] sm:$0x1] %vm2388_vm6, %v2387_v35  ;;  %2822 = vst.msk [vmem:[#allocation3 + $0x19] sm:$0x1] %vm2388_vm6, %v2814_v12  ;;  %v2863_v27 = vmax.f32 %v7549_v1, 0.0  ;;  %v2864_v46 = vmax.f32 %v7602_v0, 0.0 }
 0x41a   :  { %2823 = vst.msk [vmem:[#allocation3 + $0x29] sm:$0x1] %vm2388_vm6, %v2815_v25  ;;  %2824 = vst.msk [vmem:[#allocation3 + $0x39] sm:$0x1] %vm2388_vm6, %v2816_v23  ;;  %v2865_v59 = vmax.f32 %v7678_v47, 0.0  ;;  %v2866_v41 = vmax.f32 %v7753_v4, 0.0 }
 0x41b   :  { %2825 = vst.msk [vmem:[#allocation3 + $0x49] sm:$0x1] %vm2388_vm6, %v2817_v31  ;;  %2826 = vst.msk [vmem:[#allocation3 + $0x59] sm:$0x1] %vm2388_vm6, %v2818_v15  ;;  %v2867_v49 = vmax.f32 %v7796_v29, 0.0  ;;  %v2868_v1 = vmax.f32 %v7814_v56, 0.0 }
 0x41c   :  { %2827 = vst.msk [vmem:[#allocation3 + $0x69] sm:$0x1] %vm2388_vm6, %v2819_v30  ;;  %2828 = vst.msk [vmem:[#allocation3 + $0x79] sm:$0x1] %vm2388_vm6, %v2820_v20  ;;  %v2910_v0 = vmax.f32 %v7506_v51, 0.0  ;;  %v2911_v47 = vmax.f32 %v7552_v7, 0.0 }
 0x41d   :  { %2870 = vst.msk [vmem:[#allocation3 + $0x1a] sm:$0x1] %vm2388_vm6, %v2862_v62  ;;  %2871 = vst.msk [vmem:[#allocation3 + $0x2a] sm:$0x1] %vm2388_vm6, %v2863_v27  ;;  %v2912_v4 = vmax.f32 %v7648_v33, 0.0  ;;  %v2913_v45 = vmax.f32 %v7681_v52, 0.0 }
 0x41e   :  { %2872 = vst.msk [vmem:[#allocation3 + $0x3a] sm:$0x1] %vm2388_vm6, %v2864_v46  ;;  %2873 = vst.msk [vmem:[#allocation3 + $0x4a] sm:$0x1] %vm2388_vm6, %v2865_v59  ;;  %v4985_v29 = vld [vmem:[%s8706_s5 + $0x1e0] sm:$0xff]  ;;  %v4987_v53 = vld [vmem:[%s8706_s5 + $0x1f0] sm:$0xff] }
 0x41f   :  { %2874 = vst.msk [vmem:[#allocation3 + $0x5a] sm:$0x1] %vm2388_vm6, %v2866_v41  ;;  %2875 = vst.msk [vmem:[#allocation3 + $0x6a] sm:$0x1] %vm2388_vm6, %v2867_v49  ;;  %v2914_v51 = vmax.f32 %v7763_v18, 0.0  ;;  %v2915_v7 = vmax.f32 %v7803_v2, 0.0  ;;  %v5409_v18 = vpack.c.bf16 %v4987_v53, %v4985_v29 }
 0x420   :  { %2876 = vst.msk [vmem:[#allocation3 + $0x7a] sm:$0x1] %vm2388_vm6, %v2868_v1  ;;  %v2916_v33 = vmax.f32 %v7819_v58, 0.0  ;;  %v2970_v5 = vld [vmem:[#allocation3 + $0x71] sm:$0xff]  ;;  %v4990_v52 = vld [vmem:[%s8706_s5 + $0x208] sm:$0xff]  ;;  %v4989_v2 = vld [vmem:[%s8706_s5 + $0x200] sm:$0xff] }
 0x421   :  { %2918 = vst.msk [vmem:[#allocation3 + $0x1b] sm:$0x1] %vm2388_vm6, %v2910_v0  ;;  %2919 = vst.msk [vmem:[#allocation3 + $0x2b] sm:$0x1] %vm2388_vm6, %v2911_v47  ;;  %4976 = vmatmul.mubr.msk.f32.gmra.mrb[110].mxu1 %vm2316_vm5, %v2970_v5  ;;  %v5411_v14 = vpack.c.bf16 %v4992_v10, %v4990_v52  ;;  %v4991_v21 = vld [vmem:[%s8706_s5 + $0x210] sm:$0xff]  ;;  %v2925_v24 = vld [vmem:[#allocation3] sm:$0xff] }
 0x422   :  { %2920 = vst.msk [vmem:[#allocation3 + $0x3b] sm:$0x1] %vm2388_vm6, %v2912_v4  ;;  %2921 = vst.msk [vmem:[#allocation3 + $0x4b] sm:$0x1] %vm2388_vm6, %v2913_v45  ;;  %3227 = vmatprep.mubr.f32.mxu1 %v5875_v3  ;;  %v4996_v6 = vld [vmem:[%s8706_s5 + $0x238] sm:$0xff]  ;;  %v5413_v55 = vpack.c.bf16 %v4991_v21, %v4989_v2  ;;  %v4993_v17 = vld [vmem:[%s8706_s5 + $0x220] sm:$0xff] }
 0x423   :  { %2922 = vst.msk [vmem:[#allocation3 + $0x5b] sm:$0x1] %vm2388_vm6, %v2914_v51  ;;  %2923 = vst.msk [vmem:[#allocation3 + $0x6b] sm:$0x1] %vm2388_vm6, %v2915_v7  ;;  %v5415_v39 = vpack.c.bf16 %v4996_v6, %v4994_v50  ;;  %v2926_v22 = vld [vmem:[#allocation3 + $0x10] sm:$0xff]  ;;  %v4998_v28 = vld [vmem:[%s8706_s5 + $0x248] sm:$0xff]  ;;  %v5417_v36 = vpack.c.bf16 %v4995_v43, %v4993_v17 }
 0x424   :  { %2924 = vst.msk [vmem:[#allocation3 + $0x7b] sm:$0x1] %vm2388_vm6, %v2916_v33  ;;  %v5000_v32 = vld [vmem:[%s8706_s5 + $0x258] sm:$0xff]  ;;  %v4997_v34 = vld [vmem:[%s8706_s5 + $0x240] sm:$0xff]  ;;  %v4999_v38 = vld [vmem:[%s8706_s5 + $0x250] sm:$0xff] }
 0x425   :  { %4977 = vmatmul.mubr.msk.f32.vlgmr.msra.gmra.mrb[96].mxu1 %vm2316_vm5, %v2925_v24  ;;  %v5419_v60 = vpack.c.bf16 %v5000_v32, %v4998_v28  ;;  %v2927_v40 = vld [vmem:[#allocation3 + $0x20] sm:$0xff]  ;;  %v5002_v16 = vld [vmem:[%s8706_s5 + $0x268] sm:$0xff]  ;;  %v5004_v42 = vld [vmem:[%s8706_s5 + $0x278] sm:$0xff]  ;;  %v5421_v56 = vpack.c.bf16 %v4999_v38, %v4997_v34 }
 0x426   :  { %5410 = vmatpush1.bf16.msra.mxu1 %v5409_v18  ;;  %3233 = vmatprep.mubr.f32.mxu1 %v5875_v3  ;;  %v5423_v11 = vpack.c.bf16 %v5004_v42, %v5002_v16  ;;  %v5001_v54 = vld [vmem:[%s8706_s5 + $0x260] sm:$0xff]  ;;  %v5003_v58 = vld [vmem:[%s8706_s5 + $0x270] sm:$0xff]  ;;  %v5006_v57 = vld [vmem:[%s8706_s5 + $0x288] sm:$0xff] }
 0x427   :  { %5412 = vmatprep.subr.bf16.mxu1 %v5411_v14  ;;  %v2928_v9 = vld [vmem:[#allocation3 + $0x30] sm:$0xff]  ;;  %v5008_v37 = vld [vmem:[%s8706_s5 + $0x298] sm:$0xff]  ;;  %v5425_v48 = vpack.c.bf16 %v5003_v58, %v5001_v54  ;;  %v5005_v63 = vld [vmem:[%s8706_s5 + $0x280] sm:$0xff] }
 0x428   :  { %v5427_v61 = vpack.c.bf16 %v5008_v37, %v5006_v57  ;;  %v5007_v44 = vld [vmem:[%s8706_s5 + $0x290] sm:$0xff]  ;;  %v2929_v19 = vld [vmem:[#allocation3 + $0x40] sm:$0xff]  ;;  %v5010_v8 = vld [vmem:[%s8706_s5 + $0x2a8] sm:$0xff] }
 0x429   :  { %4978 = vmatmul.mubr.msk.f32.gmra.mrb[98].mxu1 %vm2316_vm5, %v2926_v22  ;;  %v5012_v35 = vld [vmem:[%s8706_s5 + $0x2b8] sm:$0xff]  ;;  %v5429_v12 = vpack.c.bf16 %v5007_v44, %v5005_v63  ;;  %v5009_v25 = vld [vmem:[%s8706_s5 + $0x2a0] sm:$0xff]  ;;  %v5011_v23 = vld [vmem:[%s8706_s5 + $0x2b0] sm:$0xff] }
 0x42a   :  { %5414 = vmatpush1.bf16.msra.mxu1 %v5413_v55  ;;  %3239 = vmatprep.mubr.f32.mxu1 %v5875_v3  ;;  %v5431_v13 = vpack.c.bf16 %v5012_v35, %v5010_v8  ;;  %v2930_v31 = vld [vmem:[#allocation3 + $0x50] sm:$0xff]  ;;  %v5433_v15 = vpack.c.bf16 %v5011_v23, %v5009_v25  ;;  %v5014_v30 = vld [vmem:[%s8706_s5 + $0x2c8] sm:$0xff]  ;;  %v2931_v20 = vld [vmem:[#allocation3 + $0x60] sm:$0xff] }
 0x42b   :  { %5416 = vmatprep.subr.bf16.mxu1 %v5415_v39  ;;  %v5024_v62 = vld [vmem:[%s8706_s5 + $0x2d8] sm:$0xff]  ;;  %v5026_v27 = vld [vmem:[%s8706_s5 + $0x2e8] sm:$0xff]  ;;  %v5013_v46 = vld [vmem:[%s8706_s5 + $0x2c0] sm:$0xff] }
 0x42c   :  { %v5435_v59 = vpack.c.bf16 %v5026_v27, %v5024_v62  ;;  %v5023_v41 = vld [vmem:[%s8706_s5 + $0x2d0] sm:$0xff]  ;;  %v5025_v49 = vld [vmem:[%s8706_s5 + $0x2e0] sm:$0xff]  ;;  %v5028_v0 = vld [vmem:[%s8706_s5 + $0x2f8] sm:$0xff] }
 0x42d   :  { %4979 = vmatmul.mubr.msk.f32.gmra.mrb[100].mxu1 %vm2316_vm5, %v2927_v40  ;;  %v2932_v1 = vld [vmem:[#allocation3 + $0x70] sm:$0xff]  ;;  %v5030_v47 = vld [vmem:[%s8706_s5 + $0x308] sm:$0xff]  ;;  %v5437_v4 = vpack.c.bf16 %v5025_v49, %v5023_v41  ;;  %v5029_v53 = vld [vmem:[%s8706_s5 + $0x300] sm:$0xff] }
 0x42e   :  { %5418 = vmatpush1.bf16.msra.mxu1 %v5417_v36  ;;  %3245 = vmatprep.mubr.f32.mxu1 %v5875_v3  ;;  %v5439_v45 = vpack.c.bf16 %v5030_v47, %v5028_v0  ;;  %v5027_v29 = vld [vmem:[%s8706_s5 + $0x2f0] sm:$0xff]  ;;  %v3276_v51 = vld [vmem:[#allocation3 + $0x2] sm:$0xff]  ;;  %v5032_v7 = vld [vmem:[%s8706_s5 + $0x318] sm:$0xff] }
 0x42f   :  { %5420 = vmatprep.subr.bf16.mxu1 %v5419_v60  ;;  %v5034_v33 = vld [vmem:[%s8706_s5 + $0x328] sm:$0xff]  ;;  %v5441_v5 = vpack.c.bf16 %v5029_v53, %v5027_v29  ;;  %v5031_v10 = vld [vmem:[%s8706_s5 + $0x310] sm:$0xff]  ;;  %v5033_v18 = vld [vmem:[%s8706_s5 + $0x320] sm:$0xff] }
 0x430   :  { %v5443_v52 = vpack.c.bf16 %v5034_v33, %v5032_v7  ;;  %v3277_v14 = vld [vmem:[#allocation3 + $0x12] sm:$0xff]  ;;  %v5038_v21 = vld [vmem:[%s8706_s5 + $0x348] sm:$0xff]  ;;  %v5445_v24 = vpack.c.bf16 %v5033_v18, %v5031_v10  ;;  %v5037_v55 = vld [vmem:[%s8706_s5 + $0x340] sm:$0xff] }
 0x431   :  { %4980 = vmatmul.mubr.msk.f32.gmra.mrb[102].mxu1 %vm2316_vm5, %v2928_v9  ;;  %v5036_v2 = vld [vmem:[%s8706_s5 + $0x338] sm:$0xff]  ;;  %v5035_v6 = vld [vmem:[%s8706_s5 + $0x330] sm:$0xff]  ;;  %v3278_v39 = vld [vmem:[#allocation3 + $0x22] sm:$0xff] }
 0x432   :  { %5422 = vmatpush1.bf16.msra.mxu1 %v5421_v56  ;;  %3251 = vmatprep.mubr.f32.mxu1 %v5875_v3  ;;  %v5447_v50 = vpack.c.bf16 %v5038_v21, %v5036_v2  ;;  %v5040_v17 = vld [vmem:[%s8706_s5 + $0x358] sm:$0xff]  ;;  %v5042_v43 = vld [vmem:[%s8706_s5 + $0x368] sm:$0xff]  ;;  %v5449_v22 = vpack.c.bf16 %v5037_v55, %v5035_v6  ;;  %v5039_v32 = vld [vmem:[%s8706_s5 + $0x350] sm:$0xff] }
 0x433   :  { %5424 = vmatprep.subr.bf16.mxu1 %v5423_v11  ;;  %v5451_v28 = vpack.c.bf16 %v5042_v43, %v5040_v17  ;;  %v5041_v36 = vld [vmem:[%s8706_s5 + $0x360] sm:$0xff]  ;;  %v3279_v60 = vld [vmem:[#allocation3 + $0x32] sm:$0xff]  ;;  %v5046_v38 = vld [vmem:[%s8706_s5 + $0x388] sm:$0xff] }
 0x434   :  { %v5044_v34 = vld [vmem:[%s8706_s5 + $0x378] sm:$0xff]  ;;  %v5453_v40 = vpack.c.bf16 %v5041_v36, %v5039_v32  ;;  %v5043_v42 = vld [vmem:[%s8706_s5 + $0x370] sm:$0xff]  ;;  %v5045_v56 = vld [vmem:[%s8706_s5 + $0x380] sm:$0xff] }
 0x435   :  { %4981 = vmatmul.mubr.msk.f32.gmra.mrb[104].mxu1 %vm2316_vm5, %v2929_v19  ;;  %v5455_v16 = vpack.c.bf16 %v5046_v38, %v5044_v34  ;;  %v3280_v11 = vld [vmem:[#allocation3 + $0x42] sm:$0xff]  ;;  %v5048_v54 = vld [vmem:[%s8706_s5 + $0x398] sm:$0xff]  ;;  %v5457_v9 = vpack.c.bf16 %v5045_v56, %v5043_v42  ;;  %v5047_v37 = vld [vmem:[%s8706_s5 + $0x390] sm:$0xff] }
 0x436   :  { %5426 = vmatpush1.bf16.msra.mxu1 %v5425_v48  ;;  %3257 = vmatprep.mubr.f32.mxu1 %v5875_v3  ;;  %v5050_v58 = vld [vmem:[%s8706_s5 + $0x3a8] sm:$0xff]  ;;  %v5049_v48 = vld [vmem:[%s8706_s5 + $0x3a0] sm:$0xff]  ;;  %v5052_v44 = vld [vmem:[%s8706_s5 + $0x3b8] sm:$0xff] }
 0x437   :  { %5428 = vmatprep.subr.bf16.mxu1 %v5427_v61  ;;  %v5459_v57 = vpack.c.bf16 %v5050_v58, %v5048_v54  ;;  %v3281_v61 = vld [vmem:[#allocation3 + $0x52] sm:$0xff]  ;;  %v5461_v63 = vpack.c.bf16 %v5049_v48, %v5047_v37  ;;  %v3282_v19 = vld [vmem:[#allocation3 + $0x62] sm:$0xff] }
 0x438   :  { %v5062_v8 = vld [vmem:[%s8706_s5 + $0x3c8] sm:$0xff]  ;;  %v5064_v35 = vld [vmem:[%s8706_s5 + $0x3d8] sm:$0xff]  ;;  %v5061_v25 = vld [vmem:[%s8706_s5 + $0x3c0] sm:$0xff] }
 0x439   :  { %4982 = vmatmul.mubr.msk.f32.gmra.mrb[106].mxu1 %vm2316_vm5, %v2930_v31  ;;  %v5063_v23 = vld [vmem:[%s8706_s5 + $0x3d0] sm:$0xff]  ;;  %v5065_v27 = vld [vmem:[%s8706_s5 + $0x3e0] sm:$0xff]  ;;  %v5070_v41 = vld [vmem:[%s8706_s5 + $0x408] sm:$0xff] }
 0x43a   :  { %5430 = vmatpush1.bf16.msra.mxu1 %v5429_v12  ;;  %3263 = vmatprep.mubr.f32.mxu1 %v5875_v3  ;;  %v5051_v12 = vld [vmem:[%s8706_s5 + $0x3b0] sm:$0xff]  ;;  %v5072_v49 = vld [vmem:[%s8706_s5 + $0x418] sm:$0xff]  ;;  %v5069_v47 = vld [vmem:[%s8706_s5 + $0x400] sm:$0xff] }
 0x43b   :  { %5432 = vmatprep.subr.bf16.mxu1 %v5431_v13  ;;  %v5463_v13 = vpack.c.bf16 %v5064_v35, %v5062_v8  ;;  %v3283_v31 = vld [vmem:[#allocation3 + $0x72] sm:$0xff]  ;;  %v5471_v0 = vpack.c.bf16 %v5072_v49, %v5070_v41  ;;  %v5074_v29 = vld [vmem:[%s8706_s5 + $0x428] sm:$0xff]  ;;  %v5073_v33 = vld [vmem:[%s8706_s5 + $0x420] sm:$0xff] }
 0x43c   :  { %v5076_v53 = vld [vmem:[%s8706_s5 + $0x438] sm:$0xff]  ;;  %v5078_v10 = vld [vmem:[%s8706_s5 + $0x448] sm:$0xff]  ;;  %v5077_v21 = vld [vmem:[%s8706_s5 + $0x440] sm:$0xff] }
 0x43d   :  { %4983 = vmatmul.mubr.msk.f32.gmra.mrb[108].mxu1 %vm2316_vm5, %v2931_v20  ;;  %v5465_v20 = vpack.c.bf16 %v5063_v23, %v5061_v25  ;;  %v5475_v7 = vpack.c.bf16 %v5076_v53, %v5074_v29  ;;  %v5080_v18 = vld [vmem:[%s8706_s5 + $0x458] sm:$0xff]  ;;  %v5082_v6 = vld [vmem:[%s8706_s5 + $0x468] sm:$0xff]  ;;  %v5081_v43 = vld [vmem:[%s8706_s5 + $0x460] sm:$0xff] }
 0x43e   :  { %5434 = vmatpush1.bf16.msra.mxu1 %v5433_v15  ;;  %3269 = vmatprep.mubr.f32.mxu1 %v5875_v3  ;;  %v5066_v15 = vld [vmem:[%s8706_s5 + $0x3e8] sm:$0xff]  ;;  %v5479_v2 = vpack.c.bf16 %v5080_v18, %v5078_v10  ;;  %v5084_v55 = vld [vmem:[%s8706_s5 + $0x478] sm:$0xff]  ;;  %v5085_v38 = vld [vmem:[%s8706_s5 + $0x480] sm:$0xff] }
 0x43f   :  { %3367 = vmatprep.subr.mxu1 %v5014_v30  ;;  %v5068_v30 = vld [vmem:[%s8706_s5 + $0x3f8] sm:$0xff]  ;;  %v5483_v17 = vpack.c.bf16 %v5084_v55, %v5082_v6  ;;  %v5086_v32 = vld [vmem:[%s8706_s5 + $0x488] sm:$0xff]  ;;  %v5089_v54 = vld [vmem:[%s8706_s5 + $0x4a0] sm:$0xff] }
 0x440   :  { %v5467_v62 = vpack.c.bf16 %v5068_v30, %v5066_v15  ;;  %v5088_v36 = vld [vmem:[%s8706_s5 + $0x498] sm:$0xff]  ;;  %v3474_v56 = vld [vmem:[#allocation3 + $0x63] sm:$0xff]  ;;  %v3854_v48 = vld [vmem:[%s8708_s6 + $0x10] sm:$0xff] }
 0x441   :  { %4984 = vmatmul.mubr.msk.f32.gmra.mrb[110].mxu1 %vm2316_vm5, %v2932_v1  ;;  %v5487_v34 = vpack.c.bf16 %v5088_v36, %v5086_v32  ;;  %v3852_v58 = vld [vmem:[%s8708_s6] sm:$0xff]  ;;  %v3857_v8 = vld [vmem:[%s8708_s6 + $0x28] sm:$0xff]  ;;  %v3661_v35 = vld [vmem:[#allocation3 + $0x14] sm:$0xff] }
 0x442   :  { %3368 = vmatpush1.msra.mxu1 %v5013_v46  ;;  %3403 = vmatprep.mubr.f32.mxu1 %v5875_v3  ;;  %v5067_v46 = vld [vmem:[%s8706_s5 + $0x3f0] sm:$0xff]  ;;  %v3859_v25 = vld [vmem:[%s8708_s6 + $0x38] sm:$0xff]  ;;  %v3662_v23 = vld [vmem:[#allocation3 + $0x24] sm:$0xff] }
 0x443   :  { %5436 = vmatprep.subr.bf16.mxu1 %v5435_v59  ;;  %v3468_v59 = vld [vmem:[#allocation3 + $0x3] sm:$0xff]  ;;  %v5469_v1 = vpack.c.bf16 %v5067_v46, %v5065_v27  ;;  %v3862_v27 = vld [vmem:[%s8708_s6 + $0x50] sm:$0xff]  ;;  %v3863_v46 = vld [vmem:[%s8708_s6 + $0x58] sm:$0xff] }
 0x444   :  { %v3860_v15 = vld [vmem:[%s8708_s6 + $0x40] sm:$0xff]  ;;  %v3861_v30 = vld [vmem:[%s8708_s6 + $0x48] sm:$0xff]  ;;  %v5507_v41 = vpack.c.bf16 %v3863_v46, %v3862_v27  ;;  %v3871_v10 = vld [vmem:[%s8708_s6 + $0x98] sm:$0xff] }
 0x445   :  { %5015 = vmatmul.mubr.msk.f32.vlgmr.msra.gmra.mrb[96].mxu1 %vm2316_vm5, %v3276_v51  ;;  %v3864_v49 = vld [vmem:[%s8708_s6 + $0x60] sm:$0xff]  ;;  %v4004_v6 = vld [vmem:[%s8709_s7 + $0x10] sm:$0xff]  ;;  %v4005_v55 = vld [vmem:[%s8709_s7 + $0x18] sm:$0xff] }
 0x446   :  { %5438 = vmatpush1.bf16.msra.mxu1 %v5437_v4  ;;  %3409 = vmatprep.mubr.f32.mxu1 %v5875_v3  ;;  %v5071_v4 = vld [vmem:[%s8706_s5 + $0x410] sm:$0xff]  ;;  %v3666_v29 = vld [vmem:[#allocation3 + $0x64] sm:$0xff]  ;;  %v4021_v46 = vld [vmem:[%s8709_s7 + $0x98] sm:$0xff] }
 0x447   :  { %5440 = vmatprep.subr.bf16.mxu1 %v5439_v45  ;;  %v3469_v45 = vld [vmem:[#allocation3 + $0x13] sm:$0xff]  ;;  %v5473_v51 = vpack.c.bf16 %v5071_v4, %v5069_v47 }
 0x448   :  { %v3866_v4 = vld [vmem:[%s8708_s6 + $0x70] sm:$0xff] }
 0x449   :  { %5016 = vmatmul.mubr.msk.f32.gmra.mrb[98].mxu1 %vm2316_vm5, %v3277_v14  ;;  %v4020_v27 = vld [vmem:[%s8709_s7 + $0x90] sm:$0xff] }
 0x44a   :  { %5442 = vmatpush1.bf16.msra.mxu1 %v5441_v5  ;;  %3415 = vmatprep.mubr.f32.mxu1 %v5875_v3  ;;  %v5075_v5 = vld [vmem:[%s8706_s5 + $0x430] sm:$0xff] }
 0x44b   :  { %5444 = vmatprep.subr.bf16.mxu1 %v5443_v52  ;;  %v3470_v52 = vld [vmem:[#allocation3 + $0x23] sm:$0xff]  ;;  %v5477_v14 = vpack.c.bf16 %v5075_v5, %v5073_v33  ;;  %v3667_v33 = vld [vmem:[#allocation3 + $0x74] sm:$0xff] }
 0x44d   :  { %5017 = vmatmul.mubr.msk.f32.gmra.mrb[100].mxu1 %vm2316_vm5, %v3278_v39 }
 0x44e   :  { %5446 = vmatpush1.bf16.msra.mxu1 %v5445_v24  ;;  %3421 = vmatprep.mubr.f32.mxu1 %v5875_v3  ;;  %v5079_v24 = vld [vmem:[%s8706_s5 + $0x450] sm:$0xff] }
 0x44f   :  { %5448 = vmatprep.subr.bf16.mxu1 %v5447_v50  ;;  %v3471_v50 = vld [vmem:[#allocation3 + $0x33] sm:$0xff]  ;;  %v5481_v39 = vpack.c.bf16 %v5079_v24, %v5077_v21 }
 0x451   :  { %5018 = vmatmul.mubr.msk.f32.gmra.mrb[102].mxu1 %vm2316_vm5, %v3279_v60 }
 0x452   :  { %5450 = vmatpush1.bf16.msra.mxu1 %v5449_v22  ;;  %3427 = vmatprep.mubr.f32.mxu1 %v5875_v3  ;;  %v5083_v22 = vld [vmem:[%s8706_s5 + $0x470] sm:$0xff] }
 0x453   :  { %5452 = vmatprep.subr.bf16.mxu1 %v5451_v28  ;;  %v3472_v28 = vld [vmem:[#allocation3 + $0x43] sm:$0xff]  ;;  %v5485_v60 = vpack.c.bf16 %v5083_v22, %v5081_v43 }
 0x454   :  { %v4006_v22 = vld [vmem:[%s8709_s7 + $0x20] sm:$0xff] }
 0x455   :  { %5019 = vmatmul.mubr.msk.f32.gmra.mrb[104].mxu1 %vm2316_vm5, %v3280_v11  ;;  %v5090_v11 = vld [vmem:[%s8706_s5 + $0x4a8] sm:$0xff] }
 0x456   :  { %5454 = vmatpush1.bf16.msra.mxu1 %v5453_v40  ;;  %3433 = vmatprep.mubr.f32.mxu1 %v5875_v3  ;;  %v5087_v40 = vld [vmem:[%s8706_s5 + $0x490] sm:$0xff] }
 0x457   :  { %5456 = vmatprep.subr.bf16.mxu1 %v5455_v16  ;;  %v3473_v16 = vld [vmem:[#allocation3 + $0x53] sm:$0xff]  ;;  %v5489_v42 = vpack.c.bf16 %v5087_v40, %v5085_v38 }
 0x458   :  { %v4009_v38 = vld [vmem:[%s8709_s7 + $0x38] sm:$0xff] }
 0x459   :  { %5020 = vmatmul.mubr.msk.f32.gmra.mrb[106].mxu1 %vm2316_vm5, %v3281_v61  ;;  %v3855_v61 = vld [vmem:[%s8708_s6 + $0x18] sm:$0xff] }
 0x45a   :  { %5458 = vmatpush1.bf16.msra.mxu1 %v5457_v9  ;;  %3439 = vmatprep.mubr.f32.mxu1 %v5875_v3  ;;  %v3853_v9 = vld [vmem:[%s8708_s6 + $0x8] sm:$0xff] }
 0x45b   :  { %5460 = vmatprep.subr.bf16.mxu1 %v5459_v57  ;;  %v3475_v57 = vld [vmem:[#allocation3 + $0x73] sm:$0xff]  ;;  %v5492_v37 = vpack.c.bf16 %v3853_v9, %v3852_v58 }
 0x45d   :  { %5021 = vmatmul.mubr.msk.f32.gmra.mrb[108].mxu1 %vm2316_vm5, %v3282_v19  ;;  %v3856_v19 = vld [vmem:[%s8708_s6 + $0x20] sm:$0xff] }
 0x45e   :  { %5462 = vmatpush1.bf16.msra.mxu1 %v5461_v63  ;;  %3445 = vmatprep.mubr.f32.mxu1 %v5875_v3  ;;  %v3660_v63 = vld [vmem:[#allocation3 + $0x4] sm:$0xff] }
 0x45f   :  { %3559 = vmatprep.subr.mxu1 %v5052_v44  ;;  %v5495_v44 = vpack.c.bf16 %v3855_v61, %v3854_v48 }
 0x461   :  { %5022 = vmatmul.mubr.msk.f32.gmra.mrb[110].mxu1 %vm2316_vm5, %v3283_v31 }
 0x462   :  { %3560 = vmatpush1.msra.mxu1 %v5051_v12  ;;  %3595 = vmatprep.mubr.f32.mxu1 %v5875_v3  ;;  %v5498_v12 = vpack.c.bf16 %v3857_v8, %v3856_v19  ;;  %v4015_v19 = vld [vmem:[%s8709_s7 + $0x68] sm:$0xff] }
 0x463   :  { %5464 = vmatprep.subr.bf16.mxu1 %v5463_v13  ;;  %v3858_v13 = vld [vmem:[%s8708_s6 + $0x30] sm:$0xff] }
 0x464   :  { %v5501_v31 = vpack.c.bf16 %v3859_v25, %v3858_v13  ;;  %v4016_v13 = vld [vmem:[%s8709_s7 + $0x70] sm:$0xff]  ;;  %v4017_v25 = vld [vmem:[%s8709_s7 + $0x78] sm:$0xff] }
 0x465   :  { %5053 = vmatmul.mubr.msk.f32.vlgmr.msra.gmra.mrb[96].mxu1 %vm2316_vm5, %v3468_v59  ;;  %v3664_v59 = vld [vmem:[#allocation3 + $0x44] sm:$0xff] }
 0x466   :  { %5466 = vmatpush1.bf16.msra.mxu1 %v5465_v20  ;;  %3601 = vmatprep.mubr.f32.mxu1 %v5875_v3  ;;  %v3663_v20 = vld [vmem:[#allocation3 + $0x34] sm:$0xff] }
 0x467   :  { %5468 = vmatprep.subr.bf16.mxu1 %v5467_v62  ;;  %v5504_v62 = vpack.c.bf16 %v3861_v30, %v3860_v15  ;;  %v4018_v30 = vld [vmem:[%s8709_s7 + $0x80] sm:$0xff] }
 0x469   :  { %5054 = vmatmul.mubr.msk.f32.gmra.mrb[98].mxu1 %vm2316_vm5, %v3469_v45  ;;  %v3867_v45 = vld [vmem:[%s8708_s6 + $0x78] sm:$0xff] }
 0x46a   :  { %5470 = vmatpush1.bf16.msra.mxu1 %v5469_v1  ;;  %3607 = vmatprep.mubr.f32.mxu1 %v5875_v3  ;;  %v3865_v1 = vld [vmem:[%s8708_s6 + $0x68] sm:$0xff]  ;;  %v5513_v53 = vpack.c.bf16 %v3867_v45, %v3866_v4  ;;  %v4447_v4 = vld [vmem:[%s8710_s9 + $0x90] sm:$0xff]  ;;  %v4448_v45 = vld [vmem:[%s8710_s9 + $0x98] sm:$0xff] }
 0x46b   :  { %5472 = vmatprep.subr.bf16.mxu1 %v5471_v0  ;;  %v3665_v0 = vld [vmem:[#allocation3 + $0x54] sm:$0xff]  ;;  %v5510_v47 = vpack.c.bf16 %v3865_v1, %v3864_v49  ;;  %v4446_v49 = vld [vmem:[%s8710_s9 + $0x88] sm:$0xff]  ;;  %v4429_v1 = vld [vmem:[%s8710_s9] sm:$0xff] }
 0x46d   :  { %5055 = vmatmul.mubr.msk.f32.gmra.mrb[100].mxu1 %vm2316_vm5, %v3470_v52  ;;  %v3870_v52 = vld [vmem:[%s8708_s6 + $0x90] sm:$0xff] }
 0x46e   :  { %5474 = vmatpush1.bf16.msra.mxu1 %v5473_v51  ;;  %3613 = vmatprep.mubr.f32.mxu1 %v5875_v3  ;;  %v3868_v51 = vld [vmem:[%s8708_s6 + $0x80] sm:$0xff]  ;;  %v5519_v18 = vpack.c.bf16 %v3871_v10, %v3870_v52 }
 0x46f   :  { %5476 = vmatprep.subr.bf16.mxu1 %v5475_v7  ;;  %v3869_v7 = vld [vmem:[%s8708_s6 + $0x88] sm:$0xff] }
 0x470   :  { %v5516_v5 = vpack.c.bf16 %v3869_v7, %v3868_v51  ;;  %v4431_v51 = vld [vmem:[%s8710_s9 + $0x10] sm:$0xff]  ;;  %v4432_v7 = vld [vmem:[%s8710_s9 + $0x18] sm:$0xff] }
 0x471   :  { %5056 = vmatmul.mubr.msk.f32.gmra.mrb[102].mxu1 %vm2316_vm5, %v3471_v50  ;;  %v5557_v52 = vpack.c.bf16 %v4432_v7, %v4431_v51 }
 0x472   :  { %5478 = vmatpush1.bf16.msra.mxu1 %v5477_v14  ;;  %3619 = vmatprep.mubr.f32.mxu1 %v5875_v3  ;;  %v4002_v14 = vld [vmem:[%s8709_s7] sm:$0xff] }
 0x473   :  { %5480 = vmatprep.subr.bf16.mxu1 %v5479_v2  ;;  %v4003_v2 = vld [vmem:[%s8709_s7 + $0x8] sm:$0xff] }
 0x474   :  { %v5522_v24 = vpack.c.bf16 %v4003_v2, %v4002_v14  ;;  %v4434_v14 = vld [vmem:[%s8710_s9 + $0x28] sm:$0xff]  ;;  %v4451_v2 = vld [vmem:[%s8710_s9 + $0xb0] sm:$0xff] }
 0x475   :  { %5057 = vmatmul.mubr.msk.f32.gmra.mrb[104].mxu1 %vm2316_vm5, %v3472_v28  ;;  %v4007_v28 = vld [vmem:[%s8709_s7 + $0x28] sm:$0xff] }
 0x476   :  { %5482 = vmatpush1.bf16.msra.mxu1 %v5481_v39  ;;  %3625 = vmatprep.mubr.f32.mxu1 %v5875_v3  ;;  %v5528_v36 = vpack.c.bf16 %v4007_v28, %v4006_v22  ;;  %v4454_v28 = vld [vmem:[%s8710_s9 + $0xc8] sm:$0xff] }
 0x477   :  { %5484 = vmatprep.subr.bf16.mxu1 %v5483_v17  ;;  %v5525_v17 = vpack.c.bf16 %v4005_v55, %v4004_v6  ;;  %v4462_v6 = vld [vmem:[%s8710_s9 + $0x108] sm:$0xff] }
 0x479   :  { %5058 = vmatmul.mubr.msk.f32.gmra.mrb[106].mxu1 %vm2316_vm5, %v3473_v16 }
 0x47a   :  { %5486 = vmatpush1.bf16.msra.mxu1 %v5485_v60  ;;  %3631 = vmatprep.mubr.f32.mxu1 %v5875_v3 }
 0x47b   :  { %5488 = vmatprep.subr.bf16.mxu1 %v5487_v34  ;;  %v4008_v34 = vld [vmem:[%s8709_s7 + $0x30] sm:$0xff] }
 0x47c   :  { %v5531_v16 = vpack.c.bf16 %v4009_v38, %v4008_v34 }
 0x47d   :  { %5059 = vmatmul.mubr.msk.f32.gmra.mrb[108].mxu1 %vm2316_vm5, %v3474_v56  ;;  %v4010_v56 = vld [vmem:[%s8709_s7 + $0x40] sm:$0xff] }
 0x47e   :  { %5490 = vmatpush1.bf16.msra.mxu1 %v5489_v42  ;;  %3637 = vmatprep.mubr.f32.mxu1 %v5875_v3 }
 0x47f   :  { %3751 = vmatprep.subr.mxu1 %v5090_v11  ;;  %v4011_v11 = vld [vmem:[%s8709_s7 + $0x48] sm:$0xff] }
 0x480   :  { %v5534_v58 = vpack.c.bf16 %v4011_v11, %v4010_v56  ;;  %v4456_v56 = vld [vmem:[%s8710_s9 + $0xd8] sm:$0xff] }
 0x481   :  { %5060 = vmatmul.mubr.msk.f32.gmra.mrb[110].mxu1 %vm2316_vm5, %v3475_v57  ;;  %v4012_v57 = vld [vmem:[%s8709_s7 + $0x50] sm:$0xff] }
 0x482   :  { %3752 = vmatpush1.msra.mxu1 %v5089_v54  ;;  %3787 = vmatprep.mubr.f32.mxu1 %v5875_v3 }
 0x483   :  { %5491 = vmatprep.subr.bf16.mxu1 %v5877_v26 }
 0x485   :  { %5091 = vmatmul.mubr.msk.f32.vlgmr.msra.gmra.mrb[96].mxu1 %vm2316_vm5, %v3660_v63 }
 0x486   :  { %3793 = vmatprep.mubr.f32.mxu1 %v5875_v3  ;;  %5493 = vmatpush1.bf16.msra.mxu1 %v5492_v37  ;;  %v4013_v37 = vld [vmem:[%s8709_s7 + $0x58] sm:$0xff] }
 0x487   :  { %5494 = vmatprep.subr.bf16.mxu1 %v5877_v26  ;;  %v5537_v61 = vpack.c.bf16 %v4013_v37, %v4012_v57  ;;  %v4457_v57 = vld [vmem:[%s8710_s9 + $0xe0] sm:$0xff]  ;;  %v4458_v37 = vld [vmem:[%s8710_s9 + $0xe8] sm:$0xff] }
 0x489   :  { %5092 = vmatmul.mubr.msk.f32.gmra.mrb[98].mxu1 %vm2316_vm5, %v3661_v35 }
 0x48a   :  { %3799 = vmatprep.mubr.f32.mxu1 %v5875_v3  ;;  %5496 = vmatpush1.bf16.msra.mxu1 %v5495_v44  ;;  %v4014_v44 = vld [vmem:[%s8709_s7 + $0x60] sm:$0xff] }
 0x48b   :  { %5497 = vmatprep.subr.bf16.mxu1 %v5877_v26  ;;  %v5540_v35 = vpack.c.bf16 %v4015_v19, %v4014_v44  ;;  %v4442_v44 = vld [vmem:[%s8710_s9 + $0x68] sm:$0xff] }
 0x48d   :  { %5093 = vmatmul.mubr.msk.f32.gmra.mrb[100].mxu1 %vm2316_vm5, %v3662_v23 }
 0x48e   :  { %3805 = vmatprep.mubr.f32.mxu1 %v5875_v3  ;;  %5499 = vmatpush1.bf16.msra.mxu1 %v5498_v12 }
 0x48f   :  { %5500 = vmatprep.subr.bf16.mxu1 %v5877_v26 }
 0x491   :  { %5094 = vmatmul.mubr.msk.f32.gmra.mrb[102].mxu1 %vm2316_vm5, %v3663_v20  ;;  %v4019_v20 = vld [vmem:[%s8709_s7 + $0x88] sm:$0xff] }
 0x492   :  { %3811 = vmatprep.mubr.f32.mxu1 %v5875_v3  ;;  %5502 = vmatpush1.bf16.msra.mxu1 %v5501_v31  ;;  %v5543_v31 = vpack.c.bf16 %v4017_v25, %v4016_v13 }
 0x493   :  { %5503 = vmatprep.subr.bf16.mxu1 %v5877_v26 }
 0x495   :  { %5095 = vmatmul.mubr.msk.f32.gmra.mrb[104].mxu1 %vm2316_vm5, %v3664_v59  ;;  %v5549_v59 = vpack.c.bf16 %v4021_v46, %v4020_v27 }
 0x496   :  { %3817 = vmatprep.mubr.f32.mxu1 %v5875_v3  ;;  %5505 = vmatpush1.bf16.msra.mxu1 %v5504_v62  ;;  %v5546_v62 = vpack.c.bf16 %v4019_v20, %v4018_v30 }
 0x497   :  { %5506 = vmatprep.subr.bf16.mxu1 %v5877_v26 }
 0x499   :  { %5096 = vmatmul.mubr.msk.f32.gmra.mrb[106].mxu1 %vm2316_vm5, %v3665_v0 }
 0x49a   :  { %3823 = vmatprep.mubr.f32.mxu1 %v5875_v3  ;;  %5508 = vmatpush1.bf16.msra.mxu1 %v5507_v41  ;;  %v4445_v41 = vld [vmem:[%s8710_s9 + $0x80] sm:$0xff] }
 0x49b   :  { %5509 = vmatprep.subr.bf16.mxu1 %v5877_v26  ;;  %v5551_v0 = vpack.c.bf16 %v4446_v49, %v4445_v41 }
 0x49d   :  { %5097 = vmatmul.mubr.msk.f32.gmra.mrb[108].mxu1 %vm2316_vm5, %v3666_v29  ;;  %5552 = vmatprep.subr.bf16.mxu0 %v5551_v0 }
 0x49e   :  { %3829 = vmatprep.mubr.f32.mxu1 %v5875_v3  ;;  %5511 = vmatpush1.bf16.msra.mxu1 %v5510_v47  ;;  %v4430_v47 = vld [vmem:[%s8710_s9 + $0x8] sm:$0xff] }
 0x49f   :  { %5512 = vmatprep.subr.bf16.mxu1 %v5877_v26  ;;  %v5553_v29 = vpack.c.bf16 %v4430_v47, %v4429_v1 }
 0x4a1   :  { %5098 = vmatmul.mubr.msk.f32.gmra.mrb[110].mxu1 %vm2316_vm5, %v3667_v33  ;;  %v4449_v33 = vld [vmem:[%s8710_s9 + $0xa0] sm:$0xff]  ;;  %5554 = vmatpush3.bf16.msra.mxu0 %v5553_v29 }
 0x4a2   :  { %5514 = vmatpush1.bf16.msra.mxu1 %v5513_v53  ;;  %v5555_v53 = vpack.c.bf16 %v4448_v45, %v4447_v4 }
 0x4a3   :  { %5515 = vmatprep.subr.bf16.mxu1 %v5877_v26 }
 0x4a4   :  { %5556 = vmatprep.subr.bf16.mxu0 %v5555_v53 }
 0x4a5   :  { %5558 = vmatpush3.bf16.msra.mxu0 %v5557_v52 }
 0x4a6   :  { %5517 = vmatpush1.bf16.msra.mxu1 %v5516_v5  ;;  %v4450_v5 = vld [vmem:[%s8710_s9 + $0xa8] sm:$0xff] }
 0x4a7   :  { %5518 = vmatprep.subr.bf16.mxu1 %v5877_v26  ;;  %v5559_v10 = vpack.c.bf16 %v4450_v5, %v4449_v33  ;;  %v8505_v33 = vld [vmem:[%s8711_s8] ss:$0 sm:$0xff] }
 0x4a9   :  { %5560 = vmatprep.subr.bf16.mxu0 %v5559_v10 }
 0x4aa   :  { %5520 = vmatpush1.bf16.msra.mxu1 %v5519_v18  ;;  %v4433_v18 = vld [vmem:[%s8710_s9 + $0x20] sm:$0xff] }
 0x4ab   :  { %5521 = vmatprep.subr.bf16.mxu1 %v5877_v26 }
 0x558   :  { %v8290_v21 = vpop.f32.mrb[96].mxu1 }
 0x559   :  { %v8292_v50 = vpop.f32.mrb[97].mxu1 }
 0x55a   :  { %5099 = vmatprep.mubr.msk.f32.mxu1 %vm3872_vm7, %v8292_v50 }
 0x55b   :  { %3962 = vmatmul.mubr.f32.vlgmr.msra.gmra.mrb[112].mxu1 %v8290_v21 }
 0x55c   :  { %5523 = vmatpush1.bf16.msra.mxu1 %v5522_v24  ;;  %v8303_v39 = vpop.f32.mrb[98].mxu1  ;;  %v5561_v24 = vpack.c.bf16 %v4434_v14, %v4433_v18 }
 0x55d   :  { %v8305_v43 = vpop.f32.mrb[99].mxu1  ;;  %5524 = vmatprep.subr.bf16.mxu1 %v5877_v26 }
 0x55e   :  { %5100 = vmatprep.mubr.msk.f32.mxu1 %vm3872_vm7, %v8305_v43  ;;  %5562 = vmatpush3.bf16.msra.mxu0 %v5561_v24 }
 0x55f   :  { %3967 = vmatmul.mubr.f32.gmra.mrb[114].mxu1 %v8303_v39 }
 0x560   :  { %5526 = vmatpush1.bf16.msra.mxu1 %v5525_v17  ;;  %v8317_v32 = vpop.f32.mrb[100].mxu1  ;;  %v4436_v17 = vld [vmem:[%s8710_s9 + $0x38] sm:$0xff] }
 0x561   :  { %v8319_v60 = vpop.f32.mrb[101].mxu1  ;;  %5527 = vmatprep.subr.bf16.mxu1 %v5877_v26 }
 0x562   :  { %5101 = vmatprep.mubr.msk.f32.mxu1 %vm3872_vm7, %v8319_v60 }
 0x563   :  { %3972 = vmatmul.mubr.f32.gmra.mrb[116].mxu1 %v8317_v32 }
 0x564   :  { %5529 = vmatpush1.bf16.msra.mxu1 %v5528_v36  ;;  %v3807_v40 = vpop.f32.mrb[102].mxu1  ;;  %v4464_v36 = vld [vmem:[%s8710_s9 + $0x118] sm:$0xff] }
 0x565   :  { %v3809_v42 = vpop.f32.mrb[103].mxu1  ;;  %5530 = vmatprep.subr.bf16.mxu1 %v5877_v26 }
 0x566   :  { %5102 = vmatprep.mubr.msk.f32.mxu1 %vm3872_vm7, %v3809_v42 }
 0x567   :  { %3977 = vmatmul.mubr.f32.gmra.mrb[118].mxu1 %v3807_v40 }
 0x568   :  { %5532 = vmatpush1.bf16.msra.mxu1 %v5531_v16  ;;  %v3813_v54 = vpop.f32.mrb[104].mxu1  ;;  %v4438_v16 = vld [vmem:[%s8710_s9 + $0x48] sm:$0xff] }
 0x569   :  { %v3815_v9 = vpop.f32.mrb[105].mxu1  ;;  %5533 = vmatprep.subr.bf16.mxu1 %v5877_v26 }
 0x56a   :  { %5103 = vmatprep.mubr.msk.f32.mxu1 %vm3872_vm7, %v3815_v9 }
 0x56b   :  { %3982 = vmatmul.mubr.f32.gmra.mrb[120].mxu1 %v3813_v54 }
 0x56c   :  { %5535 = vmatpush1.bf16.msra.mxu1 %v5534_v58  ;;  %v3819_v48 = vpop.f32.mrb[106].mxu1  ;;  %v4439_v58 = vld [vmem:[%s8710_s9 + $0x50] sm:$0xff] }
 0x56d   :  { %v3821_v63 = vpop.f32.mrb[107].mxu1  ;;  %5536 = vmatprep.subr.bf16.mxu1 %v5877_v26 }
 0x56e   :  { %5104 = vmatprep.mubr.msk.f32.mxu1 %vm3872_vm7, %v3821_v63 }
 0x56f   :  { %3987 = vmatmul.mubr.f32.gmra.mrb[122].mxu1 %v3819_v48 }
 0x570   :  { %5538 = vmatpush1.bf16.msra.mxu1 %v5537_v61  ;;  %v3825_v8 = vpop.f32.mrb[108].mxu1  ;;  %v5575_v61 = vpack.c.bf16 %v4458_v37, %v4457_v57 }
 0x571   :  { %v3827_v12 = vpop.f32.mrb[109].mxu1  ;;  %5539 = vmatprep.subr.bf16.mxu1 %v5877_v26 }
 0x572   :  { %5105 = vmatprep.mubr.msk.f32.mxu1 %vm3872_vm7, %v3827_v12 }
 0x573   :  { %3992 = vmatmul.mubr.f32.gmra.mrb[124].mxu1 %v3825_v8 }
 0x574   :  { %5541 = vmatpush1.bf16.msra.mxu1 %v5540_v35  ;;  %v3831_v23 = vpop.f32.mrb[110].mxu1 }
 0x575   :  { %v3833_v15 = vpop.f32.mrb[111].mxu1  ;;  %5542 = vmatprep.subr.bf16.mxu1 %v5877_v26 }
 0x576   :  { %5106 = vmatprep.mubr.msk.f32.mxu1 %vm3872_vm7, %v3833_v15 }
 0x577   :  { %3997 = vmatmul.mubr.f32.gmra.mrb[126].mxu1 %v3831_v23 }
 0x578   :  { %5544 = vmatpush1.bf16.msra.mxu1 %v5543_v31  ;;  %5107 = vmatprep.mubr.msk.f32.mxu1 %vm3872_vm7, %v8292_v50  ;;  %v4461_v50 = vld [vmem:[%s8710_s9 + $0x100] sm:$0xff] }
 0x579   :  { %5545 = vmatprep.subr.bf16.mxu1 %v5877_v26  ;;  %v5584_v22 = vpack.c.bf16 %v4462_v6, %v4461_v50 }
 0x57c   :  { %5547 = vmatpush1.bf16.msra.mxu1 %v5546_v62 }
 0x57d   :  { %5548 = vmatprep.subr.bf16.mxu1 %v5877_v26 }
 0x580   :  { %5550 = vmatpush1.bf16.msra.mxu1 %v5549_v59 }
 0x581   :  { %5583 = vmatprep.subr.bf16.mxu1 %v5877_v26 }
 0x583   :  { %4087 = vmatmul.mubr.f32.vlgmr.msra.gmra.mrb[128].mxu1 %v8290_v21  ;;  %v4452_v21 = vld [vmem:[%s8710_s9 + $0xb8] sm:$0xff] }
 0x584   :  { %5108 = vmatprep.mubr.msk.f32.mxu1 %vm3872_vm7, %v8305_v43  ;;  %v5563_v55 = vpack.c.bf16 %v4452_v21, %v4451_v2  ;;  %v4453_v43 = vld [vmem:[%s8710_s9 + $0xc0] sm:$0xff]  ;;  %5585 = vmatpush3.bf16.msra.mxu1 %v5584_v22 }
 0x585   :  { %5586 = vmatprep.subr.bf16.mxu1 %v5877_v26  ;;  %v5567_v38 = vpack.c.bf16 %v4454_v28, %v4453_v43 }
 0x586   :  { %5564 = vmatprep.subr.bf16.mxu0 %v5563_v55 }
 0x587   :  { %4092 = vmatmul.mubr.f32.gmra.mrb[130].mxu1 %v8303_v39  ;;  %v4435_v39 = vld [vmem:[%s8710_s9 + $0x30] sm:$0xff] }
 0x588   :  { %5109 = vmatprep.mubr.msk.f32.mxu1 %vm3872_vm7, %v8319_v60  ;;  %v5565_v34 = vpack.c.bf16 %v4436_v17, %v4435_v39 }
 0x58a   :  { %5566 = vmatpush3.bf16.msra.mxu0 %v5565_v34 }
 0x58b   :  { %4097 = vmatmul.mubr.f32.gmra.mrb[132].mxu1 %v8317_v32  ;;  %v4463_v32 = vld [vmem:[%s8710_s9 + $0x110] sm:$0xff]  ;;  %5568 = vmatprep.subr.bf16.mxu0 %v5567_v38 }
 0x58c   :  { %5110 = vmatprep.mubr.msk.f32.mxu1 %vm3872_vm7, %v3809_v42  ;;  %v5587_v60 = vpack.c.bf16 %v4464_v36, %v4463_v32  ;;  %v4455_v42 = vld [vmem:[%s8710_s9 + $0xd0] sm:$0xff] }
 0x58e   :  { %5588 = vmatpush3.bf16.msra.mxu1 %v5587_v60 }
 0x58f   :  { %4102 = vmatmul.mubr.f32.gmra.mrb[134].mxu1 %v3807_v40  ;;  %v4437_v40 = vld [vmem:[%s8710_s9 + $0x40] sm:$0xff]  ;;  %5589 = vmatprep.subr.bf16.mxu1 %v5877_v26 }
 0x590   :  { %5111 = vmatprep.mubr.msk.f32.mxu1 %vm3872_vm7, %v3815_v9  ;;  %v5569_v11 = vpack.c.bf16 %v4438_v16, %v4437_v40  ;;  %v4440_v9 = vld [vmem:[%s8710_s9 + $0x58] sm:$0xff] }
 0x592   :  { %5570 = vmatpush3.bf16.msra.mxu0 %v5569_v11 }
 0x593   :  { %4107 = vmatmul.mubr.f32.gmra.mrb[136].mxu1 %v3813_v54  ;;  %v5571_v54 = vpack.c.bf16 %v4456_v56, %v4455_v42 }
 0x594   :  { %5112 = vmatprep.mubr.msk.f32.mxu1 %vm3872_vm7, %v3821_v63  ;;  %v4441_v63 = vld [vmem:[%s8710_s9 + $0x60] sm:$0xff] }
 0x595   :  { %5572 = vmatprep.subr.bf16.mxu0 %v5571_v54  ;;  %v5577_v19 = vpack.c.bf16 %v4442_v44, %v4441_v63 }
 0x597   :  { %4112 = vmatmul.mubr.f32.gmra.mrb[138].mxu1 %v3819_v48  ;;  %v5573_v48 = vpack.c.bf16 %v4440_v9, %v4439_v58 }
 0x598   :  { %5113 = vmatprep.mubr.msk.f32.mxu1 %vm3872_vm7, %v3827_v12 }
 0x599   :  { %5574 = vmatpush3.bf16.msra.mxu0 %v5573_v48 }
 0x59a   :  { %5576 = vmatprep.subr.bf16.mxu0 %v5575_v61 }
 0x59b   :  { %4117 = vmatmul.mubr.f32.gmra.mrb[140].mxu1 %v3825_v8 }
 0x59c   :  { %5114 = vmatprep.mubr.msk.f32.mxu1 %vm3872_vm7, %v3833_v15 }
 0x59d   :  { %5578 = vmatpush3.bf16.msra.mxu0 %v5577_v19 }
 0x59f   :  { %4122 = vmatmul.mubr.f32.gmra.mrb[142].mxu1 %v3831_v23 }
 0x5a0   :  { %5189 = vmatprep.mubr.msk.f32.mxu1 %vm5881_vm0, %v5875_v3 }
 0x62e   :  { %v3963_v8 = vpop.f32.mrb[112].mxu1 }
 0x62f   :  { %v3965_v35 = vpop.f32.mrb[113].mxu1 }
 0x632   :  { %v3968_v12 = vpop.f32.mrb[114].mxu1 }
 0x633   :  { %v3970_v13 = vpop.f32.mrb[115].mxu1 }
 0x636   :  { %v3973_v25 = vpop.f32.mrb[116].mxu1 }
 0x637   :  { %v3975_v23 = vpop.f32.mrb[117].mxu1 }
 0x63a   :  { %v3978_v31 = vpop.f32.mrb[118].mxu1 }
 0x63b   :  { %v3980_v15 = vpop.f32.mrb[119].mxu1 }
 0x63e   :  { %v8492_v30 = vpop.f32.mrb[120].mxu1 }
 0x63f   :  { %v3985_v20 = vpop.f32.mrb[121].mxu1 }
 0x642   :  { %v8494_v62 = vpop.f32.mrb[122].mxu1 }
 0x643   :  { %v3990_v27 = vpop.f32.mrb[123].mxu1 }
 0x646   :  { %v8496_v46 = vpop.f32.mrb[124].mxu1 }
 0x647   :  { %v3995_v59 = vpop.f32.mrb[125].mxu1 }
 0x64a   :  { %v8498_v41 = vpop.f32.mrb[126].mxu1 }
 0x64b   :  { %v4000_v49 = vpop.f32.mrb[127].mxu1 }
 0x656   :  { %v4088_v1 = vpop.f32.mrb[128].mxu1 }
 0x657   :  { %v4127_v0 = vmax.f32 %v3963_v8, %v4088_v1  ;;  %v4090_v47 = vpop.f32.mrb[129].mxu1 }
 0x659   :  { %4136 = vst.msk [vmem:[#allocation4] sm:$0xff] %vm4135_vm8, %v4127_v0 }
 0x65a   :  { %v4093_v4 = vpop.f32.mrb[130].mxu1 }
 0x65b   :  { %v4128_v45 = vmax.f32 %v3968_v12, %v4093_v4  ;;  %v4095_v29 = vpop.f32.mrb[131].mxu1 }
 0x65d   :  { %4137 = vst.msk [vmem:[#allocation4 + $0x8] sm:$0xff] %vm4135_vm8, %v4128_v45 }
 0x65e   :  { %v4098_v53 = vpop.f32.mrb[132].mxu1 }
 0x65f   :  { %v4129_v51 = vmax.f32 %v3973_v25, %v4098_v53  ;;  %v4100_v7 = vpop.f32.mrb[133].mxu1 }
 0x660   :  { %v4357_v5 = vld [vmem:[#allocation4 + $0x6] sm:$0x1]  ;;  %v4365_v52 = vld [vmem:[#allocation4 + $0x7] sm:$0x1]  ;;  %v4222_v10 = vld [vmem:[#allocation4 + $0x2] sm:$0x1] }
 0x661   :  { %4138 = vst.msk [vmem:[#allocation4 + $0x10] sm:$0xff] %vm4135_vm8, %v4129_v51  ;;  %v4373_v18 = vmax.f32 %v4357_v5, %v4365_v52  ;;  %v4230_v14 = vld [vmem:[#allocation4 + $0x3] sm:$0x1]  ;;  %v4290_v2 = vld [vmem:[#allocation4 + $0x4] sm:$0x1] }
 0x662   :  { %v4298_v21 = vld [vmem:[#allocation4 + $0x5] sm:$0x1]  ;;  %v4103_v24 = vpop.f32.mrb[134].mxu1  ;;  %v4238_v50 = vmax.f32 %v4222_v10, %v4230_v14  ;;  %v4145_v40 = vld [vmem:[#allocation4] sm:$0x1] }
 0x663   :  { %v4306_v6 = vmax.f32 %v4290_v2, %v4298_v21  ;;  %v4130_v55 = vmax.f32 %v3978_v31, %v4103_v24  ;;  %v4105_v39 = vpop.f32.mrb[135].mxu1  ;;  %v8509_v17 = vadd.f32 %v8505_v33, %v4373_v18  ;;  %v4153_v54 = vld [vmem:[#allocation4 + $0x1] sm:$0x1] }
 0x664   :  { %v4358_v43 = vld [vmem:[#allocation4 + $0xe] sm:$0x1]  ;;  %v4366_v22 = vld [vmem:[#allocation4 + $0xf] sm:$0x1]  ;;  %v4223_v28 = vld [vmem:[#allocation4 + $0xa] sm:$0x1]  ;;  %v8512_v32 = vadd.f32 %v8505_v33, %v4238_v50  ;;  %v4161_v15 = vmax.f32 %v4145_v40, %v4153_v54 }
 0x665   :  { %4139 = vst.msk [vmem:[#allocation4 + $0x18] sm:$0xff] %vm4135_vm8, %v4130_v55  ;;  %v4374_v36 = vmax.f32 %v4358_v43, %v4366_v22  ;;  %v4231_v60 = vld [vmem:[#allocation4 + $0xb] sm:$0x1]  ;;  %v4291_v34 = vld [vmem:[#allocation4 + $0xc] sm:$0x1]  ;;  %v8516_v38 = vadd.f32 %v8505_v33, %v4306_v6  ;;  %v4389_v42 = vmax.f32 %v8509_v17, 0.0 }
 0x666   :  { %v4108_v16 = vpop.f32.mrb[136].mxu1  ;;  %v4239_v56 = vmax.f32 %v4223_v28, %v4231_v60  ;;  %v4299_v11 = vld [vmem:[#allocation4 + $0xd] sm:$0x1]  ;;  %v4254_v37 = vmax.f32 %v8512_v32, 0.0  ;;  %v4146_v61 = vld [vmem:[#allocation4 + $0x8] sm:$0x1]  ;;  %v8535_v24 = vadd.f32 %v8505_v33, %v4161_v15 }
 0x667   :  { %v4131_v58 = vmax.f32 %v8492_v30, %v4108_v16  ;;  %v4110_v9 = vpop.f32.mrb[137].mxu1  ;;  %v4382_v57 = vadd.f32 %v8505_v33, %v4374_v36  ;;  %v4307_v48 = vmax.f32 %v4291_v34, %v4299_v11  ;;  %v4154_v63 = vld [vmem:[#allocation4 + $0x9] sm:$0x1]  ;;  %v4322_v31 = vmax.f32 %v8516_v38, 0.0 }
 0x668   :  { %v4359_v44 = vld [vmem:[#allocation4 + $0x16] sm:$0x1]  ;;  %v4367_v19 = vld [vmem:[#allocation4 + $0x17] sm:$0x1]  ;;  %v4224_v8 = vld [vmem:[#allocation4 + $0x12] sm:$0x1]  ;;  %v4247_v35 = vadd.f32 %v8505_v33, %v4239_v56  ;;  %v4162_v1 = vmax.f32 %v4146_v61, %v4154_v63 }
 0x669   :  { %4140 = vst.msk [vmem:[#allocation4 + $0x20] sm:$0xff] %vm4135_vm8, %v4131_v58  ;;  %v4375_v12 = vmax.f32 %v4359_v44, %v4367_v19  ;;  %v4390_v13 = vmax.f32 %v4382_v57, 0.0  ;;  %v4232_v25 = vld [vmem:[#allocation4 + $0x13] sm:$0x1]  ;;  %v4292_v23 = vld [vmem:[#allocation4 + $0x14] sm:$0x1]  ;;  %v8526_v49 = vadd.f32 %v8505_v33, %v4307_v48 }
 0x66a   :  { %v4113_v30 = vpop.f32.mrb[138].mxu1  ;;  %v4240_v20 = vmax.f32 %v4224_v8, %v4232_v25  ;;  %v4255_v27 = vmax.f32 %v4247_v35, 0.0  ;;  %v4300_v59 = vld [vmem:[#allocation4 + $0x15] sm:$0x1]  ;;  %v8530_v53 = vld [vmem:[#allocation4 + $0x10] sm:$0x1]  ;;  %v8544_v56 = vadd.f32 %v8505_v33, %v4162_v1 }
 0x66b   :  { %v4132_v0 = vmax.f32 %v8494_v62, %v4113_v30  ;;  %v4115_v47 = vpop.f32.mrb[139].mxu1  ;;  %v4383_v4 = vadd.f32 %v8505_v33, %v4375_v12  ;;  %v4405_v45 = vrot.slane %v4390_v13, 7  ;;  %v4308_v29 = vmax.f32 %v4292_v23, %v4300_v59  ;;  %v4155_v51 = vld [vmem:[#allocation4 + $0x11] sm:$0x1] }
 0x66c   :  { %v4360_v7 = vld [vmem:[#allocation4 + $0x1e] sm:$0x1]  ;;  %v4368_v5 = vld [vmem:[#allocation4 + $0x1f] sm:$0x1]  ;;  %v4225_v52 = vld [vmem:[#allocation4 + $0x1a] sm:$0x1]  ;;  %v4248_v10 = vadd.f32 %v8505_v33, %v4240_v20  ;;  %v4163_v48 = vmax.f32 %v8530_v53, %v4155_v51 }
 0x66d   :  { %4141 = vst.msk [vmem:[#allocation4 + $0x28] sm:$0xff] %vm4135_vm8, %v4132_v0  ;;  %v4376_v18 = vmax.f32 %v4360_v7, %v4368_v5  ;;  %v4391_v14 = vmax.f32 %v4383_v4, 0.0  ;;  %v4233_v2 = vld [vmem:[#allocation4 + $0x1b] sm:$0x1]  ;;  %v4270_v62 = vrot.slane %v4255_v27, 7  ;;  %v8538_v43 = vadd.f32 %v8505_v33, %v4308_v29 }
 0x66e   :  { %v4293_v21 = vld [vmem:[#allocation4 + $0x1c] sm:$0x1]  ;;  %v4118_v50 = vpop.f32.mrb[140].mxu1  ;;  %v4241_v6 = vmax.f32 %v4225_v52, %v4233_v2  ;;  %v4256_v55 = vmax.f32 %v4248_v10, 0.0  ;;  %v4301_v39 = vld [vmem:[#allocation4 + $0x1d] sm:$0x1]  ;;  %v4406_v58 = vsel %vm4200_vm9, %v4405_v45, %v4389_v42 }
 0x66f   :  { %v4323_v22 = vmax.f32 %v8526_v49, 0.0  ;;  %v4133_v28 = vmax.f32 %v8496_v46, %v4118_v50  ;;  %v4120_v36 = vpop.f32.mrb[141].mxu1  ;;  %v4384_v60 = vadd.f32 %v8505_v33, %v4376_v18  ;;  %v4407_v34 = vrot.slane %v4391_v14, 6  ;;  %v4148_v40 = vld [vmem:[#allocation4 + $0x18] sm:$0x1] }
 0x670   :  { %v4156_v16 = vld [vmem:[#allocation4 + $0x19] sm:$0x1]  ;;  %v4361_v11 = vld [vmem:[#allocation4 + $0x26] sm:$0x1]  ;;  %v4369_v54 = vld [vmem:[#allocation4 + $0x27] sm:$0x1]  ;;  %v4249_v57 = vadd.f32 %v8505_v33, %v4241_v6  ;;  %v4309_v46 = vmax.f32 %v4293_v21, %v4301_v39  ;;  %v4271_v19 = vsel %vm4200_vm9, %v4270_v62, %v4254_v37 }
 0x671   :  { %v4226_v9 = vld [vmem:[#allocation4 + $0x22] sm:$0x1]  ;;  %4142 = vst.msk [vmem:[#allocation4 + $0x30] sm:$0xff] %vm4135_vm8, %v4133_v28  ;;  %v4377_v61 = vmax.f32 %v4361_v11, %v4369_v54  ;;  %v4392_v63 = vmax.f32 %v4384_v60, 0.0  ;;  %v4234_v44 = vld [vmem:[#allocation4 + $0x23] sm:$0x1]  ;;  %v4164_v23 = vmax.f32 %v4148_v40, %v4156_v16  ;;  %v4408_v47 = vsel %vm4203_vm10, %v4407_v34, %v4406_v58 }
 0x672   :  { %v4272_v8 = vrot.slane %v4256_v55, 6  ;;  %v4294_v35 = vld [vmem:[#allocation4 + $0x24] sm:$0x1]  ;;  %v4123_v17 = vpop.f32.mrb[142].mxu1  ;;  %v4242_v12 = vmax.f32 %v4226_v9, %v4234_v44  ;;  %v4257_v42 = vmax.f32 %v4249_v57, 0.0  ;;  %v4324_v25 = vmax.f32 %v8538_v43, 0.0 }
 0x673   :  { %v4302_v13 = vld [vmem:[#allocation4 + $0x25] sm:$0x1]  ;;  %v4134_v15 = vmax.f32 %v8498_v41, %v4123_v17  ;;  %v4125_v30 = vpop.f32.mrb[143].mxu1  ;;  %v4385_v20 = vadd.f32 %v8505_v33, %v4377_v61  ;;  %v4409_v27 = vrot.slane %v4392_v63, 5  ;;  %v8559_v59 = vadd.f32 %v8505_v33, %v4309_v46  ;;  %v4149_v32 = vld [vmem:[#allocation4 + $0x20] sm:$0x1] }
 0x674   :  { %v4157_v37 = vld [vmem:[#allocation4 + $0x21] sm:$0x1]  ;;  %v4362_v1 = vld [vmem:[#allocation4 + $0x2e] sm:$0x1]  ;;  %v4370_v0 = vld [vmem:[#allocation4 + $0x2f] sm:$0x1]  ;;  %v4250_v45 = vadd.f32 %v8505_v33, %v4242_v12  ;;  %v4310_v29 = vmax.f32 %v4294_v35, %v4302_v13  ;;  %v8564_v41 = vadd.f32 %v8505_v33, %v4163_v48  ;;  %v4273_v5 = vsel %vm4203_vm10, %v4272_v8, %v4271_v19 }
 0x675   :  { %v4227_v4 = vld [vmem:[#allocation4 + $0x2a] sm:$0x1]  ;;  %4143 = vst.msk [vmem:[#allocation4 + $0x38] sm:$0xff] %vm4135_vm8, %v4134_v15  ;;  %v4378_v53 = vmax.f32 %v4362_v1, %v4370_v0  ;;  %v4393_v51 = vmax.f32 %v4385_v20, 0.0  ;;  %v4235_v7 = vld [vmem:[#allocation4 + $0x2b] sm:$0x1]  ;;  %v4165_v21 = vmax.f32 %v4149_v32, %v4157_v37  ;;  %v8569_v50 = vadd.f32 %v8505_v33, %v4164_v23 }
 0x676   :  { %v4274_v52 = vrot.slane %v4257_v42, 5  ;;  %v4295_v10 = vld [vmem:[#allocation4 + $0x2c] sm:$0x1]  ;;  %v4243_v18 = vmax.f32 %v4227_v4, %v4235_v7  ;;  %v4258_v14 = vmax.f32 %v4250_v45, 0.0  ;;  %v4303_v2 = vld [vmem:[#allocation4 + $0x2d] sm:$0x1]  ;;  %v8573_v39 = vadd.f32 %v8505_v33, %v4310_v29 }
 0x677   :  { %v4150_v62 = vld [vmem:[#allocation4 + $0x28] sm:$0x1]  ;;  %v4386_v6 = vadd.f32 %v8505_v33, %v4378_v53  ;;  %v4411_v55 = vrot.slane %v4393_v51, 4  ;;  %v4325_v28 = vmax.f32 %v8559_v59, 0.0  ;;  %v4158_v36 = vld [vmem:[#allocation4 + $0x29] sm:$0x1]  ;;  %v4410_v40 = vsel %vm4206_vm11, %v4409_v27, %v4408_v47 }
 0x678   :  { %v4363_v60 = vld [vmem:[#allocation4 + $0x36] sm:$0x1]  ;;  %v4371_v34 = vld [vmem:[#allocation4 + $0x37] sm:$0x1]  ;;  %v4228_v16 = vld [vmem:[#allocation4 + $0x32] sm:$0x1]  ;;  %v4251_v11 = vadd.f32 %v8505_v33, %v4243_v18  ;;  %v4275_v54 = vsel %vm4206_vm11, %v4274_v52, %v4273_v5  ;;  %v4311_v58 = vmax.f32 %v4295_v10, %v4303_v2  ;;  %v4166_v63 = vmax.f32 %v4150_v62, %v4158_v36 }
 0x679   :  { %v4379_v9 = vmax.f32 %v4363_v60, %v4371_v34  ;;  %v4394_v57 = vmax.f32 %v4386_v6, 0.0  ;;  %v4236_v46 = vld [vmem:[#allocation4 + $0x33] sm:$0x1]  ;;  %v4276_v48 = vrot.slane %v4258_v14, 4  ;;  %v4296_v61 = vld [vmem:[#allocation4 + $0x34] sm:$0x1]  ;;  %v4412_v44 = vsel %vm4209_vm12, %v4411_v55, %v4410_v40 }
 0x67a   :  { %v4244_v19 = vmax.f32 %v4228_v16, %v4236_v46  ;;  %v4259_v8 = vmax.f32 %v4251_v11, 0.0  ;;  %v4304_v35 = vld [vmem:[#allocation4 + $0x35] sm:$0x1]  ;;  %v4151_v17 = vld [vmem:[#allocation4 + $0x30] sm:$0x1]  ;;  %v8581_v12 = vadd.f32 %v8505_v33, %v4165_v21  ;;  %v4326_v15 = vmax.f32 %v8573_v39, 0.0 }
 0x67b   :  { %v4387_v42 = vadd.f32 %v8505_v33, %v4379_v9  ;;  %v4413_v13 = vrot.slane %v4394_v57, 3  ;;  %v4312_v23 = vmax.f32 %v4296_v61, %v4304_v35  ;;  %v4159_v30 = vld [vmem:[#allocation4 + $0x31] sm:$0x1]  ;;  %v4465_v20 = vld [vmem:[%s8710_s9 + $0x120] sm:$0xff]  ;;  %v4466_v27 = vld [vmem:[%s8710_s9 + $0x128] sm:$0xff]  ;;  %v4277_v47 = vsel %vm4209_vm12, %v4276_v48, %v4275_v54 }
 0x67c   :  { %v4364_v32 = vld [vmem:[#allocation4 + $0x3e] sm:$0x1]  ;;  %v4372_v37 = vld [vmem:[#allocation4 + $0x3f] sm:$0x1]  ;;  %v4229_v1 = vld [vmem:[#allocation4 + $0x3a] sm:$0x1]  ;;  %v4252_v0 = vadd.f32 %v8505_v33, %v4244_v19  ;;  %v4319_v4 = vadd.f32 %v8505_v33, %v4311_v58  ;;  %v5590_v45 = vpack.c.bf16 %v4466_v27, %v4465_v20  ;;  %v4167_v5 = vmax.f32 %v4151_v17, %v4159_v30 }
 0x67d   :  { %v4380_v29 = vmax.f32 %v4364_v32, %v4372_v37  ;;  %v4395_v53 = vmax.f32 %v4387_v42, 0.0  ;;  %v4237_v51 = vld [vmem:[#allocation4 + $0x3b] sm:$0x1]  ;;  %v4297_v7 = vld [vmem:[#allocation4 + $0x3c] sm:$0x1]  ;;  %v8595_v52 = vadd.f32 %v8505_v33, %v4166_v63  ;;  %v4278_v14 = vrot.slane %v4259_v8, 3 }
 0x67e   :  { %v4245_v10 = vmax.f32 %v4229_v1, %v4237_v51  ;;  %v4260_v18 = vmax.f32 %v4252_v0, 0.0  ;;  %v4305_v2 = vld [vmem:[#allocation4 + $0x3d] sm:$0x1]  ;;  %v4320_v62 = vadd.f32 %v8505_v33, %v4312_v23  ;;  %5591 = vmatpush3.bf16.msra.mxu1 %v5590_v45  ;;  %v4414_v6 = vsel %vm4212_vm13, %v4413_v13, %v4412_v44  ;;  %v4160_v23 = vld [vmem:[#allocation4 + $0x39] sm:$0x1]  ;;  %v4459_v32 = vld [vmem:[%s8710_s9 + $0xf0] sm:$0xff] }
 0x67f   :  { %v4388_v21 = vadd.f32 %v8505_v33, %v4380_v29  ;;  %v4415_v55 = vrot.slane %v4395_v53, 2  ;;  %v4313_v39 = vmax.f32 %v4297_v7, %v4305_v2  ;;  %5592 = vmatprep.subr.bf16.mxu1 %v5877_v26  ;;  %v4327_v34 = vmax.f32 %v4319_v4, 0.0  ;;  %v4443_v1 = vld [vmem:[%s8710_s9 + $0x70] sm:$0xff]  ;;  %v4468_v29 = vld [vmem:[%s8710_s9 + $0x138] sm:$0xff] }
 0x680   :  { %v4253_v36 = vadd.f32 %v8505_v33, %v4245_v10  ;;  %v4280_v60 = vrot.slane %v4260_v18, 2  ;;  %v4338_v40 = vrot.slane %v4323_v22, 7  ;;  %v4328_v54 = vmax.f32 %v4320_v62, 0.0  ;;  %v4467_v45 = vld [vmem:[%s8710_s9 + $0x130] sm:$0xff] }
 0x681   :  { %v4396_v16 = vmax.f32 %v4388_v21, 0.0  ;;  %v4321_v11 = vadd.f32 %v8505_v33, %v4313_v39  ;;  %v4340_v58 = vrot.slane %v4324_v25, 6  ;;  %v4416_v9 = vsel %vm4215_vm14, %v4415_v55, %v4414_v6 }
 0x682   :  { %v4261_v57 = vmax.f32 %v4253_v36, 0.0  ;;  %v4279_v46 = vsel %vm4212_vm13, %v4278_v14, %v4277_v47  ;;  %v4342_v48 = vrot.slane %v4325_v28, 5  ;;  %v4339_v49 = vsel %vm4200_vm9, %v4338_v40, %v4322_v31  ;;  %v4152_v28 = vld [vmem:[#allocation4 + $0x38] sm:$0x1] }
 0x683   :  { %v4417_v61 = vrot.slane %v4396_v16, 1  ;;  %v4329_v63 = vmax.f32 %v4321_v11, 0.0  ;;  %v4344_v22 = vrot.slane %v4326_v15, 4  ;;  %v4281_v44 = vsel %vm4215_vm14, %v4280_v60, %v4279_v46  ;;  %v4621_v46 = vld [vmem:[%s8712_s11 + $0x8] sm:$0xff] }
 0x684   :  { %v4282_v19 = vrot.slane %v4261_v57, 1  ;;  %v4341_v43 = vsel %vm4203_vm10, %v4340_v58, %v4339_v49  ;;  %v4346_v25 = vrot.slane %v4327_v34, 3  ;;  %v4348_v17 = vrot.slane %v4328_v54, 2  ;;  %v4620_v57 = vld [vmem:[%s8712_s11] sm:$0xff] }
 0x685   :  { %v4418_v8 = vsel %vm4218_vm15, %v4417_v61, %v4416_v9  ;;  %v4343_v35 = vsel %vm4206_vm11, %v4342_v48, %v4341_v43  ;;  %v4181_v59 = vadd.f32 %v8505_v33, %v4167_v5  ;;  %v4350_v31 = vrot.slane %v4329_v63, 1  ;;  %v4622_v48 = vld [vmem:[%s8712_s11 + $0x10] sm:$0xff]  ;;  %v4623_v63 = vld [vmem:[%s8712_s11 + $0x18] sm:$0xff] }
 0x686   :  { %4419 = vrot.lane.b32.xlu1 %v4418_v8, %s5878_s24  ;;  %v4283_v38 = vsel %vm4218_vm15, %v4282_v19, %v4281_v44  ;;  %v4184_v42 = vmax.f32 %v8544_v56, 0.0  ;;  %v4185_v13 = vmax.f32 %v8564_v41, 0.0  ;;  %v4345_v15 = vsel %vm4209_vm12, %v4344_v22, %v4343_v35  ;;  %v4460_v56 = vld [vmem:[%s8710_s9 + $0xf8] sm:$0xff]  ;;  %v4625_v22 = vld [vmem:[%s8712_s11 + $0x28] sm:$0xff]  ;;  %v4626_v44 = vld [vmem:[%s8712_s11 + $0x30] sm:$0xff] }
 0x687   :  { %4284 = vrot.lane.b32.xlu0 %v4283_v38, %s5879_s25  ;;  %v4186_v30 = vmax.f32 %v8569_v50, 0.0  ;;  %v4187_v20 = vmax.f32 %v8581_v12, 0.0  ;;  %v4188_v27 = vmax.f32 %v8595_v52, 0.0  ;;  %v4347_v41 = vsel %vm4212_vm13, %v4346_v25, %v4345_v15  ;;  %v4444_v50 = vld [vmem:[%s8710_s9 + $0x78] sm:$0xff] }
 0x688   :  { %v4199_v37 = vrot.slane %v4184_v42, 7  ;;  %v4349_v12 = vsel %vm4215_vm14, %v4348_v17, %v4347_v41  ;;  %v4183_v0 = vmax.f32 %v8535_v24, 0.0  ;;  %v4189_v47 = vmax.f32 %v4181_v59, 0.0  ;;  %v4627_v43 = vld [vmem:[%s8712_s11 + $0x38] sm:$0xff]  ;;  %v5116_v59 = vld [vmem:[%s8713_s10] ss:$0 sm:$0xff] }
 0x689   :  { %v4202_v4 = vrot.slane %v4185_v13, 6  ;;  %v4351_v53 = vsel %vm4218_vm15, %v4350_v31, %v4349_v12  ;;  %v4205_v51 = vrot.slane %v4186_v30, 5  ;;  %v4168_v7 = vmax.f32 %v4152_v28, %v4160_v23 }
 0x68a   :  { %v5579_v5 = vpack.c.bf16 %v4460_v56, %v4459_v32  ;;  %v4208_v52 = vrot.slane %v4187_v20, 4  ;;  %v4211_v10 = vrot.slane %v4188_v27, 3  ;;  %v5581_v24 = vpack.c.bf16 %v4444_v50, %v4443_v1 }
 0x68b   :  { %4352 = vrot.lane.b32.xlu0 %v4351_v53, %s5880_s17  ;;  %v4201_v18 = vsel %vm4200_vm9, %v4199_v37, %v4183_v0  ;;  %v4182_v14 = vadd.f32 %v8505_v33, %v4168_v7  ;;  %v5593_v2 = vpack.c.bf16 %v4468_v29, %v4467_v45  ;;  %v4214_v21 = vrot.slane %v4189_v47, 2 }
 0x68c   :  { %5580 = vmatprep.subr.bf16.mxu0 %v5579_v5  ;;  %v4204_v62 = vsel %vm4203_vm10, %v4202_v4, %v4201_v18  ;;  %v5596_v61 = vpack.c.bf16 %v4621_v46, %v4620_v57  ;;  %v5599_v49 = vpack.c.bf16 %v4623_v63, %v4622_v48  ;;  %v5605_v25 = vpack.c.bf16 %v4627_v43, %v4626_v44 }
 0x68d   :  { %5582 = vmatpush3.bf16.msra.mxu0 %v5581_v24  ;;  %v4207_v6 = vsel %vm4206_vm11, %v4205_v51, %v4204_v62  ;;  %v4190_v55 = vmax.f32 %v4182_v14, 0.0  ;;  %5594 = vmatpush3.bf16.msra.mxu1 %v5593_v2  ;;  %v4709_v23 = vlaneseq }
 0x68e   :  { %5595 = vmatprep.subr.bf16.mxu0 %v5877_v26  ;;  %v4210_v39 = vsel %vm4209_vm12, %v4208_v52, %v4207_v6 }
 0x68f   :  { %v4213_v33 = vsel %vm4212_vm13, %v4211_v10, %v4210_v39  ;;  %v4217_v36 = vrot.slane %v4190_v55, 1  ;;  %v4710_v15 = vand.u32 127, %v4709_v23 }
 0x690   :  { %v4216_v60 = vsel %vm4215_vm14, %v4214_v21, %v4213_v33 }
 0x691   :  { %v4219_v34 = vsel %vm4218_vm15, %v4217_v36, %v4216_v60  ;;  %vm4711_vm5 = vcmp.lt.s32.totalorder %v4710_v15, 10 }
 0x692   :  { %4221 = vst.msk [vmem:[#allocation5] sm:$0xff] %vm4135_vm8, %v4219_v34 }
 0x6f8   :  { %v4420_v40 = vpop.permute.xlu1 %4419 }
 0x6f9   :  { %4425 = vst.msk [vmem:[#allocation5 + $0x10] sm:$0xff] %vm4424_vm1, %v4420_v40  ;;  %v4285_v16 = vpop.permute.xlu0 %4284 }
 0x6fa   :  { %4288 = vst.msk [vmem:[#allocation5] sm:$0xff] %vm4287_vm2, %v4285_v16 }
 0x6fb   :  { %4289 = vst.msk [vmem:[#allocation5 + $0x8] sm:$0xff] %vm3872_vm7, %v4285_v16 }
 0x6fd   :  { %v4353_v11 = vpop.permute.xlu0 %4352 }
 0x6fe   :  { %4356 = vst.msk [vmem:[#allocation5 + $0x8] sm:$0xff] %vm4355_vm3, %v4353_v11 }
 0x6ff   :  { %4423 = vst.msk [vmem:[#allocation5 + $0x8] sm:$0xff] %vm4422_vm4, %v4420_v40 }
 0x700   :  { %v4428_v54 = vld [vmem:[#allocation5 + $0x10] sm:$0xff] }
 0x701   :  { %5190 = vmatmul.mubr.msk.f32.vlgmr.msra.gmra.mrb[144].mxu1 %vm4424_vm1, %v4428_v54  ;;  %v4426_v9 = vld [vmem:[#allocation5] sm:$0xff] }
 0x706   :  { %v4427_v58 = vld [vmem:[#allocation5 + $0x8] sm:$0xff] }
 0x707   :  { %4543 = vmatprep.mubr.f32.mxu0 %v4427_v58 }
 0x708   :  { %4544 = vmatmul.mubr.f32.vlgmr.msra.gmra.mrb[48].mxu0 %v4426_v9 }
 0x709   :  { %5208 = vmatprep.mubr.msk.f32.mxu0 %vm5881_vm0, %v5875_v3  ;;  %5597 = vmatpush3.bf16.msra.mxu0 %v5596_v61  ;;  %v4624_v3 = vld [vmem:[%s8712_s11 + $0x20] sm:$0xff] }
 0x70a   :  { %5598 = vmatprep.subr.bf16.mxu0 %v5877_v26  ;;  %v5602_v19 = vpack.c.bf16 %v4625_v22, %v4624_v3 }
 0x70d   :  { %5600 = vmatpush3.bf16.msra.mxu0 %v5599_v49 }
 0x70e   :  { %5601 = vmatprep.subr.bf16.mxu0 %v5877_v26 }
 0x711   :  { %5603 = vmatpush3.bf16.msra.mxu0 %v5602_v19 }
 0x712   :  { %5604 = vmatprep.subr.bf16.mxu0 %v5877_v26  ;;  %v5118_v26 = vld [vmem:[%s8714_s12] ss:$0 sm:$0xff] }
 0x715   :  { %5606 = vmatpush3.bf16.msra.mxu0 %v5605_v25 }
 0x7d4   :  { %v4615_v8 = vpop.f32.mrb[144].mxu1 }
 0x7d5   :  { %v5191_v35 = vpop.f32.mrb[145].mxu1 }
 0x7db   :  { %v5152_v17 = vpop.f32.mrb[48].mxu0 }
 0x7dc   :  { %v5153_v28 = vpop.f32.mrb[49].mxu0 }
 0x7dd   :  { %v5154_v38 = vadd.f32 %v5153_v28, %v5152_v17 }
 0x7df   :  { %v4546_v31 = vadd.f32 %v5154_v38, %v5116_v59 }
 0x7e1   :  { %v4616_v42 = vadd.f32 %v4615_v8, %v4546_v31 }
 0x7e3   :  { %v4619_v13 = vmax.f32 %v4616_v42, 0.0 }
 0x7e5   :  { %5209 = vmatmul.mubr.msk.f32.vlgmr.msra.gmra.mrb[50].mxu0 %vm4424_vm1, %v4619_v13 }
 0x8b8   :  { %v4704_v30 = vpop.f32.mrb[50].mxu0 }
 0x8b9   :  { %v4705_v20 = vadd.f32 %v5118_v26, %v4704_v30  ;;  %v5210_v27 = vpop.f32.mrb[51].mxu0 }
 0x8bb   :  { %v4708_v32 = vmax.f32 %v4705_v20, 0.0 }
 0x8bd   :  { %v4712_v56 = vsel %vm4711_vm5, %v4708_v32, -1e+30 }
 0x8be   :  { %4713 = vmax.xlane.f32.xlu1 %v4712_v56 }
 0x94b   :  { %v4714_v41 = vpop.xlane.xlu1 %4713 }
 0x94c   :  { %v4715_v37 = vsub.f32 %v4712_v56, %v4714_v41 }
 0x94e   :  { %v4716_v1 = vmul.f32 1.442695, %v4715_v37 }
 0x950   :  { %5870 = vpow2.f32 %v4716_v1 }
 0x95a   :  { %v5871_v50 = vpop.eup %5870 }
 0x95b   :  { %4718 = vadd.xlane.f32.xlu0 %v5871_v50 }
 0x9e8   :  { %v4719_v12 = vpop.xlane.xlu0 %4718 }
 0x9e9   :  { %5872 = vlog2.f32 %v4719_v12 }
 0x9f3   :  { %v5873_v0 = vpop.eup %5872 }
 0x9f4   :  { %v4721_v47 = vmul.f32 0.6931472, %v5873_v0 }
 0x9f6   :  { %v4722_v4 = vsub.f32 %v4715_v37, %v4721_v47 }
 0x9f8   :  { %4723 = vst [vmem:[%s8715_s13] sm:$0xff] %v4722_v4 }

</bundles_post_ra>
